<compile_context>
chip_gen: v6e
topology: v6e:2x2x1
jax: 0.10.0
libtpu: 0.0.40
codegen_flags: <defaults>
</compile_context>

<pallas_src>
import jax
import jax.numpy as jnp
from jax.experimental import pallas as pl
from jax.experimental.pallas import tpu as pltpu

LANE = 128
NUM_CLASSES = 10
_VMEM_LIMIT = 32 * 1024 * 1024   # safe on v5e/v6e/v7x; blocks stay well under


def _largest_divisor(n, cap):
    for d in range(min(n, cap), 0, -1):
        if n % d == 0:
            return d
    return 1


def _fc_row_block(b, cap=128):
    if b <= cap:
        return b                        # full extent (always legal)
    for d in range(cap - cap % 8, 7, -8):   # multiple of 8 dividing b
        if b % d == 0:
            return d
    return b


# ---------------------------------------------------------------------------
# Pallas kernels
# ---------------------------------------------------------------------------

def _conv_relu_pool_kernel(p_ref, w_ref, b_ref, o_ref):
    """Fused Conv2d(3x3, stride 1, pad 1) + bias + ReLU + MaxPool(2x2).

    p_ref : (Bblk, 4, Npool, K)  bf16 im2col patches (axis 1 = 2x2 pool offsets)
    w_ref : (K, 128)             bf16 conv weights, Cout zero-padded to 128
    b_ref : (1, 128)             f32  conv bias,    Cout zero-padded to 128
    o_ref : (Bblk, Npool, 128)   f32  pooled output (lane-dense)
    """
    bblk, _, npool, k = p_ref.shape
    cpad = o_ref.shape[-1]
    # Single MXU matmul with batch and the 4 pool offsets folded into M.
    p2 = p_ref[...].reshape(bblk * 4 * npool, k)
    z = jnp.dot(p2, w_ref[...], preferred_element_type=jnp.float32)
    z = z.reshape(bblk, 4, npool, cpad)
    # 2x2 max-pool (3 VPU maxes), then bias + ReLU (commute with the max).
    pooled = jnp.maximum(jnp.maximum(z[:, 0], z[:, 1]),
                         jnp.maximum(z[:, 2], z[:, 3]))
    o_ref[...] = jnp.maximum(pooled + b_ref[...], 0.0).astype(o_ref.dtype)


def _fc_kernel(x_ref, w1_ref, b1_ref, w2_ref, b2_ref, o_ref):
    """Linear(1024->512) + ReLU + (Dropout as identity) + Linear(512->10 pad 128)."""
    h = jnp.dot(x_ref[...], w1_ref[...], preferred_element_type=jnp.float32)
    h = jnp.maximum(h + b1_ref[...], 0.0)
    # TODO(synk): nn.Dropout(p=0.5) is treated as inference-mode identity.
    o = jnp.dot(h.astype(w2_ref.dtype), w2_ref[...],
                preferred_element_type=jnp.float32) + b2_ref[...]
    o_ref[...] = o.astype(o_ref.dtype)


# ---------------------------------------------------------------------------
# Glue (plain JAX) + wrappers
# ---------------------------------------------------------------------------

def _pool_patches(x_nhwc):
    """(B,H,W,Cin) -> (B, 4, Ho*Wo, 9*Cin) im2col patches, pool offsets on axis 1.

    Built with strided slices: no 6-D transpose. Feature index = (3*kh+kw)*Cin + c.
    """
    B, H, W, Cin = x_nhwc.shape
    Ho, Wo = H // 2, W // 2
    xp = jnp.pad(x_nhwc, ((0, 0), (1, 1), (1, 1), (0, 0)))
    groups = []
    for di in range(2):
        for dj in range(2):
            taps = [xp[:, di + kh: di + kh + H: 2, dj + kw: dj + kw + W: 2, :]
                    for kh in range(3) for kw in range(3)]    # each (B,Ho,Wo,Cin)
            g = jnp.concatenate(taps, axis=-1)                # (B,Ho,Wo,9*Cin)
            groups.append(g.reshape(B, Ho * Wo, 9 * Cin))
    return jnp.stack(groups, axis=1)                          # (B,4,Npool,K)


def conv_relu_pool(x_nhwc, w_mat, b_mat, cout, blk_cap=32):
    """x_nhwc: (B,H,W,Cin) f32; w_mat: (9*Cin,128) bf16; b_mat: (1,128) f32."""
    B, H, W, Cin = x_nhwc.shape
    Ho, Wo = H // 2, W // 2
    Npool, K = Ho * Wo, 9 * Cin

    patches = _pool_patches(x_nhwc).astype(jnp.bfloat16)
    bblk = _largest_divisor(B, blk_cap)          # images per grid step

    out = pl.pallas_call(
        _conv_relu_pool_kernel,
        out_shape=jax.ShapeDtypeStruct((B, Npool, LANE), jnp.float32),
        grid_spec=pltpu.PrefetchScalarGridSpec(
            num_scalar_prefetch=0,
            grid=(B // bblk,),
            in_specs=[
                pl.BlockSpec((bblk, 4, Npool, K), lambda b: (b, 0, 0, 0)),
                pl.BlockSpec((K, LANE), lambda b: (0, 0)),
                pl.BlockSpec((1, LANE), lambda b: (0, 0)),
            ],
            out_specs=pl.BlockSpec((bblk, Npool, LANE), lambda b: (b, 0, 0)),
        ),
        compiler_params=pltpu.CompilerParams(
            dimension_semantics=("parallel",),
            vmem_limit_bytes=_VMEM_LIMIT),
    )(patches, w_mat, b_mat)

    return out[:, :, :cout].reshape(B, Ho, Wo, cout)


def fc_forward(x_flat, w1, b1, w2, b2):
    B, F = x_flat.shape
    H1 = w1.shape[1]
    blk = _fc_row_block(B)
    x_bf = x_flat.astype(jnp.bfloat16)

    out = pl.pallas_call(
        _fc_kernel,
        out_shape=jax.ShapeDtypeStruct((B, LANE), jnp.float32),
        grid_spec=pltpu.PrefetchScalarGridSpec(
            num_scalar_prefetch=0,
            grid=(B // blk,),
            in_specs=[
                pl.BlockSpec((blk, F), lambda i: (i, 0)),
                pl.BlockSpec((F, H1), lambda i: (0, 0)),
                pl.BlockSpec((1, H1), lambda i: (0, 0)),
                pl.BlockSpec((H1, LANE), lambda i: (0, 0)),
                pl.BlockSpec((1, LANE), lambda i: (0, 0)),
            ],
            out_specs=pl.BlockSpec((blk, LANE), lambda i: (i, 0)),
        ),
        compiler_params=pltpu.CompilerParams(
            dimension_semantics=("parallel",),
            vmem_limit_bytes=_VMEM_LIMIT),
    )(x_bf, w1, b1, w2, b2)

    return out[:, :NUM_CLASSES]


def prepare_params(params):
    """One-time packing of PyTorch-layout params for the Pallas kernels."""
    def conv_pack(w, b):
        cout, cin = w.shape[0], w.shape[1]
        # (Cout,Cin,3,3) -> (K,Cout) with row index (3*kh+kw)*Cin + c, pad to 128 lanes.
        w_mat = w.transpose(2, 3, 1, 0).reshape(9 * cin, cout)
        w_mat = jnp.pad(w_mat, ((0, 0), (0, LANE - cout))).astype(jnp.bfloat16)
        b_mat = jnp.pad(b, (0, LANE - cout)).reshape(1, LANE).astype(jnp.float32)
        return w_mat, b_mat

    w1, b1 = conv_pack(params["w1"], params["b1"])
    w2, b2 = conv_pack(params["w2"], params["b2"])
    w3, b3 = conv_pack(params["w3"], params["b3"])

    # fc1: fold torch (C,H,W) flatten order into a row permutation so the conv3
    # output can be flattened directly in (H,W,C) order (no runtime transpose).
    C3, Hp, Wp = 64, 4, 4
    fw1 = params["fw1"].reshape(C3, Hp, Wp, -1).transpose(1, 2, 0, 3)
    fw1 = fw1.reshape(C3 * Hp * Wp, -1).astype(jnp.bfloat16)
    fb1 = params["fb1"].reshape(1, -1).astype(jnp.float32)

    nout = params["fw2"].shape[1]
    fw2 = jnp.pad(params["fw2"], ((0, 0), (0, LANE - nout))).astype(jnp.bfloat16)
    fb2 = jnp.pad(params["fb2"], (0, LANE - nout)).reshape(1, LANE).astype(jnp.float32)

    return {"w1": w1, "b1": b1, "w2": w2, "b2": b2, "w3": w3, "b3": b3,
            "fw1": fw1, "fb1": fb1, "fw2": fw2, "fb2": fb2}


def cnn_forward(x_nchw, prep):
    x = jnp.transpose(x_nchw, (0, 2, 3, 1)).astype(jnp.float32)  # NCHW -> NHWC
    x = conv_relu_pool(x, prep["w1"], prep["b1"], 16)   # (B, 16, 16, 16)
    x = conv_relu_pool(x, prep["w2"], prep["b2"], 32)   # (B,  8,  8, 32)
    x = conv_relu_pool(x, prep["w3"], prep["b3"], 64)   # (B,  4,  4, 64)
    B = x.shape[0]
    x = x.reshape(B, -1)     # HWC flatten; fc1 rows were permuted to match
    return fc_forward(x, prep["fw1"], prep["fb1"], prep["fw2"], prep["fb2"])


# ---------------------------------------------------------------------------
# Deterministic parameter init + pure-JAX reference (PyTorch layout/semantics)
# ---------------------------------------------------------------------------

def init_params(key):
    ks = jax.random.split(key, 8)

    def conv_init(k, cout, cin):
        bound = 1.0 / jnp.sqrt(cin * 9.0)
        return jax.random.uniform(k, (cout, cin, 3, 3), jnp.float32, -bound, bound)

    def lin_init(k, fin, fout):
        bound = 1.0 / jnp.sqrt(float(fin))
        return jax.random.uniform(k, (fin, fout), jnp.float32, -bound, bound)

    return {
        "w1": conv_init(ks[0], 16, 3),  "b1": jnp.zeros((16,), jnp.float32),
        "w2": conv_init(ks[1], 32, 16), "b2": jnp.zeros((32,), jnp.float32),
        "w3": conv_init(ks[2], 64, 32), "b3": jnp.zeros((64,), jnp.float32),
        "fw1": lin_init(ks[3], 64 * 4 * 4, 512),
        "fb1": jax.random.uniform(ks[4], (512,), jnp.float32, -0.01, 0.01),
        "fw2": lin_init(ks[5], 512, 10),
        "fb2": jax.random.uniform(ks[6], (10,), jnp.float32, -0.01, 0.01),
    }


def cnn_reference(x_nchw, params):
    """Pure-JAX f32 reference mirroring the PyTorch forward (NCHW)."""
    x = jnp.transpose(x_nchw, (0, 2, 3, 1)).astype(jnp.float32)

    def layer(x, w, b):
        w_hwio = jnp.transpose(w, (2, 3, 1, 0))
        y = jax.lax.conv_general_dilated(
            x, w_hwio, window_strides=(1, 1), padding="SAME",
            dimension_numbers=("NHWC", "HWIO", "NHWC"),
            precision=jax.lax.Precision.HIGHEST) + b[None, None, None, :]
        y = jnp.maximum(y, 0.0)
        return jax.lax.reduce_window(y, -jnp.inf, jax.lax.max,
                                     (1, 2, 2, 1), (1, 2, 2, 1), "VALID")

    x = layer(x, params["w1"], params["b1"])
    x = layer(x, params["w2"], params["b2"])
    x = layer(x, params["w3"], params["b3"])
    B = x.shape[0]
    x = jnp.transpose(x, (0, 3, 1, 2)).reshape(B, -1)   # torch (C,H,W) flatten
    h = jnp.maximum(x @ params["fw1"] + params["fb1"], 0.0)
    return h @ params["fw2"] + params["fb2"]


if __name__ == "__main__":
    key = jax.random.PRNGKey(0)
    pkey, xkey = jax.random.split(key)
    params = init_params(pkey)
    prep = prepare_params(params)    # one-time weight packing / permutation

    x = jax.random.normal(xkey, (2, 3, 32, 32), jnp.float32)  # CIFAR-10 shape

    fwd = jax.jit(cnn_forward)
    out = jax.block_until_ready(fwd(x, prep))
    assert out.shape == (2, 10), out.shape

    ref = jax.block_until_ready(cnn_reference(x, params))
    max_err = float(jnp.max(jnp.abs(out - ref)))
    assert max_err < 5e-2, f"mismatch vs reference: max_err={max_err}"

    print("KERNEL_OK")
</pallas_src>

<mosaic_0001>
module attributes {stable_mosaic.version = 11 : i64} {
  func.func @_conv_relu_pool_kernel(%arg0: i32, %arg1: memref<2x4x256x27xbf16, #tpu.memory_space<vmem>>, %arg2: memref<27x128xbf16, #tpu.memory_space<vmem>>, %arg3: memref<1x128xf32, #tpu.memory_space<vmem>>, %arg4: memref<2x256x128xf32, #tpu.memory_space<vmem>>) attributes {dimension_semantics = [#tpu.dimension_semantics<parallel>], iteration_bounds = array<i64: 1>, scalar_prefetch = 0 : i64, scratch_operands = 0 : i64, tpu.core_type = #tpu.core_type<tc>, window_params = [{transform_indices = @transform_0, window_bounds = array<i64: 2, 4, 256, 27>}, {pipeline_mode = #tpu.pipeline_mode<synchronous>, transform_indices = @transform_1, window_bounds = array<i64: 27, 128>}, {pipeline_mode = #tpu.pipeline_mode<synchronous>, transform_indices = @transform_2, window_bounds = array<i64: 1, 128>}, {transform_indices = @transform_3, window_bounds = array<i64: 2, 256, 128>}]} {
    %c0 = arith.constant 0 : index
    %c0_0 = arith.constant 0 : index
    %c0_1 = arith.constant 0 : index
    %c0_2 = arith.constant 0 : index
    %0 = vector.load %arg1[%c0, %c0_0, %c0_1, %c0_2] : memref<2x4x256x27xbf16, #tpu.memory_space<vmem>>, vector<2x4x256x27xbf16>
    %1 = vector.shape_cast %0 : vector<2x4x256x27xbf16> to vector<2048x27xbf16>
    %c0_3 = arith.constant 0 : index
    %c0_4 = arith.constant 0 : index
    %2 = vector.load %arg2[%c0_3, %c0_4] : memref<27x128xbf16, #tpu.memory_space<vmem>>, vector<27x128xbf16>
    %cst = arith.constant dense<0.000000e+00> : vector<2048x128xf32>
    %3 = tpu.matmul %1, %2, %cst {dimension_numbers = #tpu.dot_dimension_numbers<[1], [0], [0], [1], [0, 0, 1, 1], [], []>} : vector<2048x27xbf16>, vector<27x128xbf16>, vector<2048x128xf32> -> vector<2048x128xf32>
    %4 = vector.shape_cast %3 : vector<2048x128xf32> to vector<2x4x256x128xf32>
    %5 = vector.extract_strided_slice %4 {offsets = [0, 0, 0, 0], sizes = [2, 1, 256, 128], strides = [1, 1, 1, 1]} : vector<2x4x256x128xf32> to vector<2x1x256x128xf32>
    %6 = vector.shape_cast %5 : vector<2x1x256x128xf32> to vector<2x256x128xf32>
    %7 = vector.extract_strided_slice %4 {offsets = [0, 1, 0, 0], sizes = [2, 1, 256, 128], strides = [1, 1, 1, 1]} : vector<2x4x256x128xf32> to vector<2x1x256x128xf32>
    %8 = vector.shape_cast %7 : vector<2x1x256x128xf32> to vector<2x256x128xf32>
    %9 = arith.maximumf %6, %8 : vector<2x256x128xf32>
    %10 = vector.extract_strided_slice %4 {offsets = [0, 2, 0, 0], sizes = [2, 1, 256, 128], strides = [1, 1, 1, 1]} : vector<2x4x256x128xf32> to vector<2x1x256x128xf32>
    %11 = vector.shape_cast %10 : vector<2x1x256x128xf32> to vector<2x256x128xf32>
    %12 = vector.extract_strided_slice %4 {offsets = [0, 3, 0, 0], sizes = [2, 1, 256, 128], strides = [1, 1, 1, 1]} : vector<2x4x256x128xf32> to vector<2x1x256x128xf32>
    %13 = vector.shape_cast %12 : vector<2x1x256x128xf32> to vector<2x256x128xf32>
    %14 = arith.maximumf %11, %13 : vector<2x256x128xf32>
    %15 = arith.maximumf %9, %14 : vector<2x256x128xf32>
    %c0_5 = arith.constant 0 : index
    %c0_6 = arith.constant 0 : index
    %16 = vector.load %arg3[%c0_5, %c0_6] : memref<1x128xf32, #tpu.memory_space<vmem>>, vector<1x128xf32>
    %17 = vector.shape_cast %16 : vector<1x128xf32> to vector<1x1x128xf32>
    %18 = vector.broadcast %17 : vector<1x1x128xf32> to vector<2x256x128xf32>
    %19 = arith.addf %15, %18 : vector<2x256x128xf32>
    %cst_7 = arith.constant 0.000000e+00 : f32
    %20 = vector.broadcast %cst_7 : f32 to vector<2x256x128xf32>
    %21 = arith.maximumf %19, %20 : vector<2x256x128xf32>
    %c0_8 = arith.constant 0 : index
    %c0_9 = arith.constant 0 : index
    %c0_10 = arith.constant 0 : index
    %22 = vector.load %arg4[%c0_8, %c0_9, %c0_10] : memref<2x256x128xf32, #tpu.memory_space<vmem>>, vector<2x256x128xf32>
    tpu.vector_store %arg4[%c0_8, %c0_9, %c0_10], %21 {strides = array<i32>} : memref<2x256x128xf32, #tpu.memory_space<vmem>>, vector<2x256x128xf32>,
    return
  }
  func.func @transform_0(%arg0: i32) -> (i32, i32, i32, i32) {
    %c0_i32 = arith.constant 0 : i32
    %c0_i32_0 = arith.constant 0 : i32
    %c0_i32_1 = arith.constant 0 : i32
    %c0_i32_2 = arith.constant 0 : i32
    return %arg0, %c0_i32, %c0_i32_0, %c0_i32_1 : i32, i32, i32, i32
  }
  func.func @transform_1(%arg0: i32) -> (i32, i32) {
    %c0_i32 = arith.constant 0 : i32
    %c0_i32_0 = arith.constant 0 : i32
    %c0_i32_1 = arith.constant 0 : i32
    return %c0_i32, %c0_i32_0 : i32, i32
  }
  func.func @transform_2(%arg0: i32) -> (i32, i32) {
    %c0_i32 = arith.constant 0 : i32
    %c0_i32_0 = arith.constant 0 : i32
    %c0_i32_1 = arith.constant 0 : i32
    return %c0_i32, %c0_i32_0 : i32, i32
  }
  func.func @transform_3(%arg0: i32) -> (i32, i32, i32) {
    %c0_i32 = arith.constant 0 : i32
    %c0_i32_0 = arith.constant 0 : i32
    %c0_i32_1 = arith.constant 0 : i32
    return %arg0, %c0_i32, %c0_i32_0 : i32, i32, i32
  }
}

module attributes {stable_mosaic.version = 11 : i64} {
  func.func @_conv_relu_pool_kernel(%arg0: i32, %arg1: memref<2x4x64x144xbf16, #tpu.memory_space<vmem>>, %arg2: memref<144x128xbf16, #tpu.memory_space<vmem>>, %arg3: memref<1x128xf32, #tpu.memory_space<vmem>>, %arg4: memref<2x64x128xf32, #tpu.memory_space<vmem>>) attributes {dimension_semantics = [#tpu.dimension_semantics<parallel>], iteration_bounds = array<i64: 1>, scalar_prefetch = 0 : i64, scratch_operands = 0 : i64, tpu.core_type = #tpu.core_type<tc>, window_params = [{transform_indices = @transform_0, window_bounds = array<i64: 2, 4, 64, 144>}, {pipeline_mode = #tpu.pipeline_mode<synchronous>, transform_indices = @transform_1, window_bounds = array<i64: 144, 128>}, {pipeline_mode = #tpu.pipeline_mode<synchronous>, transform_indices = @transform_2, window_bounds = array<i64: 1, 128>}, {transform_indices = @transform_3, window_bounds = array<i64: 2, 64, 128>}]} {
    %c0 = arith.constant 0 : index
    %c0_0 = arith.constant 0 : index
    %c0_1 = arith.constant 0 : index
    %c0_2 = arith.constant 0 : index
    %0 = vector.load %arg1[%c0, %c0_0, %c0_1, %c0_2] : memref<2x4x64x144xbf16, #tpu.memory_space<vmem>>, vector<2x4x64x144xbf16>
    %1 = vector.shape_cast %0 : vector<2x4x64x144xbf16> to vector<512x144xbf16>
    %c0_3 = arith.constant 0 : index
    %c0_4 = arith.constant 0 : index
    %2 = vector.load %arg2[%c0_3, %c0_4] : memref<144x128xbf16, #tpu.memory_space<vmem>>, vector<144x128xbf16>
    %cst = arith.constant dense<0.000000e+00> : vector<512x128xf32>
    %3 = tpu.matmul %1, %2, %cst {dimension_numbers = #tpu.dot_dimension_numbers<[1], [0], [0], [1], [0, 0, 1, 1], [], []>} : vector<512x144xbf16>, vector<144x128xbf16>, vector<512x128xf32> -> vector<512x128xf32>
    %4 = vector.shape_cast %3 : vector<512x128xf32> to vector<2x4x64x128xf32>
    %5 = vector.extract_strided_slice %4 {offsets = [0, 0, 0, 0], sizes = [2, 1, 64, 128], strides = [1, 1, 1, 1]} : vector<2x4x64x128xf32> to vector<2x1x64x128xf32>
    %6 = vector.shape_cast %5 : vector<2x1x64x128xf32> to vector<2x64x128xf32>
    %7 = vector.extract_strided_slice %4 {offsets = [0, 1, 0, 0], sizes = [2, 1, 64, 128], strides = [1, 1, 1, 1]} : vector<2x4x64x128xf32> to vector<2x1x64x128xf32>
    %8 = vector.shape_cast %7 : vector<2x1x64x128xf32> to vector<2x64x128xf32>
    %9 = arith.maximumf %6, %8 : vector<2x64x128xf32>
    %10 = vector.extract_strided_slice %4 {offsets = [0, 2, 0, 0], sizes = [2, 1, 64, 128], strides = [1, 1, 1, 1]} : vector<2x4x64x128xf32> to vector<2x1x64x128xf32>
    %11 = vector.shape_cast %10 : vector<2x1x64x128xf32> to vector<2x64x128xf32>
    %12 = vector.extract_strided_slice %4 {offsets = [0, 3, 0, 0], sizes = [2, 1, 64, 128], strides = [1, 1, 1, 1]} : vector<2x4x64x128xf32> to vector<2x1x64x128xf32>
    %13 = vector.shape_cast %12 : vector<2x1x64x128xf32> to vector<2x64x128xf32>
    %14 = arith.maximumf %11, %13 : vector<2x64x128xf32>
    %15 = arith.maximumf %9, %14 : vector<2x64x128xf32>
    %c0_5 = arith.constant 0 : index
    %c0_6 = arith.constant 0 : index
    %16 = vector.load %arg3[%c0_5, %c0_6] : memref<1x128xf32, #tpu.memory_space<vmem>>, vector<1x128xf32>
    %17 = vector.shape_cast %16 : vector<1x128xf32> to vector<1x1x128xf32>
    %18 = vector.broadcast %17 : vector<1x1x128xf32> to vector<2x64x128xf32>
    %19 = arith.addf %15, %18 : vector<2x64x128xf32>
    %cst_7 = arith.constant 0.000000e+00 : f32
    %20 = vector.broadcast %cst_7 : f32 to vector<2x64x128xf32>
    %21 = arith.maximumf %19, %20 : vector<2x64x128xf32>
    %c0_8 = arith.constant 0 : index
    %c0_9 = arith.constant 0 : index
    %c0_10 = arith.constant 0 : index
    %22 = vector.load %arg4[%c0_8, %c0_9, %c0_10] : memref<2x64x128xf32, #tpu.memory_space<vmem>>, vector<2x64x128xf32>
    tpu.vector_store %arg4[%c0_8, %c0_9, %c0_10], %21 {strides = array<i32>} : memref<2x64x128xf32, #tpu.memory_space<vmem>>, vector<2x64x128xf32>,
    return
  }
  func.func @transform_0(%arg0: i32) -> (i32, i32, i32, i32) {
    %c0_i32 = arith.constant 0 : i32
    %c0_i32_0 = arith.constant 0 : i32
    %c0_i32_1 = arith.constant 0 : i32
    %c0_i32_2 = arith.constant 0 : i32
    return %arg0, %c0_i32, %c0_i32_0, %c0_i32_1 : i32, i32, i32, i32
  }
  func.func @transform_1(%arg0: i32) -> (i32, i32) {
    %c0_i32 = arith.constant 0 : i32
    %c0_i32_0 = arith.constant 0 : i32
    %c0_i32_1 = arith.constant 0 : i32
    return %c0_i32, %c0_i32_0 : i32, i32
  }
  func.func @transform_2(%arg0: i32) -> (i32, i32) {
    %c0_i32 = arith.constant 0 : i32
    %c0_i32_0 = arith.constant 0 : i32
    %c0_i32_1 = arith.constant 0 : i32
    return %c0_i32, %c0_i32_0 : i32, i32
  }
  func.func @transform_3(%arg0: i32) -> (i32, i32, i32) {
    %c0_i32 = arith.constant 0 : i32
    %c0_i32_0 = arith.constant 0 : i32
    %c0_i32_1 = arith.constant 0 : i32
    return %arg0, %c0_i32, %c0_i32_0 : i32, i32, i32
  }
}

module attributes {stable_mosaic.version = 11 : i64} {
  func.func @_conv_relu_pool_kernel(%arg0: i32, %arg1: memref<2x4x16x288xbf16, #tpu.memory_space<vmem>>, %arg2: memref<288x128xbf16, #tpu.memory_space<vmem>>, %arg3: memref<1x128xf32, #tpu.memory_space<vmem>>, %arg4: memref<2x16x128xf32, #tpu.memory_space<vmem>>) attributes {dimension_semantics = [#tpu.dimension_semantics<parallel>], iteration_bounds = array<i64: 1>, scalar_prefetch = 0 : i64, scratch_operands = 0 : i64, tpu.core_type = #tpu.core_type<tc>, window_params = [{transform_indices = @transform_0, window_bounds = array<i64: 2, 4, 16, 288>}, {pipeline_mode = #tpu.pipeline_mode<synchronous>, transform_indices = @transform_1, window_bounds = array<i64: 288, 128>}, {pipeline_mode = #tpu.pipeline_mode<synchronous>, transform_indices = @transform_2, window_bounds = array<i64: 1, 128>}, {transform_indices = @transform_3, window_bounds = array<i64: 2, 16, 128>}]} {
    %c0 = arith.constant 0 : index
    %c0_0 = arith.constant 0 : index
    %c0_1 = arith.constant 0 : index
    %c0_2 = arith.constant 0 : index
    %0 = vector.load %arg1[%c0, %c0_0, %c0_1, %c0_2] : memref<2x4x16x288xbf16, #tpu.memory_space<vmem>>, vector<2x4x16x288xbf16>
    %1 = vector.shape_cast %0 : vector<2x4x16x288xbf16> to vector<128x288xbf16>
    %c0_3 = arith.constant 0 : index
    %c0_4 = arith.constant 0 : index
    %2 = vector.load %arg2[%c0_3, %c0_4] : memref<288x128xbf16, #tpu.memory_space<vmem>>, vector<288x128xbf16>
    %cst = arith.constant dense<0.000000e+00> : vector<128x128xf32>
    %3 = tpu.matmul %1, %2, %cst {dimension_numbers = #tpu.dot_dimension_numbers<[1], [0], [0], [1], [0, 0, 1, 1], [], []>} : vector<128x288xbf16>, vector<288x128xbf16>, vector<128x128xf32> -> vector<128x128xf32>
    %4 = vector.shape_cast %3 : vector<128x128xf32> to vector<2x4x16x128xf32>
    %5 = vector.extract_strided_slice %4 {offsets = [0, 0, 0, 0], sizes = [2, 1, 16, 128], strides = [1, 1, 1, 1]} : vector<2x4x16x128xf32> to vector<2x1x16x128xf32>
    %6 = vector.shape_cast %5 : vector<2x1x16x128xf32> to vector<2x16x128xf32>
    %7 = vector.extract_strided_slice %4 {offsets = [0, 1, 0, 0], sizes = [2, 1, 16, 128], strides = [1, 1, 1, 1]} : vector<2x4x16x128xf32> to vector<2x1x16x128xf32>
    %8 = vector.shape_cast %7 : vector<2x1x16x128xf32> to vector<2x16x128xf32>
    %9 = arith.maximumf %6, %8 : vector<2x16x128xf32>
    %10 = vector.extract_strided_slice %4 {offsets = [0, 2, 0, 0], sizes = [2, 1, 16, 128], strides = [1, 1, 1, 1]} : vector<2x4x16x128xf32> to vector<2x1x16x128xf32>
    %11 = vector.shape_cast %10 : vector<2x1x16x128xf32> to vector<2x16x128xf32>
    %12 = vector.extract_strided_slice %4 {offsets = [0, 3, 0, 0], sizes = [2, 1, 16, 128], strides = [1, 1, 1, 1]} : vector<2x4x16x128xf32> to vector<2x1x16x128xf32>
    %13 = vector.shape_cast %12 : vector<2x1x16x128xf32> to vector<2x16x128xf32>
    %14 = arith.maximumf %11, %13 : vector<2x16x128xf32>
    %15 = arith.maximumf %9, %14 : vector<2x16x128xf32>
    %c0_5 = arith.constant 0 : index
    %c0_6 = arith.constant 0 : index
    %16 = vector.load %arg3[%c0_5, %c0_6] : memref<1x128xf32, #tpu.memory_space<vmem>>, vector<1x128xf32>
    %17 = vector.shape_cast %16 : vector<1x128xf32> to vector<1x1x128xf32>
    %18 = vector.broadcast %17 : vector<1x1x128xf32> to vector<2x16x128xf32>
    %19 = arith.addf %15, %18 : vector<2x16x128xf32>
    %cst_7 = arith.constant 0.000000e+00 : f32
    %20 = vector.broadcast %cst_7 : f32 to vector<2x16x128xf32>
    %21 = arith.maximumf %19, %20 : vector<2x16x128xf32>
    %c0_8 = arith.constant 0 : index
    %c0_9 = arith.constant 0 : index
    %c0_10 = arith.constant 0 : index
    %22 = vector.load %arg4[%c0_8, %c0_9, %c0_10] : memref<2x16x128xf32, #tpu.memory_space<vmem>>, vector<2x16x128xf32>
    tpu.vector_store %arg4[%c0_8, %c0_9, %c0_10], %21 {strides = array<i32>} : memref<2x16x128xf32, #tpu.memory_space<vmem>>, vector<2x16x128xf32>,
    return
  }
  func.func @transform_0(%arg0: i32) -> (i32, i32, i32, i32) {
    %c0_i32 = arith.constant 0 : i32
    %c0_i32_0 = arith.constant 0 : i32
    %c0_i32_1 = arith.constant 0 : i32
    %c0_i32_2 = arith.constant 0 : i32
    return %arg0, %c0_i32, %c0_i32_0, %c0_i32_1 : i32, i32, i32, i32
  }
  func.func @transform_1(%arg0: i32) -> (i32, i32) {
    %c0_i32 = arith.constant 0 : i32
    %c0_i32_0 = arith.constant 0 : i32
    %c0_i32_1 = arith.constant 0 : i32
    return %c0_i32, %c0_i32_0 : i32, i32
  }
  func.func @transform_2(%arg0: i32) -> (i32, i32) {
    %c0_i32 = arith.constant 0 : i32
    %c0_i32_0 = arith.constant 0 : i32
    %c0_i32_1 = arith.constant 0 : i32
    return %c0_i32, %c0_i32_0 : i32, i32
  }
  func.func @transform_3(%arg0: i32) -> (i32, i32, i32) {
    %c0_i32 = arith.constant 0 : i32
    %c0_i32_0 = arith.constant 0 : i32
    %c0_i32_1 = arith.constant 0 : i32
    return %arg0, %c0_i32, %c0_i32_0 : i32, i32, i32
  }
}

module attributes {stable_mosaic.version = 11 : i64} {
  func.func @_fc_kernel(%arg0: i32, %arg1: memref<2x1024xbf16, #tpu.memory_space<vmem>>, %arg2: memref<1024x512xbf16, #tpu.memory_space<vmem>>, %arg3: memref<1x512xf32, #tpu.memory_space<vmem>>, %arg4: memref<512x128xbf16, #tpu.memory_space<vmem>>, %arg5: memref<1x128xf32, #tpu.memory_space<vmem>>, %arg6: memref<2x128xf32, #tpu.memory_space<vmem>>) attributes {dimension_semantics = [#tpu.dimension_semantics<parallel>], iteration_bounds = array<i64: 1>, scalar_prefetch = 0 : i64, scratch_operands = 0 : i64, tpu.core_type = #tpu.core_type<tc>, window_params = [{transform_indices = @transform_0, window_bounds = array<i64: 2, 1024>}, {pipeline_mode = #tpu.pipeline_mode<synchronous>, transform_indices = @transform_1, window_bounds = array<i64: 1024, 512>}, {pipeline_mode = #tpu.pipeline_mode<synchronous>, transform_indices = @transform_2, window_bounds = array<i64: 1, 512>}, {pipeline_mode = #tpu.pipeline_mode<synchronous>, transform_indices = @transform_3, window_bounds = array<i64: 512, 128>}, {pipeline_mode = #tpu.pipeline_mode<synchronous>, transform_indices = @transform_4, window_bounds = array<i64: 1, 128>}, {transform_indices = @transform_5, window_bounds = array<i64: 2, 128>}]} {
    %c0 = arith.constant 0 : index
    %c0_0 = arith.constant 0 : index
    %0 = vector.load %arg1[%c0, %c0_0] : memref<2x1024xbf16, #tpu.memory_space<vmem>>, vector<2x1024xbf16>
    %c0_1 = arith.constant 0 : index
    %c0_2 = arith.constant 0 : index
    %1 = vector.load %arg2[%c0_1, %c0_2] : memref<1024x512xbf16, #tpu.memory_space<vmem>>, vector<1024x512xbf16>
    %cst = arith.constant dense<0.000000e+00> : vector<2x512xf32>
    %2 = tpu.matmul %0, %1, %cst {dimension_numbers = #tpu.dot_dimension_numbers<[1], [0], [0], [1], [0, 0, 1, 1], [], []>} : vector<2x1024xbf16>, vector<1024x512xbf16>, vector<2x512xf32> -> vector<2x512xf32>
    %c0_3 = arith.constant 0 : index
    %c0_4 = arith.constant 0 : index
    %3 = vector.load %arg3[%c0_3, %c0_4] : memref<1x512xf32, #tpu.memory_space<vmem>>, vector<1x512xf32>
    %4 = vector.broadcast %3 : vector<1x512xf32> to vector<2x512xf32>
    %5 = arith.addf %2, %4 : vector<2x512xf32>
    %cst_5 = arith.constant 0.000000e+00 : f32
    %6 = vector.broadcast %cst_5 : f32 to vector<2x512xf32>
    %7 = arith.maximumf %5, %6 : vector<2x512xf32>
    %8 = arith.truncf %7 : vector<2x512xf32> to vector<2x512xbf16>
    %c0_6 = arith.constant 0 : index
    %c0_7 = arith.constant 0 : index
    %9 = vector.load %arg4[%c0_6, %c0_7] : memref<512x128xbf16, #tpu.memory_space<vmem>>, vector<512x128xbf16>
    %cst_8 = arith.constant dense<0.000000e+00> : vector<2x128xf32>
    %10 = tpu.matmul %8, %9, %cst_8 {dimension_numbers = #tpu.dot_dimension_numbers<[1], [0], [0], [1], [0, 0, 1, 1], [], []>} : vector<2x512xbf16>, vector<512x128xbf16>, vector<2x128xf32> -> vector<2x128xf32>
    %c0_9 = arith.constant 0 : index
    %c0_10 = arith.constant 0 : index
    %11 = vector.load %arg5[%c0_9, %c0_10] : memref<1x128xf32, #tpu.memory_space<vmem>>, vector<1x128xf32>
    %12 = vector.broadcast %11 : vector<1x128xf32> to vector<2x128xf32>
    %13 = arith.addf %10, %12 : vector<2x128xf32>
    %c0_11 = arith.constant 0 : index
    %c0_12 = arith.constant 0 : index
    %14 = vector.load %arg6[%c0_11, %c0_12] : memref<2x128xf32, #tpu.memory_space<vmem>>, vector<2x128xf32>
    tpu.vector_store %arg6[%c0_11, %c0_12], %13 {strides = array<i32>} : memref<2x128xf32, #tpu.memory_space<vmem>>, vector<2x128xf32>,
    return
  }
  func.func @transform_0(%arg0: i32) -> (i32, i32) {
    %c0_i32 = arith.constant 0 : i32
    %c0_i32_0 = arith.constant 0 : i32
    return %arg0, %c0_i32 : i32, i32
  }
  func.func @transform_1(%arg0: i32) -> (i32, i32) {
    %c0_i32 = arith.constant 0 : i32
    %c0_i32_0 = arith.constant 0 : i32
    %c0_i32_1 = arith.constant 0 : i32
    return %c0_i32, %c0_i32_0 : i32, i32
  }
  func.func @transform_2(%arg0: i32) -> (i32, i32) {
    %c0_i32 = arith.constant 0 : i32
    %c0_i32_0 = arith.constant 0 : i32
    %c0_i32_1 = arith.constant 0 : i32
    return %c0_i32, %c0_i32_0 : i32, i32
  }
  func.func @transform_3(%arg0: i32) -> (i32, i32) {
    %c0_i32 = arith.constant 0 : i32
    %c0_i32_0 = arith.constant 0 : i32
    %c0_i32_1 = arith.constant 0 : i32
    return %c0_i32, %c0_i32_0 : i32, i32
  }
  func.func @transform_4(%arg0: i32) -> (i32, i32) {
    %c0_i32 = arith.constant 0 : i32
    %c0_i32_0 = arith.constant 0 : i32
    %c0_i32_1 = arith.constant 0 : i32
    return %c0_i32, %c0_i32_0 : i32, i32
  }
  func.func @transform_5(%arg0: i32) -> (i32, i32) {
    %c0_i32 = arith.constant 0 : i32
    %c0_i32_0 = arith.constant 0 : i32
    return %arg0, %c0_i32 : i32, i32
  }
}

</mosaic_0001>

<bundles_post_ra>
// kernel: cnn_forward.4
= control target key start
LH: loop header
LB: loop body
LE: loop exit
PB: predicated region body
PF: predicated region fallthrough
CT: control target
= control target key end

     0   :  { %vm1311_vm0 = vcmask 1044480   ;;  %vm1312_vm1 = vcmask 1045504   ;;  %v3554_v1 = vmov 65535   ;;  %vm926_vm2 = vcmask 220160   ;;  %s5122_s1 = inlined_call_operand.vmem [shape: bf16[27,128], index: 1, kind: input, shape index: {}]   ;;  %s5123_s0 = inlined_call_operand.vmem [shape: bf16[2,4,256,27], index: 0, kind: input, shape index: {}]   ;;  %s5124_s2 = inlined_call_operand.vmem [shape: f32[1,128], index: 2, kind: input, shape index: {}]   ;;  %s5125_s3 = inlined_call_operand.vmem [shape: f32[2,256,128], index: 3, kind: output, shape index: {}]  }
   0x1   :  { %v3424_v0 = vld [vmem:[%s5122_s1 + $0x8] sm:$0x3f]   ;;  %v1313_v2 = vsel %vm1311_vm0, 4294967295, %v3554_v1  ;;  %v3426_v4 = vld [vmem:[%s5123_s0] sm:$0xff]   ;;  %v3430_v10 = vld [vmem:[%s5123_s0 + $0x10] sm:$0xff]  }
   0x2   :  { %v1314_v3 = vsel %vm1312_vm1, %v1313_v2, 0  ;;  %v3425_v6 = vld [vmem:[%s5122_s1] sm:$0xff]   ;;  %3163 = vmatprep.mubr.msk.bf16.mxu0 %vm926_vm2, %v3426_v4  ;;  %v3428_v8 = vld [vmem:[%s5123_s0 + $0x8] sm:$0xff]   ;;  %v3431_v11 = vld [vmem:[%s5123_s0 + $0x210] sm:$0xff]  }
   0x3   :  { %v1316_v5 = vand.u32 %v3424_v0, %v1314_v3  ;;  %v3427_v7 = vld [vmem:[%s5123_s0 + $0x200] sm:$0xff]   ;;  %v3429_v9 = vld [vmem:[%s5123_s0 + $0x208] sm:$0xff]   ;;  %v3432_v12 = vld [vmem:[%s5123_s0 + $0x18] sm:$0xff]  }
   0x4   :  { %3291 = vmatprep.mubr.msk.bf16.mxu1 %vm926_vm2, %v3427_v7  ;;  %v3433_v13 = vld [vmem:[%s5123_s0 + $0x218] sm:$0xff]   ;;  %v3434_v14 = vld [vmem:[%s5123_s0 + $0x20] sm:$0xff]   ;;  %v3436_v16 = vld [vmem:[%s5123_s0 + $0x28] sm:$0xff]  }
   0x5   :  { %3159 = vmatprep.subr.bf16.mxu0 %v1316_v5  ;;  %3419 = vmatprep.subr.bf16.mxu1 %v1316_v5  ;;  %v3435_v15 = vld [vmem:[%s5123_s0 + $0x220] sm:$0xff]   ;;  %v3437_v17 = vld [vmem:[%s5123_s0 + $0x228] sm:$0xff]   ;;  %v3438_v18 = vld [vmem:[%s5123_s0 + $0x30] sm:$0xff]  }
   0x6   :  { %3160 = vmatpush3.bf16.msra.mxu0 %v1316_v5  ;;  %3421 = vmatpush3.bf16.msra.mxu1 %v1316_v5  ;;  %v3439_v19 = vld [vmem:[%s5123_s0 + $0x230] sm:$0xff]   ;;  %v3440_v20 = vld [vmem:[%s5123_s0 + $0x38] sm:$0xff]   ;;  %v3442_v22 = vld [vmem:[%s5123_s0 + $0x40] sm:$0xff]  }
   0x7   :  { %3161 = vmatprep.subr.bf16.mxu0 %v3425_v6  ;;  %3420 = vmatprep.subr.bf16.mxu1 %v3425_v6  ;;  %v3441_v21 = vld [vmem:[%s5123_s0 + $0x238] sm:$0xff]   ;;  %v3443_v23 = vld [vmem:[%s5123_s0 + $0x240] sm:$0xff]   ;;  %v3444_v24 = vld [vmem:[%s5123_s0 + $0x48] sm:$0xff]  }
   0x8   :  { %v3445_v25 = vld [vmem:[%s5123_s0 + $0x248] sm:$0xff]   ;;  %v3446_v26 = vld [vmem:[%s5123_s0 + $0x50] sm:$0xff]   ;;  %v3448_v28 = vld [vmem:[%s5123_s0 + $0x58] sm:$0xff]  }
   0x9   :  { %v3447_v27 = vld [vmem:[%s5123_s0 + $0x250] sm:$0xff]   ;;  %v3449_v29 = vld [vmem:[%s5123_s0 + $0x258] sm:$0xff]   ;;  %v3450_v30 = vld [vmem:[%s5123_s0 + $0x60] sm:$0xff]  }
   0xa   :  { %3162 = vmatpush3.bf16.msra.mxu0 %v3425_v6  ;;  %3422 = vmatpush3.bf16.msra.mxu1 %v3425_v6  ;;  %v3451_v31 = vld [vmem:[%s5123_s0 + $0x260] sm:$0xff]   ;;  %v3452_v32 = vld [vmem:[%s5123_s0 + $0x68] sm:$0xff]   ;;  %v3454_v34 = vld [vmem:[%s5123_s0 + $0x70] sm:$0xff]  }
   0xb   :  { %v3453_v33 = vld [vmem:[%s5123_s0 + $0x268] sm:$0xff]   ;;  %v3455_v35 = vld [vmem:[%s5123_s0 + $0x270] sm:$0xff]   ;;  %v3456_v36 = vld [vmem:[%s5123_s0 + $0x78] sm:$0xff]  }
   0xc   :  { %v3457_v37 = vld [vmem:[%s5123_s0 + $0x278] sm:$0xff]   ;;  %v3458_v38 = vld [vmem:[%s5123_s0 + $0x80] sm:$0xff]   ;;  %v3460_v40 = vld [vmem:[%s5123_s0 + $0x88] sm:$0xff]  }
   0xd   :  { %3164 = vmatmul.mubr.msk.bf16.vlgmr.msra.gmra.mxu0 %vm926_vm2, %v3428_v8  ;;  %3292 = vmatmul.mubr.msk.bf16.vlgmr.msra.gmra.mxu1 %vm926_vm2, %v3429_v9  ;;  %v3459_v39 = vld [vmem:[%s5123_s0 + $0x280] sm:$0xff]   ;;  %v3461_v41 = vld [vmem:[%s5123_s0 + $0x288] sm:$0xff]   ;;  %v3462_v42 = vld [vmem:[%s5123_s0 + $0x90] sm:$0xff]  }
   0xe   :  { %3167 = vmatprep.mubr.msk.bf16.mxu0 %vm926_vm2, %v3430_v10  ;;  %3295 = vmatprep.mubr.msk.bf16.mxu1 %vm926_vm2, %v3431_v11  ;;  %v3463_v43 = vld [vmem:[%s5123_s0 + $0x290] sm:$0xff]   ;;  %v3464_v44 = vld [vmem:[%s5123_s0 + $0x98] sm:$0xff]   ;;  %v3466_v46 = vld [vmem:[%s5123_s0 + $0xa0] sm:$0xff]  }
   0xf   :  { %v3465_v45 = vld [vmem:[%s5123_s0 + $0x298] sm:$0xff]   ;;  %v3467_v47 = vld [vmem:[%s5123_s0 + $0x2a0] sm:$0xff]   ;;  %v3468_v48 = vld [vmem:[%s5123_s0 + $0xa8] sm:$0xff]  }
  0x10   :  { %v3469_v49 = vld [vmem:[%s5123_s0 + $0x2a8] sm:$0xff]   ;;  %v3470_v50 = vld [vmem:[%s5123_s0 + $0xb0] sm:$0xff]   ;;  %v3472_v52 = vld [vmem:[%s5123_s0 + $0xb8] sm:$0xff]  }
  0x11   :  { %v3471_v51 = vld [vmem:[%s5123_s0 + $0x2b0] sm:$0xff]   ;;  %v3473_v53 = vld [vmem:[%s5123_s0 + $0x2b8] sm:$0xff]   ;;  %v3474_v54 = vld [vmem:[%s5123_s0 + $0xc0] sm:$0xff]  }
  0x12   :  { %v3475_v55 = vld [vmem:[%s5123_s0 + $0x2c0] sm:$0xff]   ;;  %v3476_v56 = vld [vmem:[%s5123_s0 + $0xc8] sm:$0xff]   ;;  %v3478_v58 = vld [vmem:[%s5123_s0 + $0xd0] sm:$0xff]  }
  0x13   :  { %v3477_v57 = vld [vmem:[%s5123_s0 + $0x2c8] sm:$0xff]   ;;  %v3479_v59 = vld [vmem:[%s5123_s0 + $0x2d0] sm:$0xff]   ;;  %v3480_v60 = vld [vmem:[%s5123_s0 + $0xd8] sm:$0xff]  }
  0x14   :  { %v3481_v61 = vld [vmem:[%s5123_s0 + $0x2d8] sm:$0xff]   ;;  %v3482_v62 = vld [vmem:[%s5123_s0 + $0xe0] sm:$0xff]   ;;  %v3484_v0 = vld [vmem:[%s5123_s0 + $0xe8] sm:$0xff]  }
  0x15   :  { %3168 = vmatmul.mubr.msk.bf16.gmra.mxu0 %vm926_vm2, %v3432_v12  ;;  %3296 = vmatmul.mubr.msk.bf16.gmra.mxu1 %vm926_vm2, %v3433_v13  ;;  %v3483_v63 = vld [vmem:[%s5123_s0 + $0x2e0] sm:$0xff]   ;;  %v3485_v1 = vld [vmem:[%s5123_s0 + $0x2e8] sm:$0xff]   ;;  %v3486_v2 = vld [vmem:[%s5123_s0 + $0xf0] sm:$0xff]  }
  0x16   :  { %3171 = vmatprep.mubr.msk.bf16.mxu0 %vm926_vm2, %v3434_v14  ;;  %3299 = vmatprep.mubr.msk.bf16.mxu1 %vm926_vm2, %v3435_v15  ;;  %v3487_v3 = vld [vmem:[%s5123_s0 + $0x2f0] sm:$0xff]   ;;  %v3488_v4 = vld [vmem:[%s5123_s0 + $0xf8] sm:$0xff]   ;;  %v3490_v6 = vld [vmem:[%s5123_s0 + $0x100] sm:$0xff]  }
  0x17   :  { %v3489_v5 = vld [vmem:[%s5123_s0 + $0x2f8] sm:$0xff]   ;;  %v3491_v7 = vld [vmem:[%s5123_s0 + $0x300] sm:$0xff]   ;;  %v3492_v8 = vld [vmem:[%s5123_s0 + $0x108] sm:$0xff]  }
  0x18   :  { %v3493_v9 = vld [vmem:[%s5123_s0 + $0x308] sm:$0xff]   ;;  %v3494_v10 = vld [vmem:[%s5123_s0 + $0x110] sm:$0xff]   ;;  %v3496_v12 = vld [vmem:[%s5123_s0 + $0x118] sm:$0xff]  }
  0x19   :  { %v3495_v11 = vld [vmem:[%s5123_s0 + $0x310] sm:$0xff]   ;;  %v3497_v13 = vld [vmem:[%s5123_s0 + $0x318] sm:$0xff]   ;;  %v3498_v14 = vld [vmem:[%s5123_s0 + $0x120] sm:$0xff]  }
  0x1a   :  { %v3499_v15 = vld [vmem:[%s5123_s0 + $0x320] sm:$0xff]  }
  0x1d   :  { %3172 = vmatmul.mubr.msk.bf16.gmra.mxu0 %vm926_vm2, %v3436_v16  ;;  %3300 = vmatmul.mubr.msk.bf16.gmra.mxu1 %vm926_vm2, %v3437_v17  ;;  %v3500_v16 = vld [vmem:[%s5123_s0 + $0x128] sm:$0xff]  }
  0x1e   :  { %3175 = vmatprep.mubr.msk.bf16.mxu0 %vm926_vm2, %v3438_v18  ;;  %3303 = vmatprep.mubr.msk.bf16.mxu1 %vm926_vm2, %v3439_v19  ;;  %v3501_v17 = vld [vmem:[%s5123_s0 + $0x328] sm:$0xff]   ;;  %v3502_v18 = vld [vmem:[%s5123_s0 + $0x130] sm:$0xff]  }
  0x1f   :  { %v3503_v19 = vld [vmem:[%s5123_s0 + $0x330] sm:$0xff]  }
  0x25   :  { %3176 = vmatmul.mubr.msk.bf16.gmra.mxu0 %vm926_vm2, %v3440_v20  ;;  %3304 = vmatmul.mubr.msk.bf16.gmra.mxu1 %vm926_vm2, %v3441_v21  ;;  %v3504_v20 = vld [vmem:[%s5123_s0 + $0x138] sm:$0xff]  }
  0x26   :  { %3179 = vmatprep.mubr.msk.bf16.mxu0 %vm926_vm2, %v3442_v22  ;;  %3307 = vmatprep.mubr.msk.bf16.mxu1 %vm926_vm2, %v3443_v23  ;;  %v3505_v21 = vld [vmem:[%s5123_s0 + $0x338] sm:$0xff]   ;;  %v3506_v22 = vld [vmem:[%s5123_s0 + $0x140] sm:$0xff]  }
  0x27   :  { %v3507_v23 = vld [vmem:[%s5123_s0 + $0x340] sm:$0xff]  }
  0x2d   :  { %3180 = vmatmul.mubr.msk.bf16.gmra.mxu0 %vm926_vm2, %v3444_v24  ;;  %3308 = vmatmul.mubr.msk.bf16.gmra.mxu1 %vm926_vm2, %v3445_v25  ;;  %v3508_v24 = vld [vmem:[%s5123_s0 + $0x148] sm:$0xff]  }
  0x2e   :  { %3183 = vmatprep.mubr.msk.bf16.mxu0 %vm926_vm2, %v3446_v26  ;;  %3311 = vmatprep.mubr.msk.bf16.mxu1 %vm926_vm2, %v3447_v27  ;;  %v3509_v25 = vld [vmem:[%s5123_s0 + $0x348] sm:$0xff]   ;;  %v3510_v26 = vld [vmem:[%s5123_s0 + $0x150] sm:$0xff]  }
  0x2f   :  { %v3511_v27 = vld [vmem:[%s5123_s0 + $0x350] sm:$0xff]  }
  0x35   :  { %3184 = vmatmul.mubr.msk.bf16.gmra.mxu0 %vm926_vm2, %v3448_v28  ;;  %3312 = vmatmul.mubr.msk.bf16.gmra.mxu1 %vm926_vm2, %v3449_v29  ;;  %v3512_v28 = vld [vmem:[%s5123_s0 + $0x158] sm:$0xff]  }
  0x36   :  { %3187 = vmatprep.mubr.msk.bf16.mxu0 %vm926_vm2, %v3450_v30  ;;  %3315 = vmatprep.mubr.msk.bf16.mxu1 %vm926_vm2, %v3451_v31  ;;  %v3513_v29 = vld [vmem:[%s5123_s0 + $0x358] sm:$0xff]   ;;  %v3514_v30 = vld [vmem:[%s5123_s0 + $0x160] sm:$0xff]  }
  0x37   :  { %v3515_v31 = vld [vmem:[%s5123_s0 + $0x360] sm:$0xff]  }
  0x3d   :  { %3188 = vmatmul.mubr.msk.bf16.gmra.mxu0 %vm926_vm2, %v3452_v32  ;;  %3316 = vmatmul.mubr.msk.bf16.gmra.mxu1 %vm926_vm2, %v3453_v33  ;;  %v3516_v32 = vld [vmem:[%s5123_s0 + $0x168] sm:$0xff]  }
  0x3e   :  { %3191 = vmatprep.mubr.msk.bf16.mxu0 %vm926_vm2, %v3454_v34  ;;  %3319 = vmatprep.mubr.msk.bf16.mxu1 %vm926_vm2, %v3455_v35  ;;  %v3517_v33 = vld [vmem:[%s5123_s0 + $0x368] sm:$0xff]   ;;  %v3518_v34 = vld [vmem:[%s5123_s0 + $0x170] sm:$0xff]  }
  0x3f   :  { %v3519_v35 = vld [vmem:[%s5123_s0 + $0x370] sm:$0xff]  }
  0x45   :  { %3192 = vmatmul.mubr.msk.bf16.gmra.mxu0 %vm926_vm2, %v3456_v36  ;;  %3320 = vmatmul.mubr.msk.bf16.gmra.mxu1 %vm926_vm2, %v3457_v37  ;;  %v3520_v36 = vld [vmem:[%s5123_s0 + $0x178] sm:$0xff]  }
  0x46   :  { %3195 = vmatprep.mubr.msk.bf16.mxu0 %vm926_vm2, %v3458_v38  ;;  %3323 = vmatprep.mubr.msk.bf16.mxu1 %vm926_vm2, %v3459_v39  ;;  %v3521_v37 = vld [vmem:[%s5123_s0 + $0x378] sm:$0xff]   ;;  %v3522_v38 = vld [vmem:[%s5123_s0 + $0x180] sm:$0xff]  }
  0x47   :  { %v3523_v39 = vld [vmem:[%s5123_s0 + $0x380] sm:$0xff]  }
  0x4d   :  { %3196 = vmatmul.mubr.msk.bf16.gmra.mxu0 %vm926_vm2, %v3460_v40  ;;  %3324 = vmatmul.mubr.msk.bf16.gmra.mxu1 %vm926_vm2, %v3461_v41  ;;  %v3524_v40 = vld [vmem:[%s5123_s0 + $0x188] sm:$0xff]  }
  0x4e   :  { %3199 = vmatprep.mubr.msk.bf16.mxu0 %vm926_vm2, %v3462_v42  ;;  %3327 = vmatprep.mubr.msk.bf16.mxu1 %vm926_vm2, %v3463_v43  ;;  %v3525_v41 = vld [vmem:[%s5123_s0 + $0x388] sm:$0xff]   ;;  %v3526_v42 = vld [vmem:[%s5123_s0 + $0x190] sm:$0xff]  }
  0x4f   :  { %v3527_v43 = vld [vmem:[%s5123_s0 + $0x390] sm:$0xff]  }
  0x55   :  { %3200 = vmatmul.mubr.msk.bf16.gmra.mxu0 %vm926_vm2, %v3464_v44  ;;  %3328 = vmatmul.mubr.msk.bf16.gmra.mxu1 %vm926_vm2, %v3465_v45 }
  0x56   :  { %3203 = vmatprep.mubr.msk.bf16.mxu0 %vm926_vm2, %v3466_v46  ;;  %3331 = vmatprep.mubr.msk.bf16.mxu1 %vm926_vm2, %v3467_v47 }
  0x5d   :  { %3204 = vmatmul.mubr.msk.bf16.gmra.mxu0 %vm926_vm2, %v3468_v48  ;;  %3332 = vmatmul.mubr.msk.bf16.gmra.mxu1 %vm926_vm2, %v3469_v49 }
  0x5e   :  { %3207 = vmatprep.mubr.msk.bf16.mxu0 %vm926_vm2, %v3470_v50  ;;  %3335 = vmatprep.mubr.msk.bf16.mxu1 %vm926_vm2, %v3471_v51  ;;  %v3528_v50 = vld [vmem:[%s5123_s0 + $0x198] sm:$0xff]  }
  0x5f   :  { %v3529_v51 = vld [vmem:[%s5123_s0 + $0x398] sm:$0xff]  }
  0x65   :  { %3208 = vmatmul.mubr.msk.bf16.gmra.mxu0 %vm926_vm2, %v3472_v52  ;;  %3336 = vmatmul.mubr.msk.bf16.gmra.mxu1 %vm926_vm2, %v3473_v53  ;;  %v3530_v52 = vld [vmem:[%s5123_s0 + $0x1a0] sm:$0xff]  }
  0x66   :  { %3211 = vmatprep.mubr.msk.bf16.mxu0 %vm926_vm2, %v3474_v54  ;;  %3339 = vmatprep.mubr.msk.bf16.mxu1 %vm926_vm2, %v3475_v55  ;;  %v3531_v53 = vld [vmem:[%s5123_s0 + $0x3a0] sm:$0xff]  }
  0x6d   :  { %3212 = vmatmul.mubr.msk.bf16.gmra.mxu0 %vm926_vm2, %v3476_v56  ;;  %3340 = vmatmul.mubr.msk.bf16.gmra.mxu1 %vm926_vm2, %v3477_v57 }
  0x6e   :  { %3215 = vmatprep.mubr.msk.bf16.mxu0 %vm926_vm2, %v3478_v58  ;;  %3343 = vmatprep.mubr.msk.bf16.mxu1 %vm926_vm2, %v3479_v59 }
  0x75   :  { %3216 = vmatmul.mubr.msk.bf16.gmra.mxu0 %vm926_vm2, %v3480_v60  ;;  %3344 = vmatmul.mubr.msk.bf16.gmra.mxu1 %vm926_vm2, %v3481_v61 }
  0x76   :  { %3219 = vmatprep.mubr.msk.bf16.mxu0 %vm926_vm2, %v3482_v62  ;;  %3347 = vmatprep.mubr.msk.bf16.mxu1 %vm926_vm2, %v3483_v63  ;;  %v3532_v62 = vld [vmem:[%s5123_s0 + $0x1a8] sm:$0xff]  }
  0x77   :  { %v3533_v63 = vld [vmem:[%s5123_s0 + $0x3a8] sm:$0xff]  }
  0x7d   :  { %3220 = vmatmul.mubr.msk.bf16.gmra.mxu0 %vm926_vm2, %v3484_v0  ;;  %3348 = vmatmul.mubr.msk.bf16.gmra.mxu1 %vm926_vm2, %v3485_v1  ;;  %v3534_v0 = vld [vmem:[%s5123_s0 + $0x1b0] sm:$0xff]  }
  0x7e   :  { %3223 = vmatprep.mubr.msk.bf16.mxu0 %vm926_vm2, %v3486_v2  ;;  %3351 = vmatprep.mubr.msk.bf16.mxu1 %vm926_vm2, %v3487_v3  ;;  %v3535_v1 = vld [vmem:[%s5123_s0 + $0x3b0] sm:$0xff]  }
  0x85   :  { %3224 = vmatmul.mubr.msk.bf16.gmra.mxu0 %vm926_vm2, %v3488_v4  ;;  %3352 = vmatmul.mubr.msk.bf16.gmra.mxu1 %vm926_vm2, %v3489_v5 }
  0x86   :  { %3227 = vmatprep.mubr.msk.bf16.mxu0 %vm926_vm2, %v3490_v6  ;;  %3355 = vmatprep.mubr.msk.bf16.mxu1 %vm926_vm2, %v3491_v7 }
  0x8d   :  { %3228 = vmatmul.mubr.msk.bf16.gmra.mxu0 %vm926_vm2, %v3492_v8  ;;  %3356 = vmatmul.mubr.msk.bf16.gmra.mxu1 %vm926_vm2, %v3493_v9 }
  0x8e   :  { %3231 = vmatprep.mubr.msk.bf16.mxu0 %vm926_vm2, %v3494_v10  ;;  %3359 = vmatprep.mubr.msk.bf16.mxu1 %vm926_vm2, %v3495_v11  ;;  %v3536_v10 = vld [vmem:[%s5123_s0 + $0x1b8] sm:$0xff]  }
  0x8f   :  { %v3537_v11 = vld [vmem:[%s5123_s0 + $0x3b8] sm:$0xff]  }
  0x95   :  { %3232 = vmatmul.mubr.msk.bf16.gmra.mxu0 %vm926_vm2, %v3496_v12  ;;  %3360 = vmatmul.mubr.msk.bf16.gmra.mxu1 %vm926_vm2, %v3497_v13  ;;  %v3538_v12 = vld [vmem:[%s5123_s0 + $0x1c0] sm:$0xff]  }
  0x96   :  { %3235 = vmatprep.mubr.msk.bf16.mxu0 %vm926_vm2, %v3498_v14  ;;  %3363 = vmatprep.mubr.msk.bf16.mxu1 %vm926_vm2, %v3499_v15  ;;  %v3539_v13 = vld [vmem:[%s5123_s0 + $0x3c0] sm:$0xff]  }
  0x9d   :  { %3236 = vmatmul.mubr.msk.bf16.gmra.mxu0 %vm926_vm2, %v3500_v16  ;;  %3364 = vmatmul.mubr.msk.bf16.gmra.mxu1 %vm926_vm2, %v3501_v17 }
  0x9e   :  { %3239 = vmatprep.mubr.msk.bf16.mxu0 %vm926_vm2, %v3502_v18  ;;  %3367 = vmatprep.mubr.msk.bf16.mxu1 %vm926_vm2, %v3503_v19 }
  0xa5   :  { %3240 = vmatmul.mubr.msk.bf16.gmra.mxu0 %vm926_vm2, %v3504_v20  ;;  %3368 = vmatmul.mubr.msk.bf16.gmra.mxu1 %vm926_vm2, %v3505_v21 }
  0xa6   :  { %3243 = vmatprep.mubr.msk.bf16.mxu0 %vm926_vm2, %v3506_v22  ;;  %3371 = vmatprep.mubr.msk.bf16.mxu1 %vm926_vm2, %v3507_v23  ;;  %v3540_v22 = vld [vmem:[%s5123_s0 + $0x1c8] sm:$0xff]  }
  0xa7   :  { %v3541_v23 = vld [vmem:[%s5123_s0 + $0x3c8] sm:$0xff]  }
  0xad   :  { %3244 = vmatmul.mubr.msk.bf16.gmra.mxu0 %vm926_vm2, %v3508_v24  ;;  %3372 = vmatmul.mubr.msk.bf16.gmra.mxu1 %vm926_vm2, %v3509_v25  ;;  %v3542_v24 = vld [vmem:[%s5123_s0 + $0x1d0] sm:$0xff]  }
  0xae   :  { %3247 = vmatprep.mubr.msk.bf16.mxu0 %vm926_vm2, %v3510_v26  ;;  %3375 = vmatprep.mubr.msk.bf16.mxu1 %vm926_vm2, %v3511_v27  ;;  %v3543_v25 = vld [vmem:[%s5123_s0 + $0x3d0] sm:$0xff]  }
  0xb5   :  { %3248 = vmatmul.mubr.msk.bf16.gmra.mxu0 %vm926_vm2, %v3512_v28  ;;  %3376 = vmatmul.mubr.msk.bf16.gmra.mxu1 %vm926_vm2, %v3513_v29 }
  0xb6   :  { %3251 = vmatprep.mubr.msk.bf16.mxu0 %vm926_vm2, %v3514_v30  ;;  %3379 = vmatprep.mubr.msk.bf16.mxu1 %vm926_vm2, %v3515_v31 }
  0xbd   :  { %3252 = vmatmul.mubr.msk.bf16.gmra.mxu0 %vm926_vm2, %v3516_v32  ;;  %3380 = vmatmul.mubr.msk.bf16.gmra.mxu1 %vm926_vm2, %v3517_v33 }
  0xbe   :  { %3255 = vmatprep.mubr.msk.bf16.mxu0 %vm926_vm2, %v3518_v34  ;;  %3383 = vmatprep.mubr.msk.bf16.mxu1 %vm926_vm2, %v3519_v35  ;;  %v3544_v34 = vld [vmem:[%s5123_s0 + $0x1d8] sm:$0xff]  }
  0xbf   :  { %v3545_v35 = vld [vmem:[%s5123_s0 + $0x3d8] sm:$0xff]  }
  0xc5   :  { %3256 = vmatmul.mubr.msk.bf16.gmra.mxu0 %vm926_vm2, %v3520_v36  ;;  %3384 = vmatmul.mubr.msk.bf16.gmra.mxu1 %vm926_vm2, %v3521_v37  ;;  %v3546_v36 = vld [vmem:[%s5123_s0 + $0x1e0] sm:$0xff]  }
  0xc6   :  { %3259 = vmatprep.mubr.msk.bf16.mxu0 %vm926_vm2, %v3522_v38  ;;  %3387 = vmatprep.mubr.msk.bf16.mxu1 %vm926_vm2, %v3523_v39  ;;  %v3547_v37 = vld [vmem:[%s5123_s0 + $0x3e0] sm:$0xff]  }
  0xcd   :  { %v3985_v44 = vpop.f32.mrf.mxu0  ;;  %3260 = vmatmul.mubr.msk.bf16.gmra.mxu0 %vm926_vm2, %v3524_v40  ;;  %v3988_v45 = vpop.f32.mrf.mxu1  ;;  %3388 = vmatmul.mubr.msk.bf16.gmra.mxu1 %vm926_vm2, %v3525_v41 }
  0xce   :  { %5232 = vst [vmem:[#allocation2_spill] sm:$0xff] %v3988_v45  ;;  %3263 = vmatprep.mubr.msk.bf16.mxu0 %vm926_vm2, %v3526_v42  ;;  %3391 = vmatprep.mubr.msk.bf16.mxu1 %vm926_vm2, %v3527_v43 }
  0xcf   :  { %v3993_v46 = vpop.f32.mrf.mxu0  ;;  %v3995_v47 = vpop.f32.mrf.mxu1 }
  0xd0   :  { %5233 = vst [vmem:[#allocation3_spill] sm:$0xff] %v3995_v47 }
  0xd1   :  { %v3997_v48 = vpop.f32.mrf.mxu0  ;;  %v3999_v49 = vpop.f32.mrf.mxu1 }
  0xd2   :  { %5234 = vst [vmem:[#allocation4_spill] sm:$0xff] %v3999_v49 }
  0xd3   :  { %v4013_v54 = vpop.f32.mrf.mxu0  ;;  %v4015_v55 = vpop.f32.mrf.mxu1 }
  0xd4   :  { %5235 = vst [vmem:[#allocation5_spill] sm:$0xff] %v4015_v55 }
  0xd5   :  { %v4017_v56 = vpop.f32.mrf.mxu0  ;;  %3264 = vmatmul.mubr.msk.bf16.gmra.mxu0 %vm926_vm2, %v3528_v50  ;;  %v4020_v57 = vpop.f32.mrf.mxu1  ;;  %3392 = vmatmul.mubr.msk.bf16.gmra.mxu1 %vm926_vm2, %v3529_v51 }
  0xd6   :  { %5236 = vst [vmem:[#allocation6_spill] sm:$0xff] %v4020_v57  ;;  %3267 = vmatprep.mubr.msk.bf16.mxu0 %vm926_vm2, %v3530_v52  ;;  %3395 = vmatprep.mubr.msk.bf16.mxu1 %vm926_vm2, %v3531_v53  ;;  %v3548_v52 = vld [vmem:[%s5123_s0 + $0x1e8] sm:$0xff]  }
  0xd7   :  { %v4025_v58 = vpop.f32.mrf.mxu0  ;;  %v4027_v59 = vpop.f32.mrf.mxu1  ;;  %v3549_v53 = vld [vmem:[%s5123_s0 + $0x3e8] sm:$0xff]  }
  0xd8   :  { %5237 = vst [vmem:[#allocation7_spill] sm:$0xff] %v4027_v59 }
  0xd9   :  { %v4029_v60 = vpop.f32.mrf.mxu0  ;;  %v4031_v61 = vpop.f32.mrf.mxu1 }
  0xda   :  { %5238 = vst [vmem:[#allocation8_spill] sm:$0xff] %v4031_v61 }
  0xdb   :  { %v4045_v2 = vpop.f32.mrf.mxu0  ;;  %v4047_v3 = vpop.f32.mrf.mxu1 }
  0xdc   :  { %5239 = vst [vmem:[#allocation9_spill] sm:$0xff] %v4047_v3 }
  0xdd   :  { %v4049_v4 = vpop.f32.mrf.mxu0  ;;  %3268 = vmatmul.mubr.msk.bf16.gmra.mxu0 %vm926_vm2, %v3532_v62  ;;  %v4052_v5 = vpop.f32.mrf.mxu1  ;;  %3396 = vmatmul.mubr.msk.bf16.gmra.mxu1 %vm926_vm2, %v3533_v63  ;;  %v3550_v62 = vld [vmem:[%s5123_s0 + $0x1f0] sm:$0xff]  }
  0xde   :  { %5240 = vst [vmem:[#allocation10_spill] sm:$0xff] %v4052_v5  ;;  %3271 = vmatprep.mubr.msk.bf16.mxu0 %vm926_vm2, %v3534_v0  ;;  %3399 = vmatprep.mubr.msk.bf16.mxu1 %vm926_vm2, %v3535_v1  ;;  %v3551_v63 = vld [vmem:[%s5123_s0 + $0x3f0] sm:$0xff]  }
  0xdf   :  { %v4057_v6 = vpop.f32.mrf.mxu0  ;;  %v4059_v7 = vpop.f32.mrf.mxu1 }
  0xe0   :  { %5241 = vst [vmem:[#allocation11_spill] sm:$0xff] %v4059_v7 }
  0xe1   :  { %v4061_v8 = vpop.f32.mrf.mxu0  ;;  %v4063_v9 = vpop.f32.mrf.mxu1 }
  0xe2   :  { %5242 = vst [vmem:[#allocation12_spill] sm:$0xff] %v4063_v9 }
  0xe3   :  { %v4077_v14 = vpop.f32.mrf.mxu0  ;;  %v4079_v15 = vpop.f32.mrf.mxu1 }
  0xe4   :  { %5243 = vst [vmem:[#allocation13_spill] sm:$0xff] %v4077_v14  ;;  %5244 = vst [vmem:[#allocation14_spill] sm:$0xff] %v4079_v15 }
  0xe5   :  { %v4081_v16 = vpop.f32.mrf.mxu0  ;;  %3272 = vmatmul.mubr.msk.bf16.gmra.mxu0 %vm926_vm2, %v3536_v10  ;;  %v4084_v17 = vpop.f32.mrf.mxu1  ;;  %3400 = vmatmul.mubr.msk.bf16.gmra.mxu1 %vm926_vm2, %v3537_v11 }
  0xe6   :  { %5245 = vst [vmem:[#allocation15_spill] sm:$0xff] %v4081_v16  ;;  %5246 = vst [vmem:[#allocation16_spill] sm:$0xff] %v4084_v17  ;;  %3275 = vmatprep.mubr.msk.bf16.mxu0 %vm926_vm2, %v3538_v12  ;;  %3403 = vmatprep.mubr.msk.bf16.mxu1 %vm926_vm2, %v3539_v13 }
  0xe7   :  { %v4089_v18 = vpop.f32.mrf.mxu0  ;;  %v4091_v19 = vpop.f32.mrf.mxu1 }
  0xe8   :  { %5247 = vst [vmem:[#allocation17_spill] sm:$0xff] %v4089_v18  ;;  %5248 = vst [vmem:[#allocation18_spill] sm:$0xff] %v4091_v19 }
  0xe9   :  { %v4093_v20 = vpop.f32.mrf.mxu0  ;;  %v4095_v21 = vpop.f32.mrf.mxu1 }
  0xea   :  { %5249 = vst [vmem:[#allocation19_spill] sm:$0xff] %v4093_v20  ;;  %5250 = vst [vmem:[#allocation20_spill] sm:$0xff] %v4095_v21 }
  0xeb   :  { %v4109_v26 = vpop.f32.mrf.mxu0  ;;  %v4111_v27 = vpop.f32.mrf.mxu1 }
  0xec   :  { %5251 = vst [vmem:[#allocation21_spill] sm:$0xff] %v4109_v26  ;;  %5252 = vst [vmem:[#allocation22_spill] sm:$0xff] %v4111_v27 }
  0xed   :  { %v4113_v28 = vpop.f32.mrf.mxu0  ;;  %3276 = vmatmul.mubr.msk.bf16.gmra.mxu0 %vm926_vm2, %v3540_v22  ;;  %v4116_v29 = vpop.f32.mrf.mxu1  ;;  %3404 = vmatmul.mubr.msk.bf16.gmra.mxu1 %vm926_vm2, %v3541_v23 }
  0xee   :  { %5253 = vst [vmem:[#allocation23_spill] sm:$0xff] %v4113_v28  ;;  %5254 = vst [vmem:[#allocation24_spill] sm:$0xff] %v4116_v29  ;;  %3279 = vmatprep.mubr.msk.bf16.mxu0 %vm926_vm2, %v3542_v24  ;;  %3407 = vmatprep.mubr.msk.bf16.mxu1 %vm926_vm2, %v3543_v25  ;;  %v3552_v24 = vld [vmem:[%s5123_s0 + $0x1f8] sm:$0xff]  }
  0xef   :  { %v4121_v30 = vpop.f32.mrf.mxu0  ;;  %v4123_v31 = vpop.f32.mrf.mxu1  ;;  %v3553_v25 = vld [vmem:[%s5123_s0 + $0x3f8] sm:$0xff]  }
  0xf0   :  { %5255 = vst [vmem:[#allocation25_spill] sm:$0xff] %v4121_v30  ;;  %5256 = vst [vmem:[#allocation26_spill] sm:$0xff] %v4123_v31 }
  0xf1   :  { %v4125_v32 = vpop.f32.mrf.mxu0  ;;  %v4127_v33 = vpop.f32.mrf.mxu1 }
  0xf2   :  { %5257 = vst [vmem:[#allocation27_spill] sm:$0xff] %v4125_v32  ;;  %5258 = vst [vmem:[#allocation28_spill] sm:$0xff] %v4127_v33 }
  0xf3   :  { %v4141_v38 = vpop.f32.mrf.mxu0  ;;  %v4143_v39 = vpop.f32.mrf.mxu1 }
  0xf4   :  { %5259 = vst [vmem:[#allocation29_spill] sm:$0xff] %v4141_v38  ;;  %5260 = vst [vmem:[#allocation30_spill] sm:$0xff] %v4143_v39 }
  0xf5   :  { %v4145_v40 = vpop.f32.mrf.mxu0  ;;  %3280 = vmatmul.mubr.msk.bf16.gmra.mxu0 %vm926_vm2, %v3544_v34  ;;  %v4148_v41 = vpop.f32.mrf.mxu1  ;;  %3408 = vmatmul.mubr.msk.bf16.gmra.mxu1 %vm926_vm2, %v3545_v35 }
  0xf6   :  { %5261 = vst [vmem:[#allocation31_spill] sm:$0xff] %v4145_v40  ;;  %5262 = vst [vmem:[#allocation32_spill] sm:$0xff] %v4148_v41  ;;  %3283 = vmatprep.mubr.msk.bf16.mxu0 %vm926_vm2, %v3546_v36  ;;  %3411 = vmatprep.mubr.msk.bf16.mxu1 %vm926_vm2, %v3547_v37 }
  0xf7   :  { %v4153_v42 = vpop.f32.mrf.mxu0  ;;  %v4155_v43 = vpop.f32.mrf.mxu1 }
  0xf8   :  { %5263 = vst [vmem:[#allocation33_spill] sm:$0xff] %v4153_v42  ;;  %5264 = vst [vmem:[#allocation34_spill] sm:$0xff] %v4155_v43 }
  0xf9   :  { %v4157_v50 = vpop.f32.mrf.mxu0  ;;  %v4159_v51 = vpop.f32.mrf.mxu1 }
  0xfa   :  { %5265 = vst [vmem:[#allocation35_spill] sm:$0xff] %v4157_v50  ;;  %5266 = vst [vmem:[#allocation36_spill] sm:$0xff] %v4159_v51 }
  0xfb   :  { %v4173_v0 = vpop.f32.mrf.mxu0  ;;  %v4175_v1 = vpop.f32.mrf.mxu1 }
  0xfc   :  { %5267 = vst [vmem:[#allocation37_spill] sm:$0xff] %v4173_v0  ;;  %5268 = vst [vmem:[#allocation38_spill] sm:$0xff] %v4175_v1 }
  0xfd   :  { %v4177_v10 = vpop.f32.mrf.mxu0  ;;  %3284 = vmatmul.mubr.msk.bf16.gmra.mxu0 %vm926_vm2, %v3548_v52  ;;  %v4180_v11 = vpop.f32.mrf.mxu1  ;;  %3412 = vmatmul.mubr.msk.bf16.gmra.mxu1 %vm926_vm2, %v3549_v53 }
  0xfe   :  { %5269 = vst [vmem:[#allocation39_spill] sm:$0xff] %v4177_v10  ;;  %5270 = vst [vmem:[#allocation40_spill] sm:$0xff] %v4180_v11  ;;  %3287 = vmatprep.mubr.msk.bf16.mxu0 %vm926_vm2, %v3550_v62  ;;  %3415 = vmatprep.mubr.msk.bf16.mxu1 %vm926_vm2, %v3551_v63 }
  0xff   :  { %v4185_v12 = vpop.f32.mrf.mxu0  ;;  %v4187_v13 = vpop.f32.mrf.mxu1 }
 0x100   :  { %5271 = vst [vmem:[#allocation41_spill] sm:$0xff] %v4185_v12  ;;  %5272 = vst [vmem:[#allocation42_spill] sm:$0xff] %v4187_v13 }
 0x101   :  { %v4189_v22 = vpop.f32.mrf.mxu0  ;;  %v4191_v23 = vpop.f32.mrf.mxu1 }
 0x102   :  { %5273 = vst [vmem:[#allocation43_spill] sm:$0xff] %v4189_v22  ;;  %5274 = vst [vmem:[#allocation44_spill] sm:$0xff] %v4191_v23 }
 0x103   :  { %v4199_v34 = vpop.f32.mrf.mxu0  ;;  %v4201_v35 = vpop.f32.mrf.mxu1 }
 0x104   :  { %5275 = vst [vmem:[#allocation45_spill] sm:$0xff] %v4199_v34  ;;  %5276 = vst [vmem:[#allocation46_spill] sm:$0xff] %v4201_v35 }
 0x105   :  { %v4203_v36 = vpop.f32.mrf.mxu0  ;;  %3288 = vmatmul.mubr.msk.bf16.gmra.mxu0 %vm926_vm2, %v3552_v24  ;;  %v4206_v37 = vpop.f32.mrf.mxu1  ;;  %3416 = vmatmul.mubr.msk.bf16.gmra.mxu1 %vm926_vm2, %v3553_v25 }
 0x106   :  { %5277 = vst [vmem:[#allocation47_spill] sm:$0xff] %v4203_v36  ;;  %5278 = vst [vmem:[#allocation48_spill] sm:$0xff] %v4206_v37 }
 0x107   :  { %v4209_v52 = vpop.f32.mrf.mxu0  ;;  %v4211_v53 = vpop.f32.mrf.mxu1 }
 0x108   :  { %5279 = vst [vmem:[#allocation49_spill] sm:$0xff] %v4209_v52  ;;  %5280 = vst [vmem:[#allocation50_spill] sm:$0xff] %v4211_v53 }
 0x109   :  { %v4213_v62 = vpop.f32.mrf.mxu0  ;;  %v4215_v63 = vpop.f32.mrf.mxu1 }
 0x10a   :  { %5281 = vst [vmem:[#allocation51_spill] sm:$0xff] %v4213_v62  ;;  %5282 = vst [vmem:[#allocation52_spill] sm:$0xff] %v4215_v63 }
 0x10b   :  { %v4217_v23 = vpop.f32.mrf.mxu0  ;;  %v4219_v34 = vpop.f32.mrf.mxu1 }
 0x10c   :  { %5283 = vst [vmem:[#allocation53_spill] sm:$0xff] %v4217_v23  ;;  %5284 = vst [vmem:[#allocation54_spill] sm:$0xff] %v4219_v34 }
 0x10d   :  { %v4221_v35 = vpop.f32.mrf.mxu0  ;;  %v4223_v36 = vpop.f32.mrf.mxu1 }
 0x10e   :  { %5285 = vst [vmem:[#allocation55_spill] sm:$0xff] %v4223_v36 }
 0x10f   :  { %v4229_v52 = vpop.f32.mrf.mxu0  ;;  %v4231_v53 = vpop.f32.mrf.mxu1 }
 0x110   :  { %5286 = vst [vmem:[#allocation56_spill] sm:$0xff] %v4231_v53  ;;  %v5391_v14 = vmax.f32 %v3993_v46, %v4229_v52 }
 0x111   :  { %v4237_v23 = vpop.f32.mrf.mxu0  ;;  %v4239_v62 = vpop.f32.mrf.mxu1 }
 0x112   :  { %5287 = vst [vmem:[#allocation57_spill] sm:$0xff] %v4239_v62  ;;  %v5395_v46 = vmax.f32 %v3997_v48, %v4237_v23 }
 0x113   :  { %v4245_v36 = vpop.f32.mrf.mxu0  ;;  %v4247_v45 = vpop.f32.mrf.mxu1 }
 0x114   :  { %5288 = vst [vmem:[#allocation58_spill] sm:$0xff] %v4247_v45 }
 0x115   :  { %v4253_v53 = vpop.f32.mrf.mxu0  ;;  %v4255_v47 = vpop.f32.mrf.mxu1 }
 0x116   :  { %5289 = vst [vmem:[#allocation59_spill] sm:$0xff] %v4255_v47 }
 0x117   :  { %v4261_v62 = vpop.f32.mrf.mxu0  ;;  %v4263_v49 = vpop.f32.mrf.mxu1 }
 0x118   :  { %5290 = vst [vmem:[#allocation60_spill] sm:$0xff] %v4263_v49 }
 0x119   :  { %v4269_v45 = vpop.f32.mrf.mxu0  ;;  %v4271_v55 = vpop.f32.mrf.mxu1 }
 0x11a   :  { %5291 = vst [vmem:[#allocation61_spill] sm:$0xff] %v4271_v55 }
 0x11b   :  { %v4277_v47 = vpop.f32.mrf.mxu0  ;;  %v4279_v57 = vpop.f32.mrf.mxu1 }
 0x11c   :  { %5292 = vst [vmem:[#allocation62_spill] sm:$0xff] %v4279_v57 }
 0x11d   :  { %v4285_v49 = vpop.f32.mrf.mxu0  ;;  %v4287_v59 = vpop.f32.mrf.mxu1 }
 0x11e   :  { %5293 = vst [vmem:[#allocation63_spill] sm:$0xff] %v4287_v59 }
 0x11f   :  { %v4293_v55 = vpop.f32.mrf.mxu0  ;;  %v4295_v61 = vpop.f32.mrf.mxu1 }
 0x120   :  { %5294 = vst [vmem:[#allocation64_spill] sm:$0xff] %v4295_v61 }
 0x121   :  { %v4301_v57 = vpop.f32.mrf.mxu0  ;;  %v4303_v3 = vpop.f32.mrf.mxu1 }
 0x122   :  { %5295 = vst [vmem:[#allocation65_spill] sm:$0xff] %v4303_v3 }
 0x123   :  { %v4309_v59 = vpop.f32.mrf.mxu0  ;;  %v4311_v5 = vpop.f32.mrf.mxu1 }
 0x124   :  { %5296 = vst [vmem:[#allocation66_spill] sm:$0xff] %v4309_v59  ;;  %5297 = vst [vmem:[#allocation67_spill] sm:$0xff] %v4311_v5 }
 0x125   :  { %v4317_v61 = vpop.f32.mrf.mxu0  ;;  %v4319_v7 = vpop.f32.mrf.mxu1 }
 0x126   :  { %5298 = vst [vmem:[#allocation68_spill] sm:$0xff] %v4317_v61  ;;  %5299 = vst [vmem:[#allocation69_spill] sm:$0xff] %v4319_v7 }
 0x127   :  { %v4325_v3 = vpop.f32.mrf.mxu0  ;;  %v4327_v9 = vpop.f32.mrf.mxu1 }
 0x128   :  { %5300 = vst [vmem:[#allocation70_spill] sm:$0xff] %v4325_v3  ;;  %5301 = vst [vmem:[#allocation71_spill] sm:$0xff] %v4327_v9 }
 0x129   :  { %v4333_v5 = vpop.f32.mrf.mxu0  ;;  %v4335_v15 = vpop.f32.mrf.mxu1 }
 0x12a   :  { %5302 = vst [vmem:[#allocation72_spill] sm:$0xff] %v4333_v5  ;;  %5303 = vst [vmem:[#allocation73_spill] sm:$0xff] %v4335_v15 }
 0x12b   :  { %v4341_v7 = vpop.f32.mrf.mxu0  ;;  %v4343_v17 = vpop.f32.mrf.mxu1 }
 0x12c   :  { %5304 = vst [vmem:[#allocation74_spill] sm:$0xff] %v4341_v7  ;;  %5305 = vst [vmem:[#allocation75_spill] sm:$0xff] %v4343_v17 }
 0x12d   :  { %v4349_v9 = vpop.f32.mrf.mxu0  ;;  %v4351_v19 = vpop.f32.mrf.mxu1 }
 0x12e   :  { %5306 = vst [vmem:[#allocation76_spill] sm:$0xff] %v4349_v9  ;;  %5307 = vst [vmem:[#allocation77_spill] sm:$0xff] %v4351_v19 }
 0x12f   :  { %v4357_v15 = vpop.f32.mrf.mxu0  ;;  %v4359_v21 = vpop.f32.mrf.mxu1 }
 0x130   :  { %5308 = vst [vmem:[#allocation78_spill] sm:$0xff] %v4357_v15  ;;  %5309 = vst [vmem:[#allocation79_spill] sm:$0xff] %v4359_v21 }
 0x131   :  { %v4365_v17 = vpop.f32.mrf.mxu0  ;;  %v4367_v27 = vpop.f32.mrf.mxu1 }
 0x132   :  { %5310 = vst [vmem:[#allocation80_spill] sm:$0xff] %v4365_v17  ;;  %5311 = vst [vmem:[#allocation81_spill] sm:$0xff] %v4367_v27 }
 0x133   :  { %v4373_v19 = vpop.f32.mrf.mxu0  ;;  %v4375_v29 = vpop.f32.mrf.mxu1 }
 0x134   :  { %5312 = vst [vmem:[#allocation82_spill] sm:$0xff] %v4373_v19  ;;  %5313 = vst [vmem:[#allocation83_spill] sm:$0xff] %v4375_v29 }
 0x135   :  { %v4381_v21 = vpop.f32.mrf.mxu0  ;;  %v4383_v31 = vpop.f32.mrf.mxu1 }
 0x136   :  { %5314 = vst [vmem:[#allocation84_spill] sm:$0xff] %v4381_v21  ;;  %5315 = vst [vmem:[#allocation85_spill] sm:$0xff] %v4383_v31 }
 0x137   :  { %v4389_v27 = vpop.f32.mrf.mxu0  ;;  %v4391_v33 = vpop.f32.mrf.mxu1 }
 0x138   :  { %5316 = vst [vmem:[#allocation86_spill] sm:$0xff] %v4389_v27  ;;  %5317 = vst [vmem:[#allocation87_spill] sm:$0xff] %v4391_v33 }
 0x139   :  { %v4397_v29 = vpop.f32.mrf.mxu0  ;;  %v4399_v39 = vpop.f32.mrf.mxu1 }
 0x13a   :  { %5318 = vst [vmem:[#allocation88_spill] sm:$0xff] %v4397_v29  ;;  %5319 = vst [vmem:[#allocation89_spill] sm:$0xff] %v4399_v39 }
 0x13b   :  { %v4405_v31 = vpop.f32.mrf.mxu0  ;;  %v4407_v41 = vpop.f32.mrf.mxu1 }
 0x13c   :  { %5320 = vst [vmem:[#allocation90_spill] sm:$0xff] %v4405_v31  ;;  %5321 = vst [vmem:[#allocation91_spill] sm:$0xff] %v4407_v41 }
 0x13d   :  { %v4413_v33 = vpop.f32.mrf.mxu0  ;;  %v4415_v43 = vpop.f32.mrf.mxu1 }
 0x13e   :  { %5322 = vst [vmem:[#allocation92_spill] sm:$0xff] %v4413_v33  ;;  %5323 = vst [vmem:[#allocation93_spill] sm:$0xff] %v4415_v43 }
 0x13f   :  { %v4421_v39 = vpop.f32.mrf.mxu0  ;;  %v4423_v51 = vpop.f32.mrf.mxu1 }
 0x140   :  { %5324 = vst [vmem:[#allocation94_spill] sm:$0xff] %v4421_v39  ;;  %5325 = vst [vmem:[#allocation95_spill] sm:$0xff] %v4423_v51 }
 0x141   :  { %v4429_v41 = vpop.f32.mrf.mxu0  ;;  %v4431_v1 = vpop.f32.mrf.mxu1 }
 0x142   :  { %5326 = vst [vmem:[#allocation96_spill] sm:$0xff] %v4429_v41  ;;  %5327 = vst [vmem:[#allocation97_spill] sm:$0xff] %v4431_v1 }
 0x143   :  { %v4437_v43 = vpop.f32.mrf.mxu0  ;;  %v4439_v11 = vpop.f32.mrf.mxu1 }
 0x144   :  { %5329 = vst [vmem:[#allocation98_spill] sm:$0xff] %v4437_v43  ;;  %5330 = vst [vmem:[#allocation99_spill] sm:$0xff] %v4439_v11 }
 0x145   :  { %v4445_v51 = vpop.f32.mrf.mxu0  ;;  %v4447_v13 = vpop.f32.mrf.mxu1 }
 0x146   :  { %5333 = vst [vmem:[#allocation100_spill] sm:$0xff] %v4445_v51  ;;  %5334 = vst [vmem:[#allocation101_spill] sm:$0xff] %v4447_v13 }
 0x147   :  { %v4453_v1 = vpop.f32.mrf.mxu0  ;;  %v4455_v33 = vpop.f32.mrf.mxu1 }
 0x148   :  { %5336 = vst [vmem:[#allocation102_spill] sm:$0xff] %v4453_v1  ;;  %5337 = vst [vmem:[#allocation103_spill] sm:$0xff] %v4455_v33 }
 0x149   :  { %v4461_v11 = vpop.f32.mrf.mxu0  ;;  %v4463_v39 = vpop.f32.mrf.mxu1 }
 0x14a   :  { %5340 = vst [vmem:[#allocation104_spill] sm:$0xff] %v4461_v11  ;;  %5341 = vst [vmem:[#allocation105_spill] sm:$0xff] %v4463_v39 }
 0x14b   :  { %v4469_v13 = vpop.f32.mrf.mxu0  ;;  %v4471_v37 = vpop.f32.mrf.mxu1 }
 0x14c   :  { %5344 = vst [vmem:[#allocation106_spill] sm:$0xff] %v4469_v13  ;;  %5345 = vst [vmem:[#allocation107_spill] sm:$0xff] %v4471_v37 }
 0x14d   :  { %v4477_v33 = vpop.f32.mrf.mxu0  ;;  %v4479_v43 = vpop.f32.mrf.mxu1 }
 0x14f   :  { %v4481_v41 = vpop.f32.mrf.mxu0  ;;  %v4483_v24 = vpop.f32.mrf.mxu1 }
 0x151   :  { %v4485_v11 = vpop.f32.mrf.mxu0  ;;  %v4487_v25 = vpop.f32.mrf.mxu1 }
 0x153   :  { %v4489_v39 = vpop.f32.mrf.mxu0  ;;  %v4491_v51 = vpop.f32.mrf.mxu1 }
 0x155   :  { %v4493_v63 = vpop.f32.mrf.mxu0  ;;  %v4495_v13 = vpop.f32.mrf.mxu1 }
 0x157   :  { %v4497_v34 = vpop.f32.mrf.mxu0  ;;  %v4499_v37 = vpop.f32.mrf.mxu1 }
 0x159   :  { %v4501_v1 = vpop.f32.mrf.mxu0  ;;  %v4503_v12 = vpop.f32.mrf.mxu1 }
 0x15b   :  { %v4505_v10 = vpop.f32.mrf.mxu0  ;;  %v4507_v22 = vpop.f32.mrf.mxu1 }
 0x15d   :  { %v4509_v31 = vpop.f32.mrf.mxu0  ;;  %v4511_v0 = vpop.f32.mrf.mxu1 }
 0x15f   :  { %v4513_v29 = vpop.f32.mrf.mxu0  ;;  %v4515_v50 = vpop.f32.mrf.mxu1 }
 0x161   :  { %v4517_v27 = vpop.f32.mrf.mxu0  ;;  %v4519_v42 = vpop.f32.mrf.mxu1 }
 0x163   :  { %v4521_v21 = vpop.f32.mrf.mxu0  ;;  %v4523_v40 = vpop.f32.mrf.mxu1 }
 0x165   :  { %v4525_v19 = vpop.f32.mrf.mxu0  ;;  %v4527_v38 = vpop.f32.mrf.mxu1 }
 0x166   :  { %5348 = vst [vmem:[#allocation108_spill] sm:$0xff] %v4527_v38 }
 0x167   :  { %v4529_v17 = vpop.f32.mrf.mxu0  ;;  %v4531_v32 = vpop.f32.mrf.mxu1 }
 0x168   :  { %5349 = vst [vmem:[#allocation109_spill] sm:$0xff] %v4529_v17  ;;  %5350 = vst [vmem:[#allocation110_spill] sm:$0xff] %v4531_v32  ;;  %v5389_v17 = vld [vmem:[#allocation55_spill] sm:$0xff] }
 0x169   :  { %v4533_v15 = vpop.f32.mrf.mxu0  ;;  %v4535_v30 = vpop.f32.mrf.mxu1 }
 0x16a   :  { %5351 = vst [vmem:[#allocation111_spill] sm:$0xff] %v4533_v15  ;;  %5352 = vst [vmem:[#allocation112_spill] sm:$0xff] %v4535_v30 }
 0x16b   :  { %v4537_v9 = vpop.f32.mrf.mxu0  ;;  %v4539_v28 = vpop.f32.mrf.mxu1 }
 0x16c   :  { %5353 = vst [vmem:[#allocation113_spill] sm:$0xff] %v4537_v9  ;;  %5354 = vst [vmem:[#allocation114_spill] sm:$0xff] %v4539_v28 }
 0x16d   :  { %v4541_v7 = vpop.f32.mrf.mxu0  ;;  %v4543_v26 = vpop.f32.mrf.mxu1 }
 0x16e   :  { %5355 = vst [vmem:[#allocation115_spill] sm:$0xff] %v4541_v7  ;;  %5356 = vst [vmem:[#allocation116_spill] sm:$0xff] %v4543_v26 }
 0x16f   :  { %v4545_v5 = vpop.f32.mrf.mxu0  ;;  %v4547_v20 = vpop.f32.mrf.mxu1 }
 0x170   :  { %5357 = vst [vmem:[#allocation117_spill] sm:$0xff] %v4545_v5  ;;  %5358 = vst [vmem:[#allocation118_spill] sm:$0xff] %v4547_v20 }
 0x171   :  { %v4549_v3 = vpop.f32.mrf.mxu0  ;;  %v4551_v18 = vpop.f32.mrf.mxu1 }
 0x172   :  { %5359 = vst [vmem:[#allocation119_spill] sm:$0xff] %v4549_v3  ;;  %5360 = vst [vmem:[#allocation120_spill] sm:$0xff] %v4551_v18 }
 0x173   :  { %v4553_v32 = vpop.f32.mrf.mxu0  ;;  %v4555_v15 = vpop.f32.mrf.mxu1 }
 0x174   :  { %5361 = vst [vmem:[#allocation121_spill] sm:$0xff] %v4553_v32  ;;  %5362 = vst [vmem:[#allocation122_spill] sm:$0xff] %v4555_v15 }
 0x175   :  { %v4557_v30 = vpop.f32.mrf.mxu0  ;;  %v4559_v9 = vpop.f32.mrf.mxu1 }
 0x176   :  { %5363 = vst [vmem:[#allocation123_spill] sm:$0xff] %v4557_v30  ;;  %5364 = vst [vmem:[#allocation124_spill] sm:$0xff] %v4559_v9 }
 0x177   :  { %v4561_v28 = vpop.f32.mrf.mxu0  ;;  %v4563_v7 = vpop.f32.mrf.mxu1 }
 0x178   :  { %5365 = vst [vmem:[#allocation125_spill] sm:$0xff] %v4561_v28  ;;  %5366 = vst [vmem:[#allocation126_spill] sm:$0xff] %v4563_v7 }
 0x179   :  { %v4565_v26 = vpop.f32.mrf.mxu0  ;;  %v4567_v5 = vpop.f32.mrf.mxu1 }
 0x17a   :  { %5367 = vst [vmem:[#allocation127_spill] sm:$0xff] %v4565_v26  ;;  %5368 = vst [vmem:[#allocation128_spill] sm:$0xff] %v4567_v5 }
 0x17b   :  { %v4569_v20 = vpop.f32.mrf.mxu0  ;;  %v4571_v3 = vpop.f32.mrf.mxu1 }
 0x17c   :  { %5369 = vst [vmem:[#allocation129_spill] sm:$0xff] %v4569_v20  ;;  %5370 = vst [vmem:[#allocation130_spill] sm:$0xff] %v4571_v3 }
 0x17d   :  { %v4573_v18 = vpop.f32.mrf.mxu0  ;;  %v4575_v32 = vpop.f32.mrf.mxu1 }
 0x17e   :  { %5371 = vst [vmem:[#allocation131_spill] sm:$0xff] %v4573_v18  ;;  %5372 = vst [vmem:[#allocation132_spill] sm:$0xff] %v4575_v32 }
 0x17f   :  { %v4577_v15 = vpop.f32.mrf.mxu0  ;;  %v4579_v30 = vpop.f32.mrf.mxu1 }
 0x180   :  { %5373 = vst [vmem:[#allocation133_spill] sm:$0xff] %v4577_v15  ;;  %5374 = vst [vmem:[#allocation134_spill] sm:$0xff] %v4579_v30 }
 0x181   :  { %v4581_v9 = vpop.f32.mrf.mxu0  ;;  %v4583_v28 = vpop.f32.mrf.mxu1 }
 0x182   :  { %5375 = vst [vmem:[#allocation135_spill] sm:$0xff] %v4581_v9  ;;  %5376 = vst [vmem:[#allocation136_spill] sm:$0xff] %v4583_v28 }
 0x183   :  { %v4585_v7 = vpop.f32.mrf.mxu0  ;;  %v4587_v26 = vpop.f32.mrf.mxu1 }
 0x184   :  { %5377 = vst [vmem:[#allocation137_spill] sm:$0xff] %v4585_v7  ;;  %5378 = vst [vmem:[#allocation138_spill] sm:$0xff] %v4587_v26 }
 0x185   :  { %v4589_v5 = vpop.f32.mrf.mxu0  ;;  %v4591_v20 = vpop.f32.mrf.mxu1 }
 0x186   :  { %5379 = vst [vmem:[#allocation139_spill] sm:$0xff] %v4589_v5  ;;  %5380 = vst [vmem:[#allocation140_spill] sm:$0xff] %v4591_v20 }
 0x187   :  { %v4593_v3 = vpop.f32.mrf.mxu0  ;;  %v4595_v18 = vpop.f32.mrf.mxu1 }
 0x188   :  { %5381 = vst [vmem:[#allocation141_spill] sm:$0xff] %v4593_v3  ;;  %5382 = vst [vmem:[#allocation142_spill] sm:$0xff] %v4595_v18  ;;  %v4610_v3 = vld [vmem:[%s5124_s2] ss:$0 sm:$0xff] }
 0x189   :  { %v4597_v32 = vpop.f32.mrf.mxu0  ;;  %v4599_v15 = vpop.f32.mrf.mxu1 }
 0x18a   :  { %5383 = vst [vmem:[#allocation143_spill] sm:$0xff] %v4597_v32  ;;  %5384 = vst [vmem:[#allocation144_spill] sm:$0xff] %v4599_v15  ;;  %v5387_v15 = vmax.f32 %v3985_v44, %v4221_v35  ;;  %v5392_v44 = vld [vmem:[#allocation3_spill] sm:$0xff] }
 0x18b   :  { %v4601_v30 = vpop.f32.mrf.mxu0  ;;  %v4603_v9 = vpop.f32.mrf.mxu1 }
 0x18c   :  { %5385 = vst [vmem:[#allocation145_spill] sm:$0xff] %v4601_v30  ;;  %5386 = vst [vmem:[#allocation146_spill] sm:$0xff] %v4603_v9  ;;  %v5388_v30 = vld [vmem:[#allocation2_spill] sm:$0xff] }
 0x18d   :  { %v3261_v28 = vpop.f32.mrf.mxu0  ;;  %v3389_v7 = vpop.f32.mrf.mxu1  ;;  %v5390_v9 = vmax.f32 %v5388_v30, %v5389_v17 }
 0x18e   :  { %v2441_v26 = vmax.f32 %v4477_v33, %v3261_v28  ;;  %v2473_v5 = vmax.f32 %v4479_v43, %v3389_v7 }
 0x18f   :  { %v1736_v18 = vpop.f32.mrf.mxu0  ;;  %v2248_v20 = vpop.f32.mrf.mxu1 }
 0x190   :  { %v2505_v32 = vmax.f32 %v5387_v15, %v2441_v26  ;;  %v2537_v61 = vmax.f32 %v5390_v9, %v2473_v5  ;;  %v2439_v16 = vmax.f32 %v4481_v41, %v1736_v18  ;;  %v2471_v28 = vmax.f32 %v4483_v24, %v2248_v20  ;;  %v5393_v15 = vld [vmem:[#allocation56_spill] sm:$0xff]  ;;  %v5397_v41 = vld [vmem:[#allocation57_spill] sm:$0xff] }
 0x191   :  { %v3262_v7 = vpop.f32.mrf.mxu0  ;;  %v3390_v33 = vpop.f32.mrf.mxu1  ;;  %v5394_v26 = vmax.f32 %v5392_v44, %v5393_v15  ;;  %v5400_v44 = vld [vmem:[#allocation5_spill] sm:$0xff]  ;;  %v5401_v15 = vld [vmem:[#allocation58_spill] sm:$0xff] }
 0x192   :  { %v2576_v43 = vadd.f32 %v4610_v3, %v2505_v32  ;;  %v2608_v59 = vadd.f32 %v4610_v3, %v2537_v61  ;;  %v2503_v38 = vmax.f32 %v5391_v14, %v2439_v16  ;;  %v2442_v5 = vmax.f32 %v4485_v11, %v3262_v7  ;;  %v5396_v16 = vld [vmem:[#allocation4_spill] sm:$0xff] }
 0x193   :  { %v2535_v35 = vmax.f32 %v5394_v26, %v2471_v28  ;;  %v2474_v9 = vmax.f32 %v4487_v25, %v3390_v33  ;;  %v1739_v17 = vpop.f32.mrf.mxu0  ;;  %v2251_v18 = vpop.f32.mrf.mxu1  ;;  %v5398_v52 = vmax.f32 %v5396_v16, %v5397_v41  ;;  %v5399_v33 = vmax.f32 %v4013_v54, %v4245_v36  ;;  %v5404_v54 = vld [vmem:[#allocation6_spill] sm:$0xff]  ;;  %v5405_v36 = vld [vmem:[#allocation59_spill] sm:$0xff] }
 0x194   :  { %v2640_v20 = vmax.f32 %v2576_v43, 0.0  ;;  %v2672_v30 = vmax.f32 %v2608_v59, 0.0  ;;  %v2574_v32 = vadd.f32 %v4610_v3, %v2503_v38  ;;  %v2506_v14 = vmax.f32 %v5395_v46, %v2442_v5 }
 0x195   :  { %v2606_v61 = vadd.f32 %v4610_v3, %v2535_v35  ;;  %v2538_v24 = vmax.f32 %v5398_v52, %v2474_v9  ;;  %v2440_v11 = vmax.f32 %v4489_v39, %v1739_v17  ;;  %v2472_v25 = vmax.f32 %v4491_v51, %v2251_v18  ;;  %v3265_v28 = vpop.f32.mrf.mxu0  ;;  %v3393_v7 = vpop.f32.mrf.mxu1 }
 0x196   :  { %2704 = vst [vmem:[%s5125_s3 + $0x10] sm:$0xff] %v2640_v20  ;;  %2736 = vst [vmem:[%s5125_s3 + $0x110] sm:$0xff] %v2672_v30  ;;  %v2638_v48 = vmax.f32 %v2574_v32, 0.0  ;;  %v2445_v38 = vmax.f32 %v4493_v63, %v3265_v28  ;;  %v2477_v23 = vmax.f32 %v4495_v13, %v3393_v7  ;;  %v2577_v39 = vadd.f32 %v4610_v3, %v2506_v14 }
 0x197   :  { %v2670_v59 = vmax.f32 %v2606_v61, 0.0  ;;  %v2609_v51 = vadd.f32 %v4610_v3, %v2538_v24  ;;  %v2504_v43 = vmax.f32 %v5399_v33, %v2440_v11  ;;  %v5402_v26 = vmax.f32 %v5400_v44, %v5401_v15  ;;  %v1752_v5 = vpop.f32.mrf.mxu0  ;;  %v2264_v9 = vpop.f32.mrf.mxu1  ;;  %v5408_v11 = vld [vmem:[#allocation7_spill] sm:$0xff]  ;;  %v5412_v33 = vld [vmem:[#allocation8_spill] sm:$0xff] }
 0x198   :  { %2702 = vst [vmem:[%s5125_s3] sm:$0xff] %v2638_v48  ;;  %v5403_v13 = vmax.f32 %v4017_v56, %v4253_v53  ;;  %v5406_v17 = vmax.f32 %v5404_v54, %v5405_v36  ;;  %v2443_v20 = vmax.f32 %v4497_v34, %v1752_v5  ;;  %v2475_v30 = vmax.f32 %v4499_v37, %v2264_v9  ;;  %v5409_v34 = vld [vmem:[#allocation60_spill] sm:$0xff] }
 0x199   :  { %v2536_v35 = vmax.f32 %v5402_v26, %v2472_v25  ;;  %2734 = vst [vmem:[%s5125_s3 + $0x100] sm:$0xff] %v2670_v59  ;;  %v2641_v32 = vmax.f32 %v2577_v39, 0.0  ;;  %v2673_v61 = vmax.f32 %v2609_v51, 0.0  ;;  %v2575_v46 = vadd.f32 %v4610_v3, %v2504_v43  ;;  %v3266_v16 = vpop.f32.mrf.mxu0  ;;  %v3394_v41 = vpop.f32.mrf.mxu1  ;;  %v5413_v43 = vld [vmem:[#allocation61_spill] sm:$0xff] }
 0x19a   :  { %v2509_v63 = vmax.f32 %v5403_v13, %v2445_v38  ;;  %v2541_v18 = vmax.f32 %v5406_v17, %v2477_v23  ;;  %v5407_v53 = vmax.f32 %v4025_v58, %v4261_v62  ;;  %v5410_v25 = vmax.f32 %v5408_v11, %v5409_v34  ;;  %v5416_v17 = vld [vmem:[#allocation9_spill] sm:$0xff] }
 0x19b   :  { %v2607_v14 = vadd.f32 %v4610_v3, %v2536_v35  ;;  %2705 = vst [vmem:[%s5125_s3 + $0x18] sm:$0xff] %v2641_v32  ;;  %2737 = vst [vmem:[%s5125_s3 + $0x118] sm:$0xff] %v2673_v61  ;;  %v2639_v28 = vmax.f32 %v2575_v46, 0.0  ;;  %v2446_v48 = vmax.f32 %v4501_v1, %v3266_v16  ;;  %v2478_v59 = vmax.f32 %v4503_v12, %v3394_v41  ;;  %v1755_v58 = vpop.f32.mrf.mxu0  ;;  %v2267_v62 = vpop.f32.mrf.mxu1 }
 0x19c   :  { %v2580_v52 = vadd.f32 %v4610_v3, %v2509_v63  ;;  %v2612_v56 = vadd.f32 %v4610_v3, %v2541_v18  ;;  %v2507_v24 = vmax.f32 %v5407_v53, %v2443_v20  ;;  %v2539_v37 = vmax.f32 %v5410_v25, %v2475_v30  ;;  %v5417_v18 = vld [vmem:[#allocation62_spill] sm:$0xff] }
 0x19d   :  { %v2671_v7 = vmax.f32 %v2607_v14, 0.0  ;;  %2703 = vst [vmem:[%s5125_s3 + $0x8] sm:$0xff] %v2639_v28  ;;  %v5411_v1 = vmax.f32 %v4029_v60, %v4269_v45  ;;  %v5414_v44 = vmax.f32 %v5412_v33, %v5413_v43  ;;  %v2444_v26 = vmax.f32 %v4505_v10, %v1755_v58  ;;  %v3269_v5 = vpop.f32.mrf.mxu0  ;;  %v3397_v9 = vpop.f32.mrf.mxu1  ;;  %v5424_v28 = vld [vmem:[#allocation11_spill] sm:$0xff] }
 0x19e   :  { %v2644_v38 = vmax.f32 %v2580_v52, 0.0  ;;  %v2676_v23 = vmax.f32 %v2612_v56, 0.0  ;;  %v2578_v39 = vadd.f32 %v4610_v3, %v2507_v24  ;;  %v2610_v51 = vadd.f32 %v4610_v3, %v2539_v37 }
 0x19f   :  { %2735 = vst [vmem:[%s5125_s3 + $0x108] sm:$0xff] %v2671_v7  ;;  %v2510_v12 = vmax.f32 %v5411_v1, %v2446_v48  ;;  %v2542_v15 = vmax.f32 %v5414_v44, %v2478_v59  ;;  %v2476_v35 = vmax.f32 %v4507_v22, %v2267_v62  ;;  %v2449_v13 = vmax.f32 %v4509_v31, %v3269_v5  ;;  %v1768_v32 = vpop.f32.mrf.mxu0  ;;  %v2280_v61 = vpop.f32.mrf.mxu1  ;;  %v5428_v1 = vld [vmem:[#allocation12_spill] sm:$0xff] }
 0x1a0   :  { %2708 = vst [vmem:[%s5125_s3 + $0x30] sm:$0xff] %v2644_v38  ;;  %2740 = vst [vmem:[%s5125_s3 + $0x130] sm:$0xff] %v2676_v23  ;;  %v2642_v45 = vmax.f32 %v2578_v39, 0.0  ;;  %v2674_v60 = vmax.f32 %v2610_v51, 0.0  ;;  %v2481_v63 = vmax.f32 %v4511_v0, %v3397_v9  ;;  %v5415_v54 = vmax.f32 %v4045_v2, %v4277_v47  ;;  %v5420_v47 = vld [vmem:[#allocation10_spill] sm:$0xff]  ;;  %v5421_v2 = vld [vmem:[#allocation63_spill] sm:$0xff] }
 0x1a1   :  { %v2581_v10 = vadd.f32 %v4610_v3, %v2510_v12  ;;  %v2613_v22 = vadd.f32 %v4610_v3, %v2542_v15  ;;  %v5418_v20 = vmax.f32 %v5416_v17, %v5417_v18  ;;  %v5419_v31 = vmax.f32 %v4049_v4, %v4285_v49  ;;  %v3270_v11 = vpop.f32.mrf.mxu0  ;;  %v3398_v34 = vpop.f32.mrf.mxu1  ;;  %v5429_v12 = vld [vmem:[#allocation65_spill] sm:$0xff]  ;;  %v5431_v9 = vld [vmem:[#allocation108_spill] sm:$0xff] }
 0x1a2   :  { %v2508_v36 = vmax.f32 %v5415_v54, %v2444_v26  ;;  %2706 = vst [vmem:[%s5125_s3 + $0x20] sm:$0xff] %v2642_v45  ;;  %2738 = vst [vmem:[%s5125_s3 + $0x120] sm:$0xff] %v2674_v60  ;;  %v5422_v46 = vmax.f32 %v5420_v47, %v5421_v2  ;;  %v2447_v16 = vmax.f32 %v4513_v29, %v1768_v32  ;;  %v5425_v29 = vld [vmem:[#allocation64_spill] sm:$0xff]  ;;  %v5432_v60 = vld [vmem:[#allocation13_spill] sm:$0xff] }
 0x1a3   :  { %v2540_v30 = vmax.f32 %v5418_v20, %v2476_v35  ;;  %v2513_v0 = vmax.f32 %v5419_v31, %v2449_v13  ;;  %v2479_v41 = vmax.f32 %v4515_v50, %v2280_v61  ;;  %v2645_v52 = vmax.f32 %v2581_v10, 0.0  ;;  %v5433_v13 = vld [vmem:[#allocation66_spill] sm:$0xff]  ;;  %v5436_v54 = vld [vmem:[#allocation67_spill] sm:$0xff]  ;;  %v5441_v31 = vld [vmem:[#allocation16_spill] sm:$0xff] }
 0x1a4   :  { %v2545_v14 = vmax.f32 %v5422_v46, %v2481_v63  ;;  %v2677_v56 = vmax.f32 %v2613_v22, 0.0  ;;  %v2579_v53 = vadd.f32 %v4610_v3, %v2508_v36  ;;  %v5423_v4 = vmax.f32 %v4057_v6, %v4293_v55  ;;  %v1771_v55 = vpop.f32.mrf.mxu0  ;;  %v2283_v6 = vpop.f32.mrf.mxu1  ;;  %v5435_v22 = vld [vmem:[#allocation14_spill] sm:$0xff]  ;;  %v5444_v46 = vld [vmem:[#allocation109_spill] sm:$0xff] }
 0x1a5   :  { %v2611_v24 = vadd.f32 %v4610_v3, %v2540_v30  ;;  %v2584_v25 = vadd.f32 %v4610_v3, %v2513_v0  ;;  %v5426_v7 = vmax.f32 %v5424_v28, %v5425_v29  ;;  %2709 = vst [vmem:[%s5125_s3 + $0x38] sm:$0xff] %v2645_v52  ;;  %v2450_v58 = vmax.f32 %v4517_v27, %v3270_v11  ;;  %v5439_v30 = vld [vmem:[#allocation68_spill] sm:$0xff]  ;;  %v5442_v0 = vld [vmem:[#allocation69_spill] sm:$0xff] }
 0x1a6   :  { %v2616_v49 = vadd.f32 %v4610_v3, %v2545_v14  ;;  %v2511_v37 = vmax.f32 %v5423_v4, %v2447_v16  ;;  %2741 = vst [vmem:[%s5125_s3 + $0x138] sm:$0xff] %v2677_v56  ;;  %v2643_v48 = vmax.f32 %v2579_v53, 0.0  ;;  %v2482_v62 = vmax.f32 %v4519_v42, %v3398_v34  ;;  %v3273_v26 = vpop.f32.mrf.mxu0  ;;  %v3401_v35 = vpop.f32.mrf.mxu1  ;;  %v5445_v16 = vld [vmem:[#allocation110_spill] sm:$0xff]  ;;  %v5446_v4 = vld [vmem:[#allocation17_spill] sm:$0xff] }
 0x1a7   :  { %v2543_v50 = vmax.f32 %v5426_v7, %v2479_v41  ;;  %v2675_v59 = vmax.f32 %v2611_v24, 0.0  ;;  %v2648_v38 = vmax.f32 %v2584_v25, 0.0  ;;  %v5427_v27 = vmax.f32 %v4061_v8, %v4301_v57  ;;  %v5449_v7 = vld [vmem:[#allocation18_spill] sm:$0xff] }
 0x1a8   :  { %v2680_v23 = vmax.f32 %v2616_v49, 0.0  ;;  %v2582_v39 = vadd.f32 %v4610_v3, %v2511_v37  ;;  %2707 = vst [vmem:[%s5125_s3 + $0x28] sm:$0xff] %v2643_v48  ;;  %v5430_v33 = vmax.f32 %v5428_v1, %v5429_v12  ;;  %v2448_v44 = vmax.f32 %v4521_v21, %v1771_v55  ;;  %v1784_v18 = vpop.f32.mrf.mxu0  ;;  %v2296_v20 = vpop.f32.mrf.mxu1  ;;  %v5447_v37 = vld [vmem:[#allocation70_spill] sm:$0xff]  ;;  %v5452_v55 = vld [vmem:[#allocation111_spill] sm:$0xff] }
 0x1a9   :  { %v2614_v51 = vadd.f32 %v4610_v3, %v2543_v50  ;;  %2739 = vst [vmem:[%s5125_s3 + $0x128] sm:$0xff] %v2675_v59  ;;  %v2514_v42 = vmax.f32 %v5427_v27, %v2450_v58  ;;  %v2480_v15 = vmax.f32 %v4523_v40, %v2283_v6  ;;  %2712 = vst [vmem:[%s5125_s3 + $0x50] sm:$0xff] %v2648_v38  ;;  %v5450_v50 = vld [vmem:[#allocation71_spill] sm:$0xff]  ;;  %v5453_v38 = vld [vmem:[#allocation112_spill] sm:$0xff] }
 0x1aa   :  { %v2546_v43 = vmax.f32 %v5430_v33, %v2482_v62  ;;  %2744 = vst [vmem:[%s5125_s3 + $0x150] sm:$0xff] %v2680_v23  ;;  %v2646_v57 = vmax.f32 %v2582_v39, 0.0  ;;  %v2453_v5 = vmax.f32 %v4525_v19, %v3273_v26  ;;  %v2485_v45 = vmax.f32 %v5431_v9, %v3401_v35  ;;  %v5438_v19 = vld [vmem:[#allocation15_spill] sm:$0xff]  ;;  %v3274_v11 = vpop.f32.mrf.mxu0  ;;  %v3402_v34 = vpop.f32.mrf.mxu1  ;;  %v5457_v26 = vld [vmem:[#allocation20_spill] sm:$0xff]  ;;  %v5458_v35 = vld [vmem:[#allocation73_spill] sm:$0xff] }
 0x1ab   :  { %v2678_v8 = vmax.f32 %v2614_v51, 0.0  ;;  %v2585_v21 = vadd.f32 %v4610_v3, %v2514_v42  ;;  %v5434_v63 = vmax.f32 %v5432_v60, %v5433_v13  ;;  %v5437_v36 = vmax.f32 %v5435_v22, %v5436_v54  ;;  %v5454_v33 = vld [vmem:[#allocation19_spill] sm:$0xff]  ;;  %v5463_v54 = vld [vmem:[#allocation116_spill] sm:$0xff] }
 0x1ac   :  { %v2617_v40 = vadd.f32 %v4610_v3, %v2546_v43  ;;  %2710 = vst [vmem:[%s5125_s3 + $0x40] sm:$0xff] %v2646_v57  ;;  %v5440_v32 = vmax.f32 %v5438_v19, %v5439_v30  ;;  %v5443_v47 = vmax.f32 %v5441_v31, %v5442_v0  ;;  %v2451_v14 = vmax.f32 %v5444_v46, %v1784_v18  ;;  %v1787_v39 = vpop.f32.mrf.mxu0  ;;  %v2299_v51 = vpop.f32.mrf.mxu1  ;;  %v5455_v43 = vld [vmem:[#allocation72_spill] sm:$0xff]  ;;  %v5465_v19 = vld [vmem:[#allocation74_spill] sm:$0xff]  ;;  %v5468_v31 = vld [vmem:[#allocation75_spill] sm:$0xff] }
 0x1ad   :  { %v2512_v10 = vmax.f32 %v5434_v63, %v2448_v44  ;;  %v2544_v17 = vmax.f32 %v5437_v36, %v2480_v15  ;;  %2742 = vst [vmem:[%s5125_s3 + $0x140] sm:$0xff] %v2678_v8  ;;  %v2483_v41 = vmax.f32 %v5445_v16, %v2296_v20  ;;  %v2649_v52 = vmax.f32 %v2585_v21, 0.0  ;;  %v5464_v20 = vld [vmem:[#allocation21_spill] sm:$0xff]  ;;  %v5471_v16 = vld [vmem:[#allocation76_spill] sm:$0xff] }
 0x1ae   :  { %v2517_v61 = vmax.f32 %v5440_v32, %v2453_v5  ;;  %v2549_v2 = vmax.f32 %v5443_v47, %v2485_v45  ;;  %v2681_v56 = vmax.f32 %v2617_v40, 0.0  ;;  %v5448_v28 = vmax.f32 %v5446_v4, %v5447_v37  ;;  %v5460_v5 = vld [vmem:[#allocation113_spill] sm:$0xff]  ;;  %v5461_v45 = vld [vmem:[#allocation114_spill] sm:$0xff]  ;;  %v3277_v40 = vpop.f32.mrf.mxu0  ;;  %v3405_v60 = vpop.f32.mrf.mxu1 }
 0x1af   :  { %v2583_v53 = vadd.f32 %v4610_v3, %v2512_v10  ;;  %v2615_v24 = vadd.f32 %v4610_v3, %v2544_v17  ;;  %v5451_v48 = vmax.f32 %v5449_v7, %v5450_v50  ;;  %2713 = vst [vmem:[%s5125_s3 + $0x58] sm:$0xff] %v2649_v52  ;;  %v2454_v6 = vmax.f32 %v5452_v55, %v3274_v11  ;;  %v5462_v10 = vld [vmem:[#allocation115_spill] sm:$0xff]  ;;  %v5479_v55 = vld [vmem:[#allocation78_spill] sm:$0xff] }
 0x1b0   :  { %v2588_v25 = vadd.f32 %v4610_v3, %v2517_v61  ;;  %v2620_v49 = vadd.f32 %v4610_v3, %v2549_v2  ;;  %v2515_v29 = vmax.f32 %v5448_v28, %v2451_v14  ;;  %2745 = vst [vmem:[%s5125_s3 + $0x158] sm:$0xff] %v2681_v56  ;;  %v2486_v23 = vmax.f32 %v5453_v38, %v3402_v34  ;;  %v5467_v61 = vld [vmem:[#allocation22_spill] sm:$0xff]  ;;  %v1800_v2 = vpop.f32.mrf.mxu0  ;;  %v2312_v46 = vpop.f32.mrf.mxu1  ;;  %v5470_v14 = vld [vmem:[#allocation23_spill] sm:$0xff]  ;;  %v5473_v56 = vld [vmem:[#allocation24_spill] sm:$0xff] }
 0x1b1   :  { %v2547_v59 = vmax.f32 %v5451_v48, %v2483_v41  ;;  %v2647_v58 = vmax.f32 %v2583_v53, 0.0  ;;  %v2679_v62 = vmax.f32 %v2615_v24, 0.0  ;;  %v5456_v44 = vmax.f32 %v5454_v33, %v5455_v43  ;;  %v5474_v53 = vld [vmem:[#allocation77_spill] sm:$0xff]  ;;  %v5485_v43 = vld [vmem:[#allocation120_spill] sm:$0xff] }
 0x1b2   :  { %v2652_v27 = vmax.f32 %v2588_v25, 0.0  ;;  %v2684_v42 = vmax.f32 %v2620_v49, 0.0  ;;  %v2586_v1 = vadd.f32 %v4610_v3, %v2515_v29  ;;  %v5459_v57 = vmax.f32 %v5457_v26, %v5458_v35  ;;  %v5476_v34 = vld [vmem:[#allocation117_spill] sm:$0xff]  ;;  %v5477_v49 = vld [vmem:[#allocation118_spill] sm:$0xff]  ;;  %v3278_v50 = vpop.f32.mrf.mxu0  ;;  %v3406_v48 = vpop.f32.mrf.mxu1 }
 0x1b3   :  { %v2618_v12 = vadd.f32 %v4610_v3, %v2547_v59  ;;  %2711 = vst [vmem:[%s5125_s3 + $0x48] sm:$0xff] %v2647_v58  ;;  %2743 = vst [vmem:[%s5125_s3 + $0x148] sm:$0xff] %v2679_v62  ;;  %v2518_v15 = vmax.f32 %v5456_v44, %v2454_v6  ;;  %v2452_v9 = vmax.f32 %v5460_v5, %v1787_v39  ;;  %v5478_v62 = vld [vmem:[#allocation25_spill] sm:$0xff]  ;;  %v5482_v39 = vld [vmem:[#allocation79_spill] sm:$0xff] }
 0x1b4   :  { %v2550_v8 = vmax.f32 %v5459_v57, %v2486_v23  ;;  %v2484_v21 = vmax.f32 %v5461_v45, %v2299_v51  ;;  %2716 = vst [vmem:[%s5125_s3 + $0x70] sm:$0xff] %v2652_v27  ;;  %2748 = vst [vmem:[%s5125_s3 + $0x170] sm:$0xff] %v2684_v42  ;;  %v2650_v13 = vmax.f32 %v2586_v1, 0.0  ;;  %v2457_v22 = vmax.f32 %v5462_v10, %v3277_v40  ;;  %v5481_v23 = vld [vmem:[#allocation26_spill] sm:$0xff]  ;;  %v2315_v26 = vpop.f32.mrf.mxu1  ;;  %v5487_v45 = vld [vmem:[#allocation80_spill] sm:$0xff] }
 0x1b5   :  { %v2682_v63 = vmax.f32 %v2618_v12, 0.0  ;;  %v2489_v36 = vmax.f32 %v5463_v54, %v3405_v60  ;;  %v2589_v17 = vadd.f32 %v4610_v3, %v2518_v15  ;;  %v5466_v30 = vmax.f32 %v5464_v20, %v5465_v19  ;;  %v5484_v12 = vld [vmem:[#allocation119_spill] sm:$0xff]  ;;  %v1803_v15 = vpop.f32.mrf.mxu0  ;;  %v5489_v60 = vld [vmem:[#allocation28_spill] sm:$0xff] }
 0x1b6   :  { %v2621_v18 = vadd.f32 %v4610_v3, %v2550_v8  ;;  %v5469_v0 = vmax.f32 %v5467_v61, %v5468_v31  ;;  %2714 = vst [vmem:[%s5125_s3 + $0x60] sm:$0xff] %v2650_v13  ;;  %v5472_v41 = vmax.f32 %v5470_v14, %v5471_v16  ;;  %v5475_v24 = vmax.f32 %v5473_v56, %v5474_v53  ;;  %v5490_v13 = vld [vmem:[#allocation81_spill] sm:$0xff]  ;;  %v3409_v20 = vpop.f32.mrf.mxu1  ;;  %v5495_v31 = vld [vmem:[#allocation124_spill] sm:$0xff]  ;;  %v5497_v14 = vld [vmem:[#allocation82_spill] sm:$0xff] }
 0x1b7   :  { %v2516_v32 = vmax.f32 %v5466_v30, %v2452_v9  ;;  %2746 = vst [vmem:[%s5125_s3 + $0x160] sm:$0xff] %v2682_v63  ;;  %v2455_v25 = vmax.f32 %v5476_v34, %v1800_v2  ;;  %v2487_v4 = vmax.f32 %v5477_v49, %v2312_v46  ;;  %v2653_v37 = vmax.f32 %v2589_v17, 0.0  ;;  %v5486_v9 = vld [vmem:[#allocation27_spill] sm:$0xff]  ;;  %v5496_v46 = vld [vmem:[#allocation29_spill] sm:$0xff]  ;;  %v5503_v49 = vld [vmem:[#allocation84_spill] sm:$0xff] }
 0x1b8   :  { %v2548_v47 = vmax.f32 %v5469_v0, %v2484_v21  ;;  %v2521_v52 = vmax.f32 %v5472_v41, %v2457_v22  ;;  %v2553_v11 = vmax.f32 %v5475_v24, %v2489_v36  ;;  %v2685_v28 = vmax.f32 %v2621_v18, 0.0  ;;  %v5492_v22 = vld [vmem:[#allocation121_spill] sm:$0xff]  ;;  %v5493_v36 = vld [vmem:[#allocation122_spill] sm:$0xff]  ;;  %v3281_v18 = vpop.f32.mrf.mxu0  ;;  %v5500_v56 = vld [vmem:[#allocation83_spill] sm:$0xff]  ;;  %v2328_v34 = vpop.f32.mrf.mxu1 }
 0x1b9   :  { %v2587_v29 = vadd.f32 %v4610_v3, %v2516_v32  ;;  %v5480_v6 = vmax.f32 %v5478_v62, %v5479_v55  ;;  %v5483_v51 = vmax.f32 %v5481_v23, %v5482_v39  ;;  %2717 = vst [vmem:[%s5125_s3 + $0x78] sm:$0xff] %v2653_v37  ;;  %v2458_v33 = vmax.f32 %v5484_v12, %v3278_v50  ;;  %v5494_v32 = vld [vmem:[#allocation123_spill] sm:$0xff]  ;;  %v5511_v12 = vld [vmem:[#allocation86_spill] sm:$0xff] }
 0x1ba   :  { %v2619_v7 = vadd.f32 %v4610_v3, %v2548_v47  ;;  %v2592_v59 = vadd.f32 %v4610_v3, %v2521_v52  ;;  %v2624_v58 = vadd.f32 %v4610_v3, %v2553_v11  ;;  %2749 = vst [vmem:[%s5125_s3 + $0x178] sm:$0xff] %v2685_v28  ;;  %v2490_v44 = vmax.f32 %v5485_v43, %v3406_v48  ;;  %v5499_v52 = vld [vmem:[#allocation30_spill] sm:$0xff]  ;;  %v1816_v11 = vpop.f32.mrf.mxu0  ;;  %v5505_v28 = vld [vmem:[#allocation32_spill] sm:$0xff]  ;;  %v5508_v48 = vld [vmem:[#allocation125_spill] sm:$0xff] }
 0x1bb   :  { %v2519_v38 = vmax.f32 %v5480_v6, %v2455_v25  ;;  %v2551_v27 = vmax.f32 %v5483_v51, %v2487_v4  ;;  %v2651_v42 = vmax.f32 %v2587_v29, 0.0  ;;  %v5488_v21 = vmax.f32 %v5486_v9, %v5487_v45  ;;  %v5502_v25 = vld [vmem:[#allocation31_spill] sm:$0xff]  ;;  %v5506_v29 = vld [vmem:[#allocation85_spill] sm:$0xff]  ;;  %v3410_v51 = vpop.f32.mrf.mxu1  ;;  %v5517_v45 = vld [vmem:[#allocation128_spill] sm:$0xff] }
 0x1bc   :  { %v2683_v1 = vmax.f32 %v2619_v7, 0.0  ;;  %v2656_v35 = vmax.f32 %v2592_v59, 0.0  ;;  %v2688_v57 = vmax.f32 %v2624_v58, 0.0  ;;  %v5491_v63 = vmax.f32 %v5489_v60, %v5490_v13  ;;  %v5509_v58 = vld [vmem:[#allocation126_spill] sm:$0xff]  ;;  %v3282_v39 = vpop.f32.mrf.mxu0 }
 0x1bd   :  { %v2590_v8 = vadd.f32 %v4610_v3, %v2519_v38  ;;  %v2622_v5 = vadd.f32 %v4610_v3, %v2551_v27  ;;  %2715 = vst [vmem:[%s5125_s3 + $0x68] sm:$0xff] %v2651_v42  ;;  %v2522_v40 = vmax.f32 %v5488_v21, %v2458_v33  ;;  %v2456_v54 = vmax.f32 %v5492_v22, %v1803_v15  ;;  %v5514_v15 = vld [vmem:[#allocation87_spill] sm:$0xff]  ;;  %v2331_v60 = vpop.f32.mrf.mxu1 }
 0x1be   :  { %2747 = vst [vmem:[%s5125_s3 + $0x168] sm:$0xff] %v2683_v1  ;;  %v2554_v10 = vmax.f32 %v5491_v63, %v2490_v44  ;;  %v2488_v17 = vmax.f32 %v5493_v36, %v2315_v26  ;;  %2720 = vst [vmem:[%s5125_s3 + $0x90] sm:$0xff] %v2656_v35  ;;  %v2461_v61 = vmax.f32 %v5494_v32, %v3281_v18  ;;  %v5510_v1 = vld [vmem:[#allocation33_spill] sm:$0xff]  ;;  %v5513_v44 = vld [vmem:[#allocation34_spill] sm:$0xff] }
 0x1bf   :  { %2752 = vst [vmem:[%s5125_s3 + $0x190] sm:$0xff] %v2688_v57  ;;  %v2654_v19 = vmax.f32 %v2590_v8, 0.0  ;;  %v2686_v30 = vmax.f32 %v2622_v5, 0.0  ;;  %v2493_v0 = vmax.f32 %v5495_v31, %v3409_v20  ;;  %v2593_v47 = vadd.f32 %v4610_v3, %v2522_v40  ;;  %v5516_v5 = vld [vmem:[#allocation127_spill] sm:$0xff]  ;;  %v1819_v40 = vpop.f32.mrf.mxu0  ;;  %v5519_v36 = vld [vmem:[#allocation88_spill] sm:$0xff] }
 0x1c0   :  { %v2625_v2 = vadd.f32 %v4610_v3, %v2554_v10  ;;  %v5498_v16 = vmax.f32 %v5496_v46, %v5497_v14  ;;  %v5501_v53 = vmax.f32 %v5499_v52, %v5500_v56  ;;  %v5504_v4 = vmax.f32 %v5502_v25, %v5503_v49  ;;  %v5521_v20 = vld [vmem:[#allocation36_spill] sm:$0xff]  ;;  %v3413_v46 = vpop.f32.mrf.mxu1  ;;  %v5529_v25 = vld [vmem:[#allocation90_spill] sm:$0xff] }
 0x1c1   :  { %2718 = vst [vmem:[%s5125_s3 + $0x80] sm:$0xff] %v2654_v19  ;;  %2750 = vst [vmem:[%s5125_s3 + $0x180] sm:$0xff] %v2686_v30  ;;  %v5507_v7 = vmax.f32 %v5505_v28, %v5506_v29  ;;  %v2459_v59 = vmax.f32 %v5508_v48, %v1816_v11  ;;  %v2491_v62 = vmax.f32 %v5509_v58, %v2328_v34  ;;  %v2657_v55 = vmax.f32 %v2593_v47, 0.0  ;;  %v5522_v19 = vld [vmem:[#allocation89_spill] sm:$0xff]  ;;  %v5527_v56 = vld [vmem:[#allocation132_spill] sm:$0xff] }
 0x1c2   :  { %v2520_v41 = vmax.f32 %v5498_v16, %v2456_v54  ;;  %v2552_v24 = vmax.f32 %v5501_v53, %v2488_v17  ;;  %v2525_v37 = vmax.f32 %v5504_v4, %v2461_v61  ;;  %v2689_v6 = vmax.f32 %v2625_v2, 0.0  ;;  %v5518_v54 = vld [vmem:[#allocation35_spill] sm:$0xff]  ;;  %v5524_v61 = vld [vmem:[#allocation129_spill] sm:$0xff]  ;;  %v3285_v2 = vpop.f32.mrf.mxu0  ;;  %v2344_v48 = vpop.f32.mrf.mxu1  ;;  %v5535_v58 = vld [vmem:[#allocation92_spill] sm:$0xff] }
 0x1c3   :  { %v2557_v50 = vmax.f32 %v5507_v7, %v2493_v0  ;;  %v5512_v33 = vmax.f32 %v5510_v1, %v5511_v12  ;;  %v5515_v26 = vmax.f32 %v5513_v44, %v5514_v15  ;;  %2721 = vst [vmem:[%s5125_s3 + $0x98] sm:$0xff] %v2657_v55  ;;  %v2462_v9 = vmax.f32 %v5516_v5, %v3282_v39  ;;  %v5525_v0 = vld [vmem:[#allocation130_spill] sm:$0xff]  ;;  %v5528_v34 = vld [vmem:[#allocation37_spill] sm:$0xff]  ;;  %v5532_v28 = vld [vmem:[#allocation91_spill] sm:$0xff] }
 0x1c4   :  { %v2591_v38 = vadd.f32 %v4610_v3, %v2520_v41  ;;  %v2623_v23 = vadd.f32 %v4610_v3, %v2552_v24  ;;  %v2596_v27 = vadd.f32 %v4610_v3, %v2525_v37  ;;  %2753 = vst [vmem:[%s5125_s3 + $0x198] sm:$0xff] %v2689_v6  ;;  %v2494_v21 = vmax.f32 %v5517_v45, %v3410_v51  ;;  %v5526_v41 = vld [vmem:[#allocation131_spill] sm:$0xff]  ;;  %v5531_v37 = vld [vmem:[#allocation38_spill] sm:$0xff]  ;;  %v5537_v6 = vld [vmem:[#allocation40_spill] sm:$0xff] }
 0x1c5   :  { %v2628_v42 = vadd.f32 %v4610_v3, %v2557_v50  ;;  %v2523_v43 = vmax.f32 %v5512_v33, %v2459_v59  ;;  %v2555_v35 = vmax.f32 %v5515_v26, %v2491_v62  ;;  %v5520_v17 = vmax.f32 %v5518_v54, %v5519_v36  ;;  %v1832_v50 = vpop.f32.mrf.mxu0  ;;  %v5534_v59 = vld [vmem:[#allocation39_spill] sm:$0xff]  ;;  %v5540_v51 = vld [vmem:[#allocation133_spill] sm:$0xff]  ;;  %v3414_v26 = vpop.f32.mrf.mxu1  ;;  %v5543_v5 = vld [vmem:[#allocation94_spill] sm:$0xff] }
 0x1c6   :  { %v2655_v57 = vmax.f32 %v2591_v38, 0.0  ;;  %v2687_v8 = vmax.f32 %v2623_v23, 0.0  ;;  %v2660_v13 = vmax.f32 %v2596_v27, 0.0  ;;  %v5523_v30 = vmax.f32 %v5521_v20, %v5522_v19  ;;  %v5538_v38 = vld [vmem:[#allocation93_spill] sm:$0xff]  ;;  %v5549_v36 = vld [vmem:[#allocation136_spill] sm:$0xff] }
 0x1c7   :  { %v2692_v63 = vmax.f32 %v2628_v42, 0.0  ;;  %v2594_v10 = vadd.f32 %v4610_v3, %v2523_v43  ;;  %v2626_v22 = vadd.f32 %v4610_v3, %v2555_v35  ;;  %v2526_v18 = vmax.f32 %v5520_v17, %v2462_v9  ;;  %v5541_v42 = vld [vmem:[#allocation134_spill] sm:$0xff]  ;;  %v3286_v15 = vpop.f32.mrf.mxu0  ;;  %v2347_v20 = vpop.f32.mrf.mxu1 }
 0x1c8   :  { %2719 = vst [vmem:[%s5125_s3 + $0x88] sm:$0xff] %v2655_v57  ;;  %2751 = vst [vmem:[%s5125_s3 + $0x188] sm:$0xff] %v2687_v8  ;;  %v2558_v32 = vmax.f32 %v5523_v30, %v2494_v21  ;;  %v2460_v31 = vmax.f32 %v5524_v61, %v1819_v40  ;;  %v2492_v47 = vmax.f32 %v5525_v0, %v2331_v60  ;;  %v5542_v8 = vld [vmem:[#allocation41_spill] sm:$0xff]  ;;  %v5545_v21 = vld [vmem:[#allocation42_spill] sm:$0xff] }
 0x1c9   :  { %2724 = vst [vmem:[%s5125_s3 + $0xb0] sm:$0xff] %v2660_v13  ;;  %2756 = vst [vmem:[%s5125_s3 + $0x1b0] sm:$0xff] %v2692_v63  ;;  %v2658_v14 = vmax.f32 %v2594_v10, 0.0  ;;  %v2690_v16 = vmax.f32 %v2626_v22, 0.0  ;;  %v2465_v52 = vmax.f32 %v5526_v41, %v3285_v2  ;;  %v2497_v53 = vmax.f32 %v5527_v56, %v3413_v46  ;;  %v5546_v40 = vld [vmem:[#allocation95_spill] sm:$0xff]  ;;  %v5551_v0 = vld [vmem:[#allocation96_spill] sm:$0xff] }
 0x1ca   :  { %v2597_v24 = vadd.f32 %v4610_v3, %v2526_v18  ;;  %v2629_v11 = vadd.f32 %v4610_v3, %v2558_v32  ;;  %v5530_v49 = vmax.f32 %v5528_v34, %v5529_v25  ;;  %v5533_v29 = vmax.f32 %v5531_v37, %v5532_v28  ;;  %v5548_v22 = vld [vmem:[#allocation135_spill] sm:$0xff]  ;;  %v1835_v18 = vpop.f32.mrf.mxu0  ;;  %v5553_v46 = vld [vmem:[#allocation44_spill] sm:$0xff]  ;;  %v3417_v34 = vpop.f32.mrf.mxu1 }
 0x1cb   :  { %2722 = vst [vmem:[%s5125_s3 + $0xa0] sm:$0xff] %v2658_v14  ;;  %2754 = vst [vmem:[%s5125_s3 + $0x1a0] sm:$0xff] %v2690_v16  ;;  %v5536_v62 = vmax.f32 %v5534_v59, %v5535_v58  ;;  %v5539_v23 = vmax.f32 %v5537_v6, %v5538_v38  ;;  %v2463_v27 = vmax.f32 %v5540_v51, %v1832_v50  ;;  %v5554_v14 = vld [vmem:[#allocation97_spill] sm:$0xff]  ;;  %v5559_v28 = vld [vmem:[#allocation140_spill] sm:$0xff] }
 0x1cc   :  { %v2524_v4 = vmax.f32 %v5530_v49, %v2460_v31  ;;  %v2556_v7 = vmax.f32 %v5533_v29, %v2492_v47  ;;  %v2495_v1 = vmax.f32 %v5541_v42, %v2344_v48  ;;  %v2661_v12 = vmax.f32 %v2597_v24, 0.0  ;;  %v5550_v31 = vld [vmem:[#allocation43_spill] sm:$0xff]  ;;  %v5560_v48 = vld [vmem:[#allocation45_spill] sm:$0xff]  ;;  %v5561_v59 = vld [vmem:[#allocation98_spill] sm:$0xff]  ;;  %v2360_v51 = vpop.f32.mrf.mxu1 }
 0x1cd   :  { %v2529_v55 = vmax.f32 %v5536_v62, %v2465_v52  ;;  %v2561_v39 = vmax.f32 %v5539_v23, %v2497_v53  ;;  %v2693_v33 = vmax.f32 %v2629_v11, 0.0  ;;  %v5544_v9 = vmax.f32 %v5542_v8, %v5543_v5  ;;  %v5556_v52 = vld [vmem:[#allocation137_spill] sm:$0xff]  ;;  %v5557_v53 = vld [vmem:[#allocation138_spill] sm:$0xff]  ;;  %v3289_v11 = vpop.f32.mrf.mxu0  ;;  %v5564_v6 = vld [vmem:[#allocation99_spill] sm:$0xff] }
 0x1ce   :  { %v2595_v43 = vadd.f32 %v4610_v3, %v2524_v4  ;;  %v2627_v44 = vadd.f32 %v4610_v3, %v2556_v7  ;;  %v5547_v60 = vmax.f32 %v5545_v21, %v5546_v40  ;;  %2725 = vst [vmem:[%s5125_s3 + $0xb8] sm:$0xff] %v2661_v12  ;;  %v2466_v54 = vmax.f32 %v5548_v22, %v3286_v15  ;;  %v5558_v4 = vld [vmem:[#allocation139_spill] sm:$0xff]  ;;  %v5567_v42 = vld [vmem:[#allocation100_spill] sm:$0xff]  ;;  %v5575_v22 = vld [vmem:[#allocation102_spill] sm:$0xff] }
 0x1cf   :  { %v2600_v35 = vadd.f32 %v4610_v3, %v2529_v55  ;;  %v2632_v57 = vadd.f32 %v4610_v3, %v2561_v39  ;;  %v2527_v45 = vmax.f32 %v5544_v9, %v2463_v27  ;;  %2757 = vst [vmem:[%s5125_s3 + $0x1b8] sm:$0xff] %v2693_v33  ;;  %v2498_v17 = vmax.f32 %v5549_v36, %v3414_v26  ;;  %v5563_v55 = vld [vmem:[#allocation46_spill] sm:$0xff]  ;;  %v1848_v39 = vpop.f32.mrf.mxu0  ;;  %v5566_v27 = vld [vmem:[#allocation47_spill] sm:$0xff]  ;;  %v5569_v33 = vld [vmem:[#allocation48_spill] sm:$0xff] }
 0x1d0   :  { %v2559_v13 = vmax.f32 %v5547_v60, %v2495_v1  ;;  %v2659_v63 = vmax.f32 %v2595_v43, 0.0  ;;  %v2691_v10 = vmax.f32 %v2627_v44, 0.0  ;;  %v5552_v47 = vmax.f32 %v5550_v31, %v5551_v0  ;;  %v5570_v43 = vld [vmem:[#allocation101_spill] sm:$0xff]  ;;  %v3418_v60 = vpop.f32.mrf.mxu1  ;;  %v5581_v0 = vld [vmem:[#allocation144_spill] sm:$0xff] }
 0x1d1   :  { %v2664_v19 = vmax.f32 %v2600_v35, 0.0  ;;  %v2696_v30 = vmax.f32 %v2632_v57, 0.0  ;;  %v2598_v32 = vadd.f32 %v4610_v3, %v2527_v45  ;;  %v5555_v16 = vmax.f32 %v5553_v46, %v5554_v14  ;;  %v5572_v26 = vld [vmem:[#allocation141_spill] sm:$0xff]  ;;  %v5573_v57 = vld [vmem:[#allocation142_spill] sm:$0xff]  ;;  %v3290_v40 = vpop.f32.mrf.mxu0 }
 0x1d2   :  { %v2630_v61 = vadd.f32 %v4610_v3, %v2559_v13  ;;  %2723 = vst [vmem:[%s5125_s3 + $0xa8] sm:$0xff] %v2659_v63  ;;  %2755 = vst [vmem:[%s5125_s3 + $0x1a8] sm:$0xff] %v2691_v10  ;;  %v2530_v2 = vmax.f32 %v5552_v47, %v2466_v54  ;;  %v2464_v56 = vmax.f32 %v5556_v52, %v1835_v18  ;;  %v5574_v10 = vld [vmem:[#allocation49_spill] sm:$0xff]  ;;  %v5578_v18 = vld [vmem:[#allocation103_spill] sm:$0xff]  ;;  %v2363_v46 = vpop.f32.mrf.mxu1 }
 0x1d3   :  { %v2562_v41 = vmax.f32 %v5555_v16, %v2498_v17  ;;  %v2496_v24 = vmax.f32 %v5557_v53, %v2347_v20  ;;  %2728 = vst [vmem:[%s5125_s3 + $0xd0] sm:$0xff] %v2664_v19  ;;  %2760 = vst [vmem:[%s5125_s3 + $0x1d0] sm:$0xff] %v2696_v30  ;;  %v2662_v25 = vmax.f32 %v2598_v32, 0.0  ;;  %v2469_v37 = vmax.f32 %v5558_v4, %v3289_v11  ;;  %v5577_v17 = vld [vmem:[#allocation50_spill] sm:$0xff]  ;;  %v5583_v53 = vld [vmem:[#allocation104_spill] sm:$0xff] }
 0x1d4   :  { %v2694_v49 = vmax.f32 %v2630_v61, 0.0  ;;  %v2501_v29 = vmax.f32 %v5559_v28, %v3417_v34  ;;  %v2601_v7 = vadd.f32 %v4610_v3, %v2530_v2  ;;  %v5562_v58 = vmax.f32 %v5560_v48, %v5561_v59  ;;  %v5580_v61 = vld [vmem:[#allocation143_spill] sm:$0xff]  ;;  %v1851_v2 = vpop.f32.mrf.mxu0  ;;  %v5585_v34 = vld [vmem:[#allocation52_spill] sm:$0xff] }
 0x1d5   :  { %v2633_v50 = vadd.f32 %v4610_v3, %v2562_v41  ;;  %v5565_v38 = vmax.f32 %v5563_v55, %v5564_v6  ;;  %2726 = vst [vmem:[%s5125_s3 + $0xc0] sm:$0xff] %v2662_v25  ;;  %v5568_v1 = vmax.f32 %v5566_v27, %v5567_v42  ;;  %v5571_v44 = vmax.f32 %v5569_v33, %v5570_v43  ;;  %v5586_v25 = vld [vmem:[#allocation105_spill] sm:$0xff]  ;;  %v5591_v55 = vld [vmem:[#allocation106_spill] sm:$0xff] }
 0x1d6   :  { %v2528_v62 = vmax.f32 %v5562_v58, %v2464_v56  ;;  %2758 = vst [vmem:[%s5125_s3 + $0x1c0] sm:$0xff] %v2694_v49  ;;  %v2467_v35 = vmax.f32 %v5572_v26, %v1848_v39  ;;  %v2499_v8 = vmax.f32 %v5573_v57, %v2360_v51  ;;  %v2665_v5 = vmax.f32 %v2601_v7, 0.0  ;;  %v5582_v56 = vld [vmem:[#allocation51_spill] sm:$0xff] }
 0x1d7   :  { %v2560_v23 = vmax.f32 %v5565_v38, %v2496_v24  ;;  %v2533_v12 = vmax.f32 %v5568_v1, %v2469_v37  ;;  %v2565_v15 = vmax.f32 %v5571_v44, %v2501_v29  ;;  %v2697_v9 = vmax.f32 %v2633_v50, 0.0  ;;  %v5588_v37 = vld [vmem:[#allocation145_spill] sm:$0xff]  ;;  %v5589_v29 = vld [vmem:[#allocation146_spill] sm:$0xff]  ;;  %v5594_v39 = vld [vmem:[#allocation107_spill] sm:$0xff] }
 0x1d8   :  { %v2599_v45 = vadd.f32 %v4610_v3, %v2528_v62  ;;  %v5576_v54 = vmax.f32 %v5574_v10, %v5575_v22  ;;  %v5579_v20 = vmax.f32 %v5577_v17, %v5578_v18  ;;  %2729 = vst [vmem:[%s5125_s3 + $0xd8] sm:$0xff] %v2665_v5  ;;  %v2470_v31 = vmax.f32 %v5580_v61, %v3290_v40  ;;  %v5590_v62 = vld [vmem:[#allocation53_spill] sm:$0xff] }
 0x1d9   :  { %v2631_v21 = vadd.f32 %v4610_v3, %v2560_v23  ;;  %v2604_v13 = vadd.f32 %v4610_v3, %v2533_v12  ;;  %v2636_v63 = vadd.f32 %v4610_v3, %v2565_v15  ;;  %2761 = vst [vmem:[%s5125_s3 + $0x1d8] sm:$0xff] %v2697_v9  ;;  %v2502_v47 = vmax.f32 %v5581_v0, %v3418_v60  ;;  %v5593_v23 = vld [vmem:[#allocation54_spill] sm:$0xff] }
 0x1da   :  { %v2531_v36 = vmax.f32 %v5576_v54, %v2467_v35  ;;  %v2563_v19 = vmax.f32 %v5579_v20, %v2499_v8  ;;  %v2663_v30 = vmax.f32 %v2599_v45, 0.0  ;;  %v5584_v24 = vmax.f32 %v5582_v56, %v5583_v53 }
 0x1db   :  { %v2695_v32 = vmax.f32 %v2631_v21, 0.0  ;;  %v2668_v14 = vmax.f32 %v2604_v13, 0.0  ;;  %v2700_v16 = vmax.f32 %v2636_v63, 0.0  ;;  %v5587_v49 = vmax.f32 %v5585_v34, %v5586_v25 }
 0x1dc   :  { %v2602_v41 = vadd.f32 %v4610_v3, %v2531_v36  ;;  %v2634_v52 = vadd.f32 %v4610_v3, %v2563_v19  ;;  %2727 = vst [vmem:[%s5125_s3 + $0xc8] sm:$0xff] %v2663_v30  ;;  %v2534_v11 = vmax.f32 %v5584_v24, %v2470_v31  ;;  %v2468_v28 = vmax.f32 %v5588_v37, %v1851_v2 }
 0x1dd   :  { %2759 = vst [vmem:[%s5125_s3 + $0x1c8] sm:$0xff] %v2695_v32  ;;  %v2566_v4 = vmax.f32 %v5587_v49, %v2502_v47  ;;  %v2500_v7 = vmax.f32 %v5589_v29, %v2363_v46  ;;  %2732 = vst [vmem:[%s5125_s3 + $0xf0] sm:$0xff] %v2668_v14  ;;  %v5592_v6 = vmax.f32 %v5590_v62, %v5591_v55 }
 0x1de   :  { %2764 = vst [vmem:[%s5125_s3 + $0x1f0] sm:$0xff] %v2700_v16  ;;  %v2666_v50 = vmax.f32 %v2602_v41, 0.0  ;;  %v2698_v48 = vmax.f32 %v2634_v52, 0.0  ;;  %v2605_v59 = vadd.f32 %v4610_v3, %v2534_v11  ;;  %v5595_v51 = vmax.f32 %v5593_v23, %v5594_v39 }
 0x1df   :  { %v2637_v58 = vadd.f32 %v4610_v3, %v2566_v4  ;;  %v2532_v38 = vmax.f32 %v5592_v6, %v2468_v28 }
 0x1e0   :  { %v2564_v27 = vmax.f32 %v5595_v51, %v2500_v7  ;;  %2730 = vst [vmem:[%s5125_s3 + $0xe0] sm:$0xff] %v2666_v50  ;;  %2762 = vst [vmem:[%s5125_s3 + $0x1e0] sm:$0xff] %v2698_v48  ;;  %v2669_v42 = vmax.f32 %v2605_v59, 0.0 }
 0x1e1   :  { %v2701_v1 = vmax.f32 %v2637_v58, 0.0  ;;  %v2603_v12 = vadd.f32 %v4610_v3, %v2532_v38 }
 0x1e2   :  { %v2635_v33 = vadd.f32 %v4610_v3, %v2564_v27  ;;  %2733 = vst [vmem:[%s5125_s3 + $0xf8] sm:$0xff] %v2669_v42 }
 0x1e3   :  { %2765 = vst [vmem:[%s5125_s3 + $0x1f8] sm:$0xff] %v2701_v1  ;;  %v2667_v43 = vmax.f32 %v2603_v12, 0.0 }
 0x1e4   :  { %v2699_v44 = vmax.f32 %v2635_v33, 0.0 }
 0x1e5   :  { %2731 = vst [vmem:[%s5125_s3 + $0xe8] sm:$0xff] %v2667_v43 }
 0x1e6   :  { %2763 = vst [vmem:[%s5125_s3 + $0x1e8] sm:$0xff] %v2699_v44 }

// kernel: cnn_forward.5
= control target key start
LH: loop header
LB: loop body
LE: loop exit
PB: predicated region body
PF: predicated region fallthrough
CT: control target
= control target key end

     0   :  { %v1162_v0 = vmov 0   ;;  %vm439_vm0 = vcmask 130048   ;;  %s1677_s1 = inlined_call_operand.vmem [shape: bf16[144,128], index: 1, kind: input, shape index: {}]   ;;  %s1678_s0 = inlined_call_operand.vmem [shape: bf16[2,4,64,144], index: 0, kind: input, shape index: {}]   ;;  %s1679_s2 = inlined_call_operand.vmem [shape: f32[1,128], index: 2, kind: input, shape index: {}]   ;;  %s1680_s3 = inlined_call_operand.vmem [shape: f32[2,64,128], index: 3, kind: output, shape index: {}]  }
   0x1   :  { %536 = vmatprep.subr.bf16.mxu0 %v1162_v0  ;;  %1038 = vmatprep.subr.bf16.mxu1 %v1162_v0  ;;  %v1057_v1 = vld [vmem:[%s1677_s1 + $0x38] sm:$0xff]   ;;  %v1058_v2 = vld [vmem:[%s1677_s1 + $0x30] sm:$0xff]   ;;  %v1059_v3 = vld [vmem:[%s1677_s1 + $0x28] sm:$0xff]  }
   0x2   :  { %537 = vmatpush1.bf16.msra.mxu0 %v1057_v1  ;;  %1047 = vmatpush1.bf16.msra.mxu1 %v1057_v1  ;;  %v1060_v4 = vld [vmem:[%s1677_s1 + $0x20] sm:$0xff]   ;;  %v1061_v7 = vld [vmem:[%s1677_s1 + $0x18] sm:$0xff]   ;;  %v1062_v8 = vld [vmem:[%s1677_s1 + $0x10] sm:$0xff]  }
   0x3   :  { %538 = vmatprep.subr.bf16.mxu0 %v1162_v0  ;;  %1039 = vmatprep.subr.bf16.mxu1 %v1162_v0  ;;  %v1068_v5 = vld [vmem:[%s1678_s0 + $0x4] ss:$8 sps:$4 sm:$0xff]   ;;  %v1066_v12 = vld [vmem:[%s1678_s0] ss:$8 sps:$4 sm:$0xff]   ;;  %v1072_v14 = vld [vmem:[%s1678_s0 + $0x14] ss:$8 sps:$4 sm:$0xff]  }
   0x4   :  { %v1071_v6 = vld [vmem:[%s1678_s0 + $0x104] ss:$8 sps:$4 sm:$0xff]   ;;  %1005 = vmatprep.mubr.msk.bf16.mxu0 %vm439_vm0, %v1068_v5  ;;  %v1069_v13 = vld [vmem:[%s1678_s0 + $0x100] ss:$8 sps:$4 sm:$0xff]   ;;  %v1074_v15 = vld [vmem:[%s1678_s0 + $0x114] ss:$8 sps:$4 sm:$0xff]  }
   0x5   :  { %1021 = vmatprep.mubr.msk.bf16.mxu1 %vm439_vm0, %v1071_v6  ;;  %v1063_v9 = vld [vmem:[%s1677_s1 + $0x8] sm:$0xff]   ;;  %v1064_v10 = vld [vmem:[%s1677_s1] sm:$0xff]   ;;  %v1076_v16 = vld [vmem:[%s1678_s0 + $0x10] ss:$8 sps:$4 sm:$0xff]  }
   0x6   :  { %539 = vmatpush1.bf16.msra.mxu0 %v1058_v2  ;;  %1048 = vmatpush1.bf16.msra.mxu1 %v1058_v2  ;;  %v1065_v11 = vld [vmem:[%s1677_s1 + $0x40] sm:$0xff]   ;;  %v1077_v17 = vld [vmem:[%s1678_s0 + $0x110] ss:$8 sps:$4 sm:$0xff]   ;;  %v1084_v22 = vld [vmem:[%s1678_s0 + $0x34] ss:$8 sps:$4 sm:$0xff]  }
   0x7   :  { %540 = vmatprep.subr.bf16.mxu0 %v1162_v0  ;;  %1040 = vmatprep.subr.bf16.mxu1 %v1162_v0  ;;  %v1078_v18 = vld [vmem:[%s1678_s0 + $0x24] ss:$8 sps:$4 sm:$0xff]   ;;  %v1082_v20 = vld [vmem:[%s1678_s0 + $0x20] ss:$8 sps:$4 sm:$0xff]   ;;  %v1086_v23 = vld [vmem:[%s1678_s0 + $0x134] ss:$8 sps:$4 sm:$0xff]  }
   0x8   :  { %v1080_v19 = vld [vmem:[%s1678_s0 + $0x124] ss:$8 sps:$4 sm:$0xff]   ;;  %v1083_v21 = vld [vmem:[%s1678_s0 + $0x120] ss:$8 sps:$4 sm:$0xff]   ;;  %v1088_v24 = vld [vmem:[%s1678_s0 + $0x30] ss:$8 sps:$4 sm:$0xff]  }
   0x9   :  { %v1089_v25 = vld [vmem:[%s1678_s0 + $0x130] ss:$8 sps:$4 sm:$0xff]   ;;  %v1090_v26 = vld [vmem:[%s1678_s0 + $0x44] ss:$8 sps:$4 sm:$0xff]   ;;  %v1094_v28 = vld [vmem:[%s1678_s0 + $0x40] ss:$8 sps:$4 sm:$0xff]  }
   0xa   :  { %541 = vmatpush1.bf16.msra.mxu0 %v1059_v3  ;;  %1049 = vmatpush1.bf16.msra.mxu1 %v1059_v3  ;;  %v1092_v27 = vld [vmem:[%s1678_s0 + $0x144] ss:$8 sps:$4 sm:$0xff]   ;;  %v1095_v29 = vld [vmem:[%s1678_s0 + $0x140] ss:$8 sps:$4 sm:$0xff]   ;;  %v1096_v30 = vld [vmem:[%s1678_s0 + $0x54] ss:$8 sps:$4 sm:$0xff]  }
   0xb   :  { %542 = vmatprep.subr.bf16.mxu0 %v1162_v0  ;;  %1041 = vmatprep.subr.bf16.mxu1 %v1162_v0  ;;  %v1098_v31 = vld [vmem:[%s1678_s0 + $0x154] ss:$8 sps:$4 sm:$0xff]   ;;  %v1100_v32 = vld [vmem:[%s1678_s0 + $0x50] ss:$8 sps:$4 sm:$0xff]   ;;  %v1102_v34 = vld [vmem:[%s1678_s0 + $0x64] ss:$8 sps:$4 sm:$0xff]  }
   0xc   :  { %v1101_v33 = vld [vmem:[%s1678_s0 + $0x150] ss:$8 sps:$4 sm:$0xff]   ;;  %v1104_v35 = vld [vmem:[%s1678_s0 + $0x164] ss:$8 sps:$4 sm:$0xff]   ;;  %v1106_v36 = vld [vmem:[%s1678_s0 + $0x60] ss:$8 sps:$4 sm:$0xff]  }
   0xd   :  { %v1107_v37 = vld [vmem:[%s1678_s0 + $0x160] ss:$8 sps:$4 sm:$0xff]   ;;  %v1108_v38 = vld [vmem:[%s1678_s0 + $0x74] ss:$8 sps:$4 sm:$0xff]   ;;  %v1112_v40 = vld [vmem:[%s1678_s0 + $0x70] ss:$8 sps:$4 sm:$0xff]  }
   0xe   :  { %543 = vmatpush1.bf16.msra.mxu0 %v1060_v4  ;;  %1050 = vmatpush1.bf16.msra.mxu1 %v1060_v4  ;;  %v1110_v39 = vld [vmem:[%s1678_s0 + $0x174] ss:$8 sps:$4 sm:$0xff]   ;;  %v1113_v41 = vld [vmem:[%s1678_s0 + $0x170] ss:$8 sps:$4 sm:$0xff]   ;;  %v1114_v42 = vld [vmem:[%s1678_s0 + $0x84] ss:$8 sps:$4 sm:$0xff]  }
   0xf   :  { %544 = vmatprep.subr.bf16.mxu0 %v1162_v0  ;;  %1042 = vmatprep.subr.bf16.mxu1 %v1162_v0  ;;  %v1116_v43 = vld [vmem:[%s1678_s0 + $0x184] ss:$8 sps:$4 sm:$0xff]   ;;  %v1118_v44 = vld [vmem:[%s1678_s0 + $0x80] ss:$8 sps:$4 sm:$0xff]   ;;  %v1120_v46 = vld [vmem:[%s1678_s0 + $0x94] ss:$8 sps:$4 sm:$0xff]  }
  0x10   :  { %v1119_v45 = vld [vmem:[%s1678_s0 + $0x180] ss:$8 sps:$4 sm:$0xff]   ;;  %v1122_v47 = vld [vmem:[%s1678_s0 + $0x194] ss:$8 sps:$4 sm:$0xff]   ;;  %v1124_v48 = vld [vmem:[%s1678_s0 + $0x90] ss:$8 sps:$4 sm:$0xff]  }
  0x11   :  { %v1125_v49 = vld [vmem:[%s1678_s0 + $0x190] ss:$8 sps:$4 sm:$0xff]   ;;  %v1126_v50 = vld [vmem:[%s1678_s0 + $0xa4] ss:$8 sps:$4 sm:$0xff]   ;;  %v1130_v52 = vld [vmem:[%s1678_s0 + $0xa0] ss:$8 sps:$4 sm:$0xff]  }
  0x12   :  { %545 = vmatpush1.bf16.msra.mxu0 %v1061_v7  ;;  %1051 = vmatpush1.bf16.msra.mxu1 %v1061_v7  ;;  %v1128_v51 = vld [vmem:[%s1678_s0 + $0x1a4] ss:$8 sps:$4 sm:$0xff]   ;;  %v1131_v53 = vld [vmem:[%s1678_s0 + $0x1a0] ss:$8 sps:$4 sm:$0xff]   ;;  %v1132_v54 = vld [vmem:[%s1678_s0 + $0xb4] ss:$8 sps:$4 sm:$0xff]  }
  0x13   :  { %546 = vmatprep.subr.bf16.mxu0 %v1162_v0  ;;  %1043 = vmatprep.subr.bf16.mxu1 %v1162_v0  ;;  %v1134_v55 = vld [vmem:[%s1678_s0 + $0x1b4] ss:$8 sps:$4 sm:$0xff]   ;;  %v1136_v56 = vld [vmem:[%s1678_s0 + $0xb0] ss:$8 sps:$4 sm:$0xff]   ;;  %v1138_v58 = vld [vmem:[%s1678_s0 + $0xc4] ss:$8 sps:$4 sm:$0xff]  }
  0x14   :  { %v1137_v57 = vld [vmem:[%s1678_s0 + $0x1b0] ss:$8 sps:$4 sm:$0xff]   ;;  %v1140_v59 = vld [vmem:[%s1678_s0 + $0x1c4] ss:$8 sps:$4 sm:$0xff]   ;;  %v1142_v60 = vld [vmem:[%s1678_s0 + $0xc0] ss:$8 sps:$4 sm:$0xff]  }
  0x15   :  { %v1143_v61 = vld [vmem:[%s1678_s0 + $0x1c0] ss:$8 sps:$4 sm:$0xff]   ;;  %v1144_v62 = vld [vmem:[%s1678_s0 + $0xd4] ss:$8 sps:$4 sm:$0xff]   ;;  %v1149_v1 = vld [vmem:[%s1678_s0 + $0x1d0] ss:$8 sps:$4 sm:$0xff]  }
  0x16   :  { %547 = vmatpush1.bf16.msra.mxu0 %v1062_v8  ;;  %1052 = vmatpush1.bf16.msra.mxu1 %v1062_v8  ;;  %v1146_v63 = vld [vmem:[%s1678_s0 + $0x1d4] ss:$8 sps:$4 sm:$0xff]   ;;  %v1150_v2 = vld [vmem:[%s1678_s0 + $0xe4] ss:$8 sps:$4 sm:$0xff]   ;;  %v1154_v4 = vld [vmem:[%s1678_s0 + $0xe0] ss:$8 sps:$4 sm:$0xff]  }
  0x17   :  { %548 = vmatprep.subr.bf16.mxu0 %v1162_v0  ;;  %1044 = vmatprep.subr.bf16.mxu1 %v1162_v0  ;;  %v1152_v3 = vld [vmem:[%s1678_s0 + $0x1e4] ss:$8 sps:$4 sm:$0xff]   ;;  %v1155_v5 = vld [vmem:[%s1678_s0 + $0x1e0] ss:$8 sps:$4 sm:$0xff]   ;;  %v1156_v6 = vld [vmem:[%s1678_s0 + $0xf4] ss:$8 sps:$4 sm:$0xff]  }
  0x18   :  { %v1158_v7 = vld [vmem:[%s1678_s0 + $0x1f4] ss:$8 sps:$4 sm:$0xff]   ;;  %v1160_v8 = vld [vmem:[%s1678_s0 + $0xf0] ss:$8 sps:$4 sm:$0xff]  }
  0x1a   :  { %549 = vmatpush1.bf16.msra.mxu0 %v1063_v9  ;;  %1053 = vmatpush1.bf16.msra.mxu1 %v1063_v9  ;;  %v1161_v9 = vld [vmem:[%s1678_s0 + $0x1f0] ss:$8 sps:$4 sm:$0xff]  }
  0x1b   :  { %550 = vmatprep.subr.bf16.mxu0 %v1162_v0  ;;  %1045 = vmatprep.subr.bf16.mxu1 %v1162_v0 }
  0x1e   :  { %551 = vmatpush1.bf16.msra.mxu0 %v1064_v10  ;;  %1054 = vmatpush1.bf16.msra.mxu1 %v1064_v10 }
  0x1f   :  { %566 = vmatprep.subr.bf16.mxu0 %v1162_v0  ;;  %1046 = vmatprep.subr.bf16.mxu1 %v1162_v0  ;;  %v1148_v0 = vld [vmem:[%s1678_s0 + $0xd0] ss:$8 sps:$4 sm:$0xff]  }
  0x22   :  { %567 = vmatpush2.bf16.msra.mxu0 %v1065_v11  ;;  %1055 = vmatpush2.bf16.msra.mxu1 %v1065_v11 }
  0x25   :  { %569 = vmatmul.mubr.bf16.vlgmr.msra.gmra.mxu0 %v1066_v12  ;;  %697 = vmatmul.mubr.bf16.vlgmr.msra.gmra.mxu1 %v1069_v13 }
  0x26   :  { %1006 = vmatprep.mubr.msk.bf16.mxu0 %vm439_vm0, %v1072_v14  ;;  %1022 = vmatprep.mubr.msk.bf16.mxu1 %vm439_vm0, %v1074_v15 }
  0x2d   :  { %577 = vmatmul.mubr.bf16.gmra.mxu0 %v1076_v16  ;;  %705 = vmatmul.mubr.bf16.gmra.mxu1 %v1077_v17 }
  0x2e   :  { %1007 = vmatprep.mubr.msk.bf16.mxu0 %vm439_vm0, %v1078_v18  ;;  %1023 = vmatprep.mubr.msk.bf16.mxu1 %vm439_vm0, %v1080_v19 }
  0x35   :  { %585 = vmatmul.mubr.bf16.gmra.mxu0 %v1082_v20  ;;  %713 = vmatmul.mubr.bf16.gmra.mxu1 %v1083_v21 }
  0x36   :  { %1008 = vmatprep.mubr.msk.bf16.mxu0 %vm439_vm0, %v1084_v22  ;;  %1024 = vmatprep.mubr.msk.bf16.mxu1 %vm439_vm0, %v1086_v23 }
  0x3d   :  { %593 = vmatmul.mubr.bf16.gmra.mxu0 %v1088_v24  ;;  %721 = vmatmul.mubr.bf16.gmra.mxu1 %v1089_v25 }
  0x3e   :  { %1009 = vmatprep.mubr.msk.bf16.mxu0 %vm439_vm0, %v1090_v26  ;;  %1025 = vmatprep.mubr.msk.bf16.mxu1 %vm439_vm0, %v1092_v27 }
  0x45   :  { %601 = vmatmul.mubr.bf16.gmra.mxu0 %v1094_v28  ;;  %729 = vmatmul.mubr.bf16.gmra.mxu1 %v1095_v29 }
  0x46   :  { %1010 = vmatprep.mubr.msk.bf16.mxu0 %vm439_vm0, %v1096_v30  ;;  %1026 = vmatprep.mubr.msk.bf16.mxu1 %vm439_vm0, %v1098_v31 }
  0x4d   :  { %609 = vmatmul.mubr.bf16.gmra.mxu0 %v1100_v32  ;;  %737 = vmatmul.mubr.bf16.gmra.mxu1 %v1101_v33 }
  0x4e   :  { %1011 = vmatprep.mubr.msk.bf16.mxu0 %vm439_vm0, %v1102_v34  ;;  %1027 = vmatprep.mubr.msk.bf16.mxu1 %vm439_vm0, %v1104_v35 }
  0x55   :  { %617 = vmatmul.mubr.bf16.gmra.mxu0 %v1106_v36  ;;  %745 = vmatmul.mubr.bf16.gmra.mxu1 %v1107_v37 }
  0x56   :  { %1012 = vmatprep.mubr.msk.bf16.mxu0 %vm439_vm0, %v1108_v38  ;;  %1028 = vmatprep.mubr.msk.bf16.mxu1 %vm439_vm0, %v1110_v39 }
  0x5d   :  { %625 = vmatmul.mubr.bf16.gmra.mxu0 %v1112_v40  ;;  %753 = vmatmul.mubr.bf16.gmra.mxu1 %v1113_v41 }
  0x5e   :  { %1013 = vmatprep.mubr.msk.bf16.mxu0 %vm439_vm0, %v1114_v42  ;;  %1029 = vmatprep.mubr.msk.bf16.mxu1 %vm439_vm0, %v1116_v43 }
  0x65   :  { %633 = vmatmul.mubr.bf16.gmra.mxu0 %v1118_v44  ;;  %761 = vmatmul.mubr.bf16.gmra.mxu1 %v1119_v45 }
  0x66   :  { %1014 = vmatprep.mubr.msk.bf16.mxu0 %vm439_vm0, %v1120_v46  ;;  %1030 = vmatprep.mubr.msk.bf16.mxu1 %vm439_vm0, %v1122_v47 }
  0x6d   :  { %641 = vmatmul.mubr.bf16.gmra.mxu0 %v1124_v48  ;;  %769 = vmatmul.mubr.bf16.gmra.mxu1 %v1125_v49 }
  0x6e   :  { %1015 = vmatprep.mubr.msk.bf16.mxu0 %vm439_vm0, %v1126_v50  ;;  %1031 = vmatprep.mubr.msk.bf16.mxu1 %vm439_vm0, %v1128_v51 }
  0x75   :  { %649 = vmatmul.mubr.bf16.gmra.mxu0 %v1130_v52  ;;  %777 = vmatmul.mubr.bf16.gmra.mxu1 %v1131_v53 }
  0x76   :  { %1016 = vmatprep.mubr.msk.bf16.mxu0 %vm439_vm0, %v1132_v54  ;;  %1032 = vmatprep.mubr.msk.bf16.mxu1 %vm439_vm0, %v1134_v55 }
  0x7d   :  { %657 = vmatmul.mubr.bf16.gmra.mxu0 %v1136_v56  ;;  %785 = vmatmul.mubr.bf16.gmra.mxu1 %v1137_v57 }
  0x7e   :  { %1017 = vmatprep.mubr.msk.bf16.mxu0 %vm439_vm0, %v1138_v58  ;;  %1033 = vmatprep.mubr.msk.bf16.mxu1 %vm439_vm0, %v1140_v59 }
  0x85   :  { %665 = vmatmul.mubr.bf16.gmra.mxu0 %v1142_v60  ;;  %793 = vmatmul.mubr.bf16.gmra.mxu1 %v1143_v61 }
  0x86   :  { %1018 = vmatprep.mubr.msk.bf16.mxu0 %vm439_vm0, %v1144_v62  ;;  %1034 = vmatprep.mubr.msk.bf16.mxu1 %vm439_vm0, %v1146_v63 }
  0x8d   :  { %673 = vmatmul.mubr.bf16.gmra.mxu0 %v1148_v0  ;;  %801 = vmatmul.mubr.bf16.gmra.mxu1 %v1149_v1 }
  0x8e   :  { %1019 = vmatprep.mubr.msk.bf16.mxu0 %vm439_vm0, %v1150_v2  ;;  %1035 = vmatprep.mubr.msk.bf16.mxu1 %vm439_vm0, %v1152_v3 }
  0x95   :  { %681 = vmatmul.mubr.bf16.gmra.mxu0 %v1154_v4  ;;  %809 = vmatmul.mubr.bf16.gmra.mxu1 %v1155_v5 }
  0x96   :  { %1020 = vmatprep.mubr.msk.bf16.mxu0 %vm439_vm0, %v1156_v6  ;;  %1036 = vmatprep.mubr.msk.bf16.mxu1 %vm439_vm0, %v1158_v7 }
  0x9d   :  { %689 = vmatmul.mubr.bf16.gmra.mxu0 %v1160_v8  ;;  %817 = vmatmul.mubr.bf16.gmra.mxu1 %v1161_v9 }
  0xe5   :  { %v1434_v10 = vpop.f32.mrf.mxu0  ;;  %v1436_v11 = vpop.f32.mrf.mxu1 }
  0xe7   :  { %v572_v12 = vpop.f32.mrf.mxu0  ;;  %v700_v13 = vpop.f32.mrf.mxu1 }
  0xe9   :  { %v1438_v14 = vpop.f32.mrf.mxu0  ;;  %v1440_v15 = vpop.f32.mrf.mxu1 }
  0xeb   :  { %v575_v16 = vpop.f32.mrf.mxu0  ;;  %v703_v17 = vpop.f32.mrf.mxu1 }
  0xed   :  { %v1442_v18 = vpop.f32.mrf.mxu0  ;;  %v1444_v19 = vpop.f32.mrf.mxu1 }
  0xef   :  { %v580_v20 = vpop.f32.mrf.mxu0  ;;  %v708_v21 = vpop.f32.mrf.mxu1 }
  0xf1   :  { %v1446_v22 = vpop.f32.mrf.mxu0  ;;  %v1448_v23 = vpop.f32.mrf.mxu1 }
  0xf3   :  { %v583_v24 = vpop.f32.mrf.mxu0  ;;  %v711_v25 = vpop.f32.mrf.mxu1 }
  0xf5   :  { %v1450_v26 = vpop.f32.mrf.mxu0  ;;  %v1452_v27 = vpop.f32.mrf.mxu1 }
  0xf7   :  { %v588_v28 = vpop.f32.mrf.mxu0  ;;  %v716_v29 = vpop.f32.mrf.mxu1 }
  0xf9   :  { %v1454_v30 = vpop.f32.mrf.mxu0  ;;  %v1456_v31 = vpop.f32.mrf.mxu1 }
  0xfb   :  { %v591_v32 = vpop.f32.mrf.mxu0  ;;  %v719_v33 = vpop.f32.mrf.mxu1 }
  0xfd   :  { %v1458_v34 = vpop.f32.mrf.mxu0  ;;  %v1460_v35 = vpop.f32.mrf.mxu1 }
  0xff   :  { %v596_v36 = vpop.f32.mrf.mxu0  ;;  %v724_v37 = vpop.f32.mrf.mxu1 }
 0x101   :  { %v1462_v38 = vpop.f32.mrf.mxu0  ;;  %v1464_v39 = vpop.f32.mrf.mxu1 }
 0x103   :  { %v599_v40 = vpop.f32.mrf.mxu0  ;;  %v727_v41 = vpop.f32.mrf.mxu1 }
 0x105   :  { %v1466_v42 = vpop.f32.mrf.mxu0  ;;  %v1468_v43 = vpop.f32.mrf.mxu1 }
 0x106   :  { %v825_v44 = vmax.f32 %v1434_v10, %v1466_v42  ;;  %v833_v45 = vmax.f32 %v1436_v11, %v1468_v43 }
 0x107   :  { %v604_v46 = vpop.f32.mrf.mxu0  ;;  %v732_v47 = vpop.f32.mrf.mxu1 }
 0x109   :  { %v1474_v48 = vpop.f32.mrf.mxu0  ;;  %v1476_v49 = vpop.f32.mrf.mxu1 }
 0x10a   :  { %v826_v50 = vmax.f32 %v1438_v14, %v1474_v48  ;;  %v1681_v11 = vmax.f32 %v1440_v15, %v1476_v49 }
 0x10b   :  { %v607_v52 = vpop.f32.mrf.mxu0  ;;  %v735_v53 = vpop.f32.mrf.mxu1 }
 0x10d   :  { %v1482_v54 = vpop.f32.mrf.mxu0  ;;  %v1484_v55 = vpop.f32.mrf.mxu1 }
 0x10f   :  { %v612_v58 = vpop.f32.mrf.mxu0  ;;  %v740_v59 = vpop.f32.mrf.mxu1 }
 0x111   :  { %v1490_v60 = vpop.f32.mrf.mxu0  ;;  %v1492_v61 = vpop.f32.mrf.mxu1 }
 0x113   :  { %v615_v0 = vpop.f32.mrf.mxu0  ;;  %v743_v1 = vpop.f32.mrf.mxu1 }
 0x115   :  { %v1498_v2 = vpop.f32.mrf.mxu0  ;;  %v1500_v3 = vpop.f32.mrf.mxu1 }
 0x117   :  { %v620_v6 = vpop.f32.mrf.mxu0  ;;  %v748_v7 = vpop.f32.mrf.mxu1 }
 0x119   :  { %v1506_v8 = vpop.f32.mrf.mxu0  ;;  %v1508_v9 = vpop.f32.mrf.mxu1 }
 0x11b   :  { %v623_v16 = vpop.f32.mrf.mxu0  ;;  %v751_v17 = vpop.f32.mrf.mxu1 }
 0x11d   :  { %v1514_v20 = vpop.f32.mrf.mxu0  ;;  %v1516_v21 = vpop.f32.mrf.mxu1 }
 0x11f   :  { %v628_v28 = vpop.f32.mrf.mxu0  ;;  %v756_v29 = vpop.f32.mrf.mxu1 }
 0x121   :  { %v1522_v32 = vpop.f32.mrf.mxu0  ;;  %v1524_v33 = vpop.f32.mrf.mxu1 }
 0x123   :  { %v631_v40 = vpop.f32.mrf.mxu0  ;;  %v759_v41 = vpop.f32.mrf.mxu1 }
 0x125   :  { %v634_v46 = vpop.f32.mrf.mxu0  ;;  %v762_v47 = vpop.f32.mrf.mxu1 }
 0x127   :  { %v636_v52 = vpop.f32.mrf.mxu0  ;;  %v764_v53 = vpop.f32.mrf.mxu1 }
 0x129   :  { %v637_v58 = vpop.f32.mrf.mxu0  ;;  %v765_v59 = vpop.f32.mrf.mxu1 }
 0x12b   :  { %v639_v0 = vpop.f32.mrf.mxu0  ;;  %v767_v1 = vpop.f32.mrf.mxu1 }
 0x12d   :  { %v642_v6 = vpop.f32.mrf.mxu0  ;;  %v770_v7 = vpop.f32.mrf.mxu1 }
 0x12f   :  { %v644_v16 = vpop.f32.mrf.mxu0  ;;  %v772_v17 = vpop.f32.mrf.mxu1 }
 0x131   :  { %v1530_v28 = vpop.f32.mrf.mxu0  ;;  %v1532_v29 = vpop.f32.mrf.mxu1 }
 0x133   :  { %v647_v36 = vpop.f32.mrf.mxu0  ;;  %v775_v37 = vpop.f32.mrf.mxu1 }
 0x135   :  { %v1534_v40 = vpop.f32.mrf.mxu0  ;;  %v1536_v41 = vpop.f32.mrf.mxu1 }
 0x137   :  { %v652_v52 = vpop.f32.mrf.mxu0  ;;  %v780_v53 = vpop.f32.mrf.mxu1 }
 0x139   :  { %v1538_v25 = vpop.f32.mrf.mxu0  ;;  %v1540_v0 = vpop.f32.mrf.mxu1 }
 0x13b   :  { %v655_v1 = vpop.f32.mrf.mxu0  ;;  %v783_v24 = vpop.f32.mrf.mxu1 }
 0x13c   :  { %v1553_v24 = vld [vmem:[%s1679_s2] ss:$0 sm:$0xff] }
 0x13d   :  { %v1542_v16 = vpop.f32.mrf.mxu0  ;;  %v1544_v17 = vpop.f32.mrf.mxu1 }
 0x13f   :  { %v660_v13 = vpop.f32.mrf.mxu0  ;;  %v788_v12 = vpop.f32.mrf.mxu1 }
 0x141   :  { %v1546_v36 = vpop.f32.mrf.mxu0  ;;  %v1548_v37 = vpop.f32.mrf.mxu1 }
 0x143   :  { %v663_v5 = vpop.f32.mrf.mxu0  ;;  %v791_v4 = vpop.f32.mrf.mxu1 }
 0x145   :  { %v666_v52 = vpop.f32.mrf.mxu0  ;;  %v794_v53 = vpop.f32.mrf.mxu1 }
 0x146   :  { %v841_v63 = vmax.f32 %v634_v46, %v666_v52  ;;  %v849_v62 = vmax.f32 %v762_v47, %v794_v53 }
 0x147   :  { %v668_v1 = vpop.f32.mrf.mxu0  ;;  %v796_v57 = vpop.f32.mrf.mxu1 }
 0x148   :  { %v857_v12 = vmax.f32 %v825_v44, %v841_v63  ;;  %v865_v5 = vmax.f32 %v833_v45, %v849_v62  ;;  %v1682_v62 = vmax.f32 %v1442_v18, %v1482_v54 }
 0x149   :  { %v669_v4 = vpop.f32.mrf.mxu0  ;;  %v797_v13 = vpop.f32.mrf.mxu1 }
 0x14a   :  { %v880_v46 = vadd.f32 %v1553_v24, %v857_v12  ;;  %v888_v47 = vadd.f32 %v1553_v24, %v865_v5  ;;  %v842_v52 = vmax.f32 %v637_v58, %v669_v4  ;;  %v850_v53 = vmax.f32 %v765_v59, %v797_v13 }
 0x14b   :  { %v671_v56 = vpop.f32.mrf.mxu0  ;;  %v799_v51 = vpop.f32.mrf.mxu1  ;;  %v1683_v58 = vmax.f32 %v1444_v19, %v1484_v55 }
 0x14c   :  { %v896_v1 = vmax.f32 %v880_v46, 0.0  ;;  %v904_v57 = vmax.f32 %v888_v47, 0.0  ;;  %v858_v10 = vmax.f32 %v826_v50, %v842_v52  ;;  %v866_v42 = vmax.f32 %v1681_v11, %v850_v53 }
 0x14d   :  { %v674_v43 = vpop.f32.mrf.mxu0  ;;  %v802_v44 = vpop.f32.mrf.mxu1  ;;  %v1684_v46 = vmax.f32 %v1446_v22, %v1490_v60  ;;  %v1685_v52 = vmax.f32 %v1448_v23, %v1492_v61 }
 0x14e   :  { %912 = vst [vmem:[%s1680_s3] sm:$0xff] %v896_v1  ;;  %920 = vst [vmem:[%s1680_s3 + $0x40] sm:$0xff] %v904_v57  ;;  %v881_v45 = vadd.f32 %v1553_v24, %v858_v10  ;;  %v889_v51 = vadd.f32 %v1553_v24, %v866_v42  ;;  %v843_v14 = vmax.f32 %v642_v6, %v674_v43 }
 0x14f   :  { %v851_v48 = vmax.f32 %v770_v7, %v802_v44  ;;  %v676_v50 = vpop.f32.mrf.mxu0  ;;  %v804_v56 = vpop.f32.mrf.mxu1  ;;  %v1686_v42 = vmax.f32 %v1450_v26, %v1498_v2  ;;  %v1687_v44 = vmax.f32 %v1452_v27, %v1500_v3 }
 0x150   :  { %v897_v15 = vmax.f32 %v881_v45, 0.0  ;;  %v905_v49 = vmax.f32 %v889_v51, 0.0  ;;  %v859_v63 = vmax.f32 %v1682_v62, %v843_v14  ;;  %v1688_v56 = vmax.f32 %v1454_v30, %v1506_v8 }
 0x151   :  { %v867_v59 = vmax.f32 %v1683_v58, %v851_v48  ;;  %v677_v12 = vpop.f32.mrf.mxu0  ;;  %v805_v5 = vpop.f32.mrf.mxu1 }
 0x152   :  { %913 = vst [vmem:[%s1680_s3 + $0x8] sm:$0xff] %v897_v15  ;;  %921 = vst [vmem:[%s1680_s3 + $0x48] sm:$0xff] %v905_v49  ;;  %v882_v6 = vadd.f32 %v1553_v24, %v859_v63  ;;  %v844_v18 = vmax.f32 %v1530_v28, %v677_v12  ;;  %v852_v54 = vmax.f32 %v1532_v29, %v805_v5 }
 0x153   :  { %v890_v7 = vadd.f32 %v1553_v24, %v867_v59  ;;  %v679_v19 = vpop.f32.mrf.mxu0  ;;  %v807_v55 = vpop.f32.mrf.mxu1  ;;  %v1689_v49 = vmax.f32 %v1456_v31, %v1508_v9  ;;  %v1690_v5 = vmax.f32 %v1458_v34, %v1514_v20 }
 0x154   :  { %v898_v4 = vmax.f32 %v882_v6, 0.0  ;;  %v860_v47 = vmax.f32 %v1684_v46, %v844_v18  ;;  %v868_v53 = vmax.f32 %v1685_v52, %v852_v54 }
 0x155   :  { %v906_v13 = vmax.f32 %v890_v7, 0.0  ;;  %v682_v1 = vpop.f32.mrf.mxu0  ;;  %v810_v57 = vpop.f32.mrf.mxu1  ;;  %v1691_v7 = vmax.f32 %v1460_v35, %v1516_v21 }
 0x156   :  { %914 = vst [vmem:[%s1680_s3 + $0x10] sm:$0xff] %v898_v4  ;;  %v883_v28 = vadd.f32 %v1553_v24, %v860_v47  ;;  %v891_v29 = vadd.f32 %v1553_v24, %v868_v53  ;;  %v845_v22 = vmax.f32 %v1534_v40, %v682_v1  ;;  %v853_v60 = vmax.f32 %v1536_v41, %v810_v57 }
 0x157   :  { %922 = vst [vmem:[%s1680_s3 + $0x50] sm:$0xff] %v906_v13  ;;  %v684_v23 = vpop.f32.mrf.mxu0  ;;  %v812_v61 = vpop.f32.mrf.mxu1  ;;  %v1692_v13 = vmax.f32 %v1462_v38, %v1522_v32  ;;  %v1693_v47 = vmax.f32 %v1464_v39, %v1524_v33 }
 0x158   :  { %v899_v10 = vmax.f32 %v883_v28, 0.0  ;;  %v907_v11 = vmax.f32 %v891_v29, 0.0  ;;  %v861_v43 = vmax.f32 %v1686_v42, %v845_v22  ;;  %v869_v45 = vmax.f32 %v1687_v44, %v853_v60 }
 0x159   :  { %v685_v51 = vpop.f32.mrf.mxu0  ;;  %v813_v14 = vpop.f32.mrf.mxu1 }
 0x15a   :  { %915 = vst [vmem:[%s1680_s3 + $0x18] sm:$0xff] %v899_v10  ;;  %923 = vst [vmem:[%s1680_s3 + $0x58] sm:$0xff] %v907_v11  ;;  %v884_v40 = vadd.f32 %v1553_v24, %v861_v43  ;;  %v892_v41 = vadd.f32 %v1553_v24, %v869_v45  ;;  %v846_v26 = vmax.f32 %v1538_v25, %v685_v51 }
 0x15b   :  { %v854_v2 = vmax.f32 %v1540_v0, %v813_v14  ;;  %v687_v27 = vpop.f32.mrf.mxu0  ;;  %v815_v3 = vpop.f32.mrf.mxu1 }
 0x15c   :  { %v900_v48 = vmax.f32 %v884_v40, 0.0  ;;  %v908_v50 = vmax.f32 %v892_v41, 0.0  ;;  %v862_v15 = vmax.f32 %v1688_v56, %v846_v26 }
 0x15d   :  { %v870_v62 = vmax.f32 %v1689_v49, %v854_v2  ;;  %v690_v63 = vpop.f32.mrf.mxu0  ;;  %v818_v58 = vpop.f32.mrf.mxu1 }
 0x15e   :  { %916 = vst [vmem:[%s1680_s3 + $0x20] sm:$0xff] %v900_v48  ;;  %924 = vst [vmem:[%s1680_s3 + $0x60] sm:$0xff] %v908_v50  ;;  %v885_v25 = vadd.f32 %v1553_v24, %v862_v15  ;;  %v847_v30 = vmax.f32 %v1542_v16, %v690_v63  ;;  %v855_v8 = vmax.f32 %v1544_v17, %v818_v58 }
 0x15f   :  { %v893_v0 = vadd.f32 %v1553_v24, %v870_v62  ;;  %v692_v31 = vpop.f32.mrf.mxu0  ;;  %v820_v9 = vpop.f32.mrf.mxu1 }
 0x160   :  { %v901_v59 = vmax.f32 %v885_v25, 0.0  ;;  %v863_v6 = vmax.f32 %v1690_v5, %v847_v30  ;;  %v871_v18 = vmax.f32 %v1691_v7, %v855_v8 }
 0x161   :  { %v909_v12 = vmax.f32 %v893_v0, 0.0  ;;  %v693_v54 = vpop.f32.mrf.mxu0  ;;  %v821_v19 = vpop.f32.mrf.mxu1 }
 0x162   :  { %917 = vst [vmem:[%s1680_s3 + $0x28] sm:$0xff] %v901_v59  ;;  %v886_v16 = vadd.f32 %v1553_v24, %v863_v6  ;;  %v894_v17 = vadd.f32 %v1553_v24, %v871_v18  ;;  %v848_v34 = vmax.f32 %v1546_v36, %v693_v54  ;;  %v856_v20 = vmax.f32 %v1548_v37, %v821_v19 }
 0x163   :  { %925 = vst [vmem:[%s1680_s3 + $0x68] sm:$0xff] %v909_v12  ;;  %v695_v35 = vpop.f32.mrf.mxu0  ;;  %v823_v21 = vpop.f32.mrf.mxu1 }
 0x164   :  { %v902_v55 = vmax.f32 %v886_v16, 0.0  ;;  %v910_v4 = vmax.f32 %v894_v17, 0.0  ;;  %v864_v46 = vmax.f32 %v1692_v13, %v848_v34  ;;  %v872_v52 = vmax.f32 %v1693_v47, %v856_v20 }
 0x166   :  { %918 = vst [vmem:[%s1680_s3 + $0x30] sm:$0xff] %v902_v55  ;;  %926 = vst [vmem:[%s1680_s3 + $0x70] sm:$0xff] %v910_v4  ;;  %v887_v36 = vadd.f32 %v1553_v24, %v864_v46  ;;  %v895_v37 = vadd.f32 %v1553_v24, %v872_v52 }
 0x168   :  { %v903_v53 = vmax.f32 %v887_v36, 0.0  ;;  %v911_v1 = vmax.f32 %v895_v37, 0.0 }
 0x16a   :  { %919 = vst [vmem:[%s1680_s3 + $0x38] sm:$0xff] %v903_v53  ;;  %927 = vst [vmem:[%s1680_s3 + $0x78] sm:$0xff] %v911_v1 }

// kernel: cnn_forward.6
= control target key start
LH: loop header
LB: loop body
LE: loop exit
PB: predicated region body
PF: predicated region fallthrough
CT: control target
= control target key end

     0   :  { %vm311_vm0 = vcmask 261120   ;;  %s969_s1 = inlined_call_operand.vmem [shape: bf16[288,128], index: 1, kind: input, shape index: {}]   ;;  %s970_s0 = inlined_call_operand.vmem [shape: bf16[2,4,16,288], index: 0, kind: input, shape index: {}]   ;;  %s971_s2 = inlined_call_operand.vmem [shape: f32[1,128], index: 2, kind: input, shape index: {}]   ;;  %s972_s3 = inlined_call_operand.vmem [shape: f32[2,16,128], index: 3, kind: output, shape index: {}]  }
   0x1   :  { %v726_v0 = vld [vmem:[%s969_s1 + $0x78] sm:$0xff]   ;;  %v728_v2 = vld [vmem:[%s969_s1 + $0x70] sm:$0xff]   ;;  %v730_v4 = vld [vmem:[%s969_s1 + $0x68] sm:$0xff]  }
   0x2   :  { %v727_v1 = vld [vmem:[%s969_s1 + $0x38] sm:$0xff]   ;;  %616 = vmatprep.subr.bf16.mxu0 %v726_v0  ;;  %710 = vmatprep.subr.bf16.mxu1 %v726_v0  ;;  %v729_v3 = vld [vmem:[%s969_s1 + $0x30] sm:$0xff]   ;;  %v731_v5 = vld [vmem:[%s969_s1 + $0x28] sm:$0xff]  }
   0x3   :  { %617 = vmatpush3.bf16.msra.mxu0 %v727_v1  ;;  %718 = vmatpush3.bf16.msra.mxu1 %v727_v1  ;;  %v732_v6 = vld [vmem:[%s969_s1 + $0x60] sm:$0xff]   ;;  %v734_v8 = vld [vmem:[%s969_s1 + $0x58] sm:$0xff]   ;;  %v736_v10 = vld [vmem:[%s969_s1 + $0x50] sm:$0xff]  }
   0x4   :  { %618 = vmatprep.subr.bf16.mxu0 %v728_v2  ;;  %711 = vmatprep.subr.bf16.mxu1 %v728_v2  ;;  %v733_v7 = vld [vmem:[%s969_s1 + $0x20] sm:$0xff]   ;;  %v735_v9 = vld [vmem:[%s969_s1 + $0x18] sm:$0xff]   ;;  %v737_v13 = vld [vmem:[%s969_s1 + $0x10] sm:$0xff]  }
   0x5   :  { %v744_v11 = vld [vmem:[%s970_s0 + $0x4] ss:$12 sps:$4 sm:$0xff]   ;;  %v747_v12 = vld [vmem:[%s970_s0 + $0x94] ss:$12 sps:$4 sm:$0xff]   ;;  %v738_v14 = vld [vmem:[%s969_s1 + $0x48] sm:$0xff]  }
   0x6   :  { %368 = vmatprep.mubr.bf16.mxu0 %v744_v11  ;;  %416 = vmatprep.mubr.bf16.mxu1 %v747_v12  ;;  %v739_v15 = vld [vmem:[%s969_s1 + $0x8] sm:$0xff]   ;;  %v740_v16 = vld [vmem:[%s969_s1 + $0x40] sm:$0xff]   ;;  %v745_v20 = vld [vmem:[%s970_s0 + $0x90] ss:$12 sps:$4 sm:$0xff]  }
   0x7   :  { %619 = vmatpush3.bf16.msra.mxu0 %v729_v3  ;;  %719 = vmatpush3.bf16.msra.mxu1 %v729_v3  ;;  %v741_v17 = vld [vmem:[%s969_s1] sm:$0xff]   ;;  %v748_v19 = vld [vmem:[%s969_s1 + $0x88] sm:$0xff]   ;;  %v759_v28 = vld [vmem:[%s970_s0 + $0x30] ss:$12 sps:$4 sm:$0xff]  }
   0x8   :  { %620 = vmatprep.subr.bf16.mxu0 %v730_v4  ;;  %712 = vmatprep.subr.bf16.mxu1 %v730_v4  ;;  %v742_v18 = vld [vmem:[%s970_s0] ss:$12 sps:$4 sm:$0xff]   ;;  %v749_v21 = vld [vmem:[%s970_s0 + $0x1c] ss:$12 sps:$4 sm:$0xff]   ;;  %v753_v24 = vld [vmem:[%s970_s0 + $0x18] ss:$12 sps:$4 sm:$0xff]  }
   0x9   :  { %v751_v22 = vld [vmem:[%s970_s0 + $0xac] ss:$12 sps:$4 sm:$0xff]   ;;  %v755_v23 = vld [vmem:[%s969_s1 + $0x80] sm:$0xff]   ;;  %v754_v25 = vld [vmem:[%s970_s0 + $0xa8] ss:$12 sps:$4 sm:$0xff]  }
   0xa   :  { %v756_v26 = vld [vmem:[%s970_s0 + $0x34] ss:$12 sps:$4 sm:$0xff]   ;;  %v761_v30 = vld [vmem:[%s970_s0 + $0x4c] ss:$12 sps:$4 sm:$0xff]   ;;  %v765_v33 = vld [vmem:[%s970_s0 + $0x50] ss:$12 sps:$4 sm:$0xff]  }
   0xb   :  { %621 = vmatpush3.bf16.msra.mxu0 %v731_v5  ;;  %720 = vmatpush3.bf16.msra.mxu1 %v731_v5  ;;  %v758_v27 = vld [vmem:[%s970_s0 + $0x8] ss:$12 sps:$4 sm:$0xff]   ;;  %v760_v29 = vld [vmem:[%s970_s0 + $0x20] ss:$12 sps:$4 sm:$0xff]   ;;  %v763_v31 = vld [vmem:[%s970_s0 + $0x38] ss:$12 sps:$4 sm:$0xff]  }
   0xc   :  { %622 = vmatprep.subr.bf16.mxu0 %v732_v6  ;;  %713 = vmatprep.subr.bf16.mxu1 %v732_v6  ;;  %v764_v32 = vld [vmem:[%s970_s0 + $0x48] ss:$12 sps:$4 sm:$0xff]   ;;  %v766_v34 = vld [vmem:[%s970_s0 + $0x64] ss:$12 sps:$4 sm:$0xff]   ;;  %v769_v36 = vld [vmem:[%s970_s0 + $0x60] ss:$12 sps:$4 sm:$0xff]  }
   0xd   :  { %v768_v35 = vld [vmem:[%s970_s0 + $0x68] ss:$12 sps:$4 sm:$0xff]   ;;  %v770_v37 = vld [vmem:[%s970_s0 + $0x80] ss:$12 sps:$4 sm:$0xff]   ;;  %v773_v39 = vld [vmem:[%s970_s0 + $0x98] ss:$12 sps:$4 sm:$0xff]  }
   0xe   :  { %v771_v38 = vld [vmem:[%s970_s0 + $0x7c] ss:$12 sps:$4 sm:$0xff]   ;;  %v774_v40 = vld [vmem:[%s970_s0 + $0x78] ss:$12 sps:$4 sm:$0xff]  }
   0xf   :  { %623 = vmatpush3.bf16.msra.mxu0 %v733_v7  ;;  %721 = vmatpush3.bf16.msra.mxu1 %v733_v7  ;;  %v775_v41 = vld [vmem:[%s970_s0 + $0xb0] ss:$12 sps:$4 sm:$0xff]  }
  0x10   :  { %624 = vmatprep.subr.bf16.mxu0 %v734_v8  ;;  %714 = vmatprep.subr.bf16.mxu1 %v734_v8 }
  0x13   :  { %625 = vmatpush3.bf16.msra.mxu0 %v735_v9  ;;  %722 = vmatpush3.bf16.msra.mxu1 %v735_v9 }
  0x14   :  { %626 = vmatprep.subr.bf16.mxu0 %v736_v10  ;;  %715 = vmatprep.subr.bf16.mxu1 %v736_v10 }
  0x17   :  { %627 = vmatpush3.bf16.msra.mxu0 %v737_v13  ;;  %723 = vmatpush3.bf16.msra.mxu1 %v737_v13 }
  0x18   :  { %628 = vmatprep.subr.bf16.mxu0 %v738_v14  ;;  %716 = vmatprep.subr.bf16.mxu1 %v738_v14 }
  0x1b   :  { %629 = vmatpush3.bf16.msra.mxu0 %v739_v15  ;;  %724 = vmatpush3.bf16.msra.mxu1 %v739_v15 }
  0x1c   :  { %630 = vmatprep.subr.bf16.mxu0 %v740_v16  ;;  %717 = vmatprep.subr.bf16.mxu1 %v740_v16 }
  0x1f   :  { %631 = vmatpush3.bf16.msra.mxu0 %v741_v17  ;;  %725 = vmatpush3.bf16.msra.mxu1 %v741_v17 }
  0x20   :  { %690 = vmatprep.subr.bf16.mxu1 %v748_v19 }
  0x22   :  { %369 = vmatmul.mubr.bf16.vlgmr.msra.gmra.mxu0 %v742_v18  ;;  %417 = vmatmul.mubr.bf16.vlgmr.msra.gmra.mxu1 %v745_v20 }
  0x23   :  { %691 = vmatpush3.bf16.msra.mxu1 %v748_v19  ;;  %376 = vmatprep.mubr.bf16.mxu0 %v749_v21 }
  0x24   :  { %424 = vmatprep.mubr.bf16.mxu1 %v751_v22  ;;  %692 = vmatprep.subr.bf16.mxu1 %v755_v23 }
  0x27   :  { %693 = vmatpush3.bf16.msra.mxu1 %v755_v23 }
  0x2a   :  { %377 = vmatmul.mubr.bf16.gmra.mxu0 %v753_v24  ;;  %425 = vmatmul.mubr.bf16.gmra.mxu1 %v754_v25  ;;  %v615_v25 = vld [vmem:[%s971_s2] ss:$0 sm:$0xff] }
  0x2b   :  { %384 = vmatprep.mubr.bf16.mxu0 %v756_v26  ;;  %694 = vmatprep.mubr.msk.bf16.mxu1 %vm311_vm0, %v758_v27 }
  0x32   :  { %385 = vmatmul.mubr.bf16.gmra.mxu0 %v759_v28  ;;  %695 = vmatmul.mubr.msk.bf16.vlgmr.msra.gmra.mxu1 %vm311_vm0, %v760_v29 }
  0x33   :  { %392 = vmatprep.mubr.bf16.mxu0 %v761_v30  ;;  %698 = vmatprep.mubr.msk.bf16.mxu1 %vm311_vm0, %v763_v31 }
  0x3a   :  { %393 = vmatmul.mubr.bf16.gmra.mxu0 %v764_v32  ;;  %699 = vmatmul.mubr.msk.bf16.gmra.mxu1 %vm311_vm0, %v765_v33 }
  0x3b   :  { %400 = vmatprep.mubr.bf16.mxu0 %v766_v34  ;;  %702 = vmatprep.mubr.msk.bf16.mxu1 %vm311_vm0, %v768_v35 }
  0x42   :  { %401 = vmatmul.mubr.bf16.gmra.mxu0 %v769_v36  ;;  %703 = vmatmul.mubr.msk.bf16.gmra.mxu1 %vm311_vm0, %v770_v37 }
  0x43   :  { %408 = vmatprep.mubr.bf16.mxu0 %v771_v38  ;;  %706 = vmatprep.mubr.msk.bf16.mxu1 %vm311_vm0, %v773_v39 }
  0x4a   :  { %409 = vmatmul.mubr.bf16.gmra.mxu0 %v774_v40  ;;  %707 = vmatmul.mubr.msk.bf16.gmra.mxu1 %vm311_vm0, %v775_v41 }
  0xe2   :  { %v632_v42 = vpop.f32.mrf.mxu0  ;;  %v930_v43 = vpop.f32.mrf.mxu1 }
  0xe4   :  { %v633_v44 = vpop.f32.mrf.mxu0  ;;  %v932_v45 = vpop.f32.mrf.mxu1 }
  0xe5   :  { %v634_v2 = vadd.f32 %v633_v44, %v632_v42 }
  0xe6   :  { %v635_v46 = vpop.f32.mrf.mxu0  ;;  %v934_v47 = vpop.f32.mrf.mxu1 }
  0xe8   :  { %v636_v48 = vpop.f32.mrf.mxu0  ;;  %v936_v49 = vpop.f32.mrf.mxu1 }
  0xe9   :  { %v637_v14 = vadd.f32 %v636_v48, %v635_v46 }
  0xea   :  { %v638_v50 = vpop.f32.mrf.mxu0  ;;  %v938_v51 = vpop.f32.mrf.mxu1 }
  0xec   :  { %v639_v52 = vpop.f32.mrf.mxu0  ;;  %v940_v53 = vpop.f32.mrf.mxu1 }
  0xed   :  { %v640_v5 = vadd.f32 %v639_v52, %v638_v50  ;;  %v670_v50 = vadd.f32 %v932_v45, %v930_v43 }
  0xee   :  { %v641_v54 = vpop.f32.mrf.mxu0  ;;  %v942_v55 = vpop.f32.mrf.mxu1 }
  0xf0   :  { %v642_v56 = vpop.f32.mrf.mxu0  ;;  %v944_v57 = vpop.f32.mrf.mxu1 }
  0xf1   :  { %v643_v17 = vadd.f32 %v642_v56, %v641_v54 }
  0xf2   :  { %v644_v58 = vpop.f32.mrf.mxu0  ;;  %v696_v59 = vpop.f32.mrf.mxu1 }
  0xf3   :  { %v476_v11 = vadd.f32 %v696_v59, %v640_v5  ;;  %v676_v59 = vadd.f32 %v940_v53, %v938_v51 }
  0xf4   :  { %v645_v60 = vpop.f32.mrf.mxu0  ;;  %v467_v61 = vpop.f32.mrf.mxu1 }
  0xf5   :  { %v468_v6 = vadd.f32 %v634_v2, %v467_v61  ;;  %v646_v9 = vadd.f32 %v645_v60, %v644_v58 }
  0xf6   :  { %v647_v62 = vpop.f32.mrf.mxu0  ;;  %v697_v63 = vpop.f32.mrf.mxu1 }
  0xf7   :  { %v530_v18 = vmax.f32 %v468_v6, %v476_v11  ;;  %v479_v28 = vadd.f32 %v697_v63, %v643_v17 }
  0xf8   :  { %v648_v0 = vpop.f32.mrf.mxu0  ;;  %v470_v1 = vpop.f32.mrf.mxu1 }
  0xf9   :  { %v649_v21 = vadd.f32 %v648_v0, %v647_v62  ;;  %v471_v22 = vadd.f32 %v637_v14, %v470_v1  ;;  %v673_v62 = vadd.f32 %v936_v49, %v934_v47 }
  0xfa   :  { %v650_v3 = vpop.f32.mrf.mxu0  ;;  %v700_v4 = vpop.f32.mrf.mxu1 }
  0xfb   :  { %v531_v34 = vmax.f32 %v471_v22, %v479_v28 }
  0xfc   :  { %v651_v7 = vpop.f32.mrf.mxu0  ;;  %v483_v8 = vpop.f32.mrf.mxu1 }
  0xfd   :  { %v652_v10 = vadd.f32 %v651_v7, %v650_v3  ;;  %v484_v16 = vadd.f32 %v646_v9, %v483_v8  ;;  %v679_v3 = vadd.f32 %v944_v57, %v942_v55 }
  0xfe   :  { %v653_v12 = vpop.f32.mrf.mxu0  ;;  %v701_v13 = vpop.f32.mrf.mxu1 }
  0xff   :  { %v492_v15 = vadd.f32 %v700_v4, %v652_v10 }
 0x100   :  { %v654_v19 = vpop.f32.mrf.mxu0  ;;  %v486_v20 = vpop.f32.mrf.mxu1 }
 0x101   :  { %v534_v23 = vmax.f32 %v484_v16, %v492_v15  ;;  %v655_v24 = vadd.f32 %v654_v19, %v653_v12  ;;  %v487_v31 = vadd.f32 %v649_v21, %v486_v20 }
 0x102   :  { %v656_v26 = vpop.f32.mrf.mxu0  ;;  %v704_v27 = vpop.f32.mrf.mxu1 }
 0x103   :  { %v538_v29 = vmax.f32 %v530_v18, %v534_v23  ;;  %v495_v30 = vadd.f32 %v701_v13, %v655_v24 }
 0x104   :  { %v657_v32 = vpop.f32.mrf.mxu0  ;;  %v499_v33 = vpop.f32.mrf.mxu1 }
 0x105   :  { %v549_v35 = vadd.f32 %v615_v25, %v538_v29  ;;  %v535_v36 = vmax.f32 %v487_v31, %v495_v30  ;;  %v658_v54 = vadd.f32 %v657_v32, %v656_v26 }
 0x106   :  { %v659_v37 = vpop.f32.mrf.mxu0  ;;  %v705_v38 = vpop.f32.mrf.mxu1 }
 0x107   :  { %v553_v39 = vmax.f32 %v549_v35, 0.0  ;;  %v539_v40 = vmax.f32 %v531_v34, %v535_v36  ;;  %v500_v1 = vadd.f32 %v658_v54, %v499_v33 }
 0x108   :  { %v660_v41 = vpop.f32.mrf.mxu0  ;;  %v502_v42 = vpop.f32.mrf.mxu1 }
 0x109   :  { %557 = vst [vmem:[%s972_s3] sm:$0xff] %v553_v39  ;;  %v550_v44 = vadd.f32 %v615_v25, %v539_v40  ;;  %v661_v43 = vadd.f32 %v660_v41, %v659_v37 }
 0x10a   :  { %v662_v46 = vpop.f32.mrf.mxu0  ;;  %v708_v48 = vpop.f32.mrf.mxu1 }
 0x10b   :  { %v554_v52 = vmax.f32 %v550_v44, 0.0  ;;  %v524_v45 = vadd.f32 %v708_v48, %v676_v59  ;;  %v503_v8 = vadd.f32 %v661_v43, %v502_v42 }
 0x10c   :  { %v663_v56 = vpop.f32.mrf.mxu0  ;;  %v515_v58 = vpop.f32.mrf.mxu1 }
 0x10d   :  { %558 = vst [vmem:[%s972_s3 + $0x8] sm:$0xff] %v554_v52  ;;  %v664_v60 = vadd.f32 %v663_v56, %v662_v46  ;;  %v516_v61 = vadd.f32 %v670_v50, %v515_v58 }
 0x10e   :  { %v665_v63 = vpop.f32.mrf.mxu0  ;;  %v709_v0 = vpop.f32.mrf.mxu1 }
 0x10f   :  { %v508_v2 = vadd.f32 %v704_v27, %v664_v60  ;;  %v536_v5 = vmax.f32 %v516_v61, %v524_v45  ;;  %v527_v10 = vadd.f32 %v709_v0, %v679_v3 }
 0x110   :  { %v666_v4 = vpop.f32.mrf.mxu0  ;;  %v518_v51 = vpop.f32.mrf.mxu1 }
 0x111   :  { %v532_v53 = vmax.f32 %v500_v1, %v508_v2  ;;  %v667_v6 = vadd.f32 %v666_v4, %v665_v63  ;;  %v519_v7 = vadd.f32 %v673_v62, %v518_v51 }
 0x113   :  { %v540_v9 = vmax.f32 %v532_v53, %v536_v5  ;;  %v511_v11 = vadd.f32 %v705_v38, %v667_v6  ;;  %v537_v12 = vmax.f32 %v519_v7, %v527_v10 }
 0x115   :  { %v551_v47 = vadd.f32 %v615_v25, %v540_v9  ;;  %v533_v49 = vmax.f32 %v503_v8, %v511_v11 }
 0x117   :  { %v555_v13 = vmax.f32 %v551_v47, 0.0  ;;  %v541_v14 = vmax.f32 %v533_v49, %v537_v12 }
 0x119   :  { %559 = vst [vmem:[%s972_s3 + $0x10] sm:$0xff] %v555_v13  ;;  %v552_v55 = vadd.f32 %v615_v25, %v541_v14 }
 0x11b   :  { %v556_v57 = vmax.f32 %v552_v55, 0.0 }
 0x11d   :  { %560 = vst [vmem:[%s972_s3 + $0x18] sm:$0xff] %v556_v57 }

// kernel: cnn_forward.7
= control target key start
LH: loop header
LB: loop body
LE: loop exit
PB: predicated region body
PF: predicated region fallthrough
CT: control target
= control target key end

     0   :  { %v281_v36 = vlaneseq  ;;  %v3107_v37 = vmov 1966171168   ;;  %s4071_s0 = inlined_call_operand.vmem [shape: bf16[2,1024], index: 0, kind: input, shape index: {}]   ;;  %s4072_s1 = inlined_call_operand.vmem [shape: bf16[1024,512], index: 1, kind: input, shape index: {}]   ;;  %s4073_s2 = inlined_call_operand.vmem [shape: f32[1,512], index: 2, kind: input, shape index: {}]   ;;  %s4074_s3 = inlined_call_operand.vmem [shape: bf16[512,128], index: 3, kind: input, shape index: {}]   ;;  %s4075_s4 = inlined_call_operand.vmem [shape: f32[1,128], index: 4, kind: input, shape index: {}]   ;;  %s4076_s5 = inlined_call_operand.hbm [shape: f32[2,128], index: 5, kind: output, shape index: {}]  }
   0x1   :  { %v2668_v0 = vld [vmem:[%s4072_s1 + $0xe4] ss:$16 sps:$4 sm:$0xff]   ;;  %v2672_v2 = vld [vmem:[%s4072_s1 + $0xe0] ss:$16 sps:$4 sm:$0xff]   ;;  %v304_v38 = vunpack.c.l.s4 %v3107_v37 }
   0x2   :  { %v2670_v1 = vld [vmem:[%s4072_s1 + $0x2e4] ss:$16 sps:$4 sm:$0xff]   ;;  %1639 = vmatprep.subr.bf16.mxu0 %v2668_v0  ;;  %v2673_v3 = vld [vmem:[%s4072_s1 + $0x2e0] ss:$16 sps:$4 sm:$0xff]   ;;  %v3256_v42 = vshrl.u32 %v281_v36, 7 }
   0x3   :  { %1680 = vmatprep.subr.bf16.mxu1 %v2670_v1  ;;  %v2674_v4 = vld [vmem:[%s4072_s1 + $0xc4] ss:$16 sps:$4 sm:$0xff]   ;;  %1640 = vmatpush1.bf16.msra.mxu0 %v2672_v2  ;;  %v2678_v6 = vld [vmem:[%s4072_s1 + $0xc0] ss:$16 sps:$4 sm:$0xff]   ;;  %v305_v43 = vunpack.c.0.s8 %v304_v38 }
   0x4   :  { %1681 = vmatpush1.bf16.msra.mxu1 %v2673_v3  ;;  %v2676_v5 = vld [vmem:[%s4072_s1 + $0x2c4] ss:$16 sps:$4 sm:$0xff]   ;;  %1641 = vmatprep.subr.bf16.mxu0 %v2674_v4  ;;  %v2679_v7 = vld [vmem:[%s4072_s1 + $0x2c0] ss:$16 sps:$4 sm:$0xff]  }
   0x5   :  { %1682 = vmatprep.subr.bf16.mxu1 %v2676_v5  ;;  %v2680_v8 = vld [vmem:[%s4072_s1 + $0xa4] ss:$16 sps:$4 sm:$0xff]   ;;  %v2684_v10 = vld [vmem:[%s4072_s1 + $0xa0] ss:$16 sps:$4 sm:$0xff]   ;;  %v308_v49 = vsub.s32 %v305_v43, %v3256_v42 }
   0x6   :  { %v2682_v9 = vld [vmem:[%s4072_s1 + $0x2a4] ss:$16 sps:$4 sm:$0xff]   ;;  %v2685_v11 = vld [vmem:[%s4072_s1 + $0x2a0] ss:$16 sps:$4 sm:$0xff]  }
   0x7   :  { %1642 = vmatpush1.bf16.msra.mxu0 %v2678_v6  ;;  %v2686_v12 = vld [vmem:[%s4072_s1 + $0x84] ss:$16 sps:$4 sm:$0xff]   ;;  %v2690_v14 = vld [vmem:[%s4072_s1 + $0x80] ss:$16 sps:$4 sm:$0xff]  }
   0x8   :  { %1683 = vmatpush1.bf16.msra.mxu1 %v2679_v7  ;;  %1643 = vmatprep.subr.bf16.mxu0 %v2680_v8  ;;  %v2688_v13 = vld [vmem:[%s4072_s1 + $0x284] ss:$16 sps:$4 sm:$0xff]   ;;  %v2691_v15 = vld [vmem:[%s4072_s1 + $0x280] ss:$16 sps:$4 sm:$0xff]  }
   0x9   :  { %1684 = vmatprep.subr.bf16.mxu1 %v2682_v9  ;;  %v2692_v16 = vld [vmem:[%s4072_s1 + $0x64] ss:$16 sps:$4 sm:$0xff]   ;;  %v2696_v18 = vld [vmem:[%s4072_s1 + $0x60] ss:$16 sps:$4 sm:$0xff]  }
   0xa   :  { %v2694_v17 = vld [vmem:[%s4072_s1 + $0x264] ss:$16 sps:$4 sm:$0xff]   ;;  %v2697_v19 = vld [vmem:[%s4072_s1 + $0x260] ss:$16 sps:$4 sm:$0xff]  }
   0xb   :  { %1644 = vmatpush1.bf16.msra.mxu0 %v2684_v10  ;;  %v2698_v20 = vld [vmem:[%s4072_s1 + $0x44] ss:$16 sps:$4 sm:$0xff]   ;;  %v2702_v22 = vld [vmem:[%s4072_s1 + $0x40] ss:$16 sps:$4 sm:$0xff]  }
   0xc   :  { %1685 = vmatpush1.bf16.msra.mxu1 %v2685_v11  ;;  %1645 = vmatprep.subr.bf16.mxu0 %v2686_v12  ;;  %v2700_v21 = vld [vmem:[%s4072_s1 + $0x244] ss:$16 sps:$4 sm:$0xff]   ;;  %v2703_v23 = vld [vmem:[%s4072_s1 + $0x240] ss:$16 sps:$4 sm:$0xff]  }
   0xd   :  { %1686 = vmatprep.subr.bf16.mxu1 %v2688_v13  ;;  %v2704_v24 = vld [vmem:[%s4072_s1 + $0x24] ss:$16 sps:$4 sm:$0xff]   ;;  %v2708_v26 = vld [vmem:[%s4072_s1 + $0x20] ss:$16 sps:$4 sm:$0xff]  }
   0xe   :  { %v2706_v25 = vld [vmem:[%s4072_s1 + $0x224] ss:$16 sps:$4 sm:$0xff]   ;;  %v2709_v27 = vld [vmem:[%s4072_s1 + $0x220] ss:$16 sps:$4 sm:$0xff]  }
   0xf   :  { %1646 = vmatpush1.bf16.msra.mxu0 %v2690_v14  ;;  %v2710_v28 = vld [vmem:[%s4072_s1 + $0x4] ss:$16 sps:$4 sm:$0xff]   ;;  %v2714_v30 = vld [vmem:[%s4072_s1] ss:$16 sps:$4 sm:$0xff]  }
  0x10   :  { %1687 = vmatpush1.bf16.msra.mxu1 %v2691_v15  ;;  %1647 = vmatprep.subr.bf16.mxu0 %v2692_v16  ;;  %v2712_v29 = vld [vmem:[%s4072_s1 + $0x204] ss:$16 sps:$4 sm:$0xff]   ;;  %v2715_v31 = vld [vmem:[%s4072_s1 + $0x200] ss:$16 sps:$4 sm:$0xff]  }
  0x11   :  { %1688 = vmatprep.subr.bf16.mxu1 %v2694_v17  ;;  %v2716_v32 = vld [vmem:[%s4072_s1 + $0x1e4] ss:$16 sps:$4 sm:$0xff]   ;;  %v2720_v34 = vld [vmem:[%s4072_s1 + $0x1e0] ss:$16 sps:$4 sm:$0xff]  }
  0x12   :  { %v2718_v33 = vld [vmem:[%s4072_s1 + $0x3e4] ss:$16 sps:$4 sm:$0xff]   ;;  %v2721_v35 = vld [vmem:[%s4072_s1 + $0x3e0] ss:$16 sps:$4 sm:$0xff]  }
  0x13   :  { %1648 = vmatpush1.bf16.msra.mxu0 %v2696_v18  ;;  %v2722_v39 = vld [vmem:[%s4072_s1 + $0x1c4] ss:$16 sps:$4 sm:$0xff]   ;;  %v2726_v41 = vld [vmem:[%s4072_s1 + $0x1c0] ss:$16 sps:$4 sm:$0xff]  }
  0x14   :  { %1689 = vmatpush1.bf16.msra.mxu1 %v2697_v19  ;;  %1649 = vmatprep.subr.bf16.mxu0 %v2698_v20  ;;  %v2724_v40 = vld [vmem:[%s4072_s1 + $0x3c4] ss:$16 sps:$4 sm:$0xff]   ;;  %v2727_v44 = vld [vmem:[%s4072_s1 + $0x3c0] ss:$16 sps:$4 sm:$0xff]  }
  0x15   :  { %1690 = vmatprep.subr.bf16.mxu1 %v2700_v21  ;;  %v2728_v45 = vld [vmem:[%s4072_s1 + $0x1a4] ss:$16 sps:$4 sm:$0xff]   ;;  %v2732_v47 = vld [vmem:[%s4072_s1 + $0x1a0] ss:$16 sps:$4 sm:$0xff]  }
  0x16   :  { %v2730_v46 = vld [vmem:[%s4072_s1 + $0x3a4] ss:$16 sps:$4 sm:$0xff]   ;;  %v2733_v48 = vld [vmem:[%s4072_s1 + $0x3a0] ss:$16 sps:$4 sm:$0xff]  }
  0x17   :  { %1650 = vmatpush1.bf16.msra.mxu0 %v2702_v22  ;;  %v2734_v50 = vld [vmem:[%s4072_s1 + $0x184] ss:$16 sps:$4 sm:$0xff]   ;;  %v2738_v53 = vld [vmem:[%s4072_s1 + $0x180] ss:$16 sps:$4 sm:$0xff]  }
  0x18   :  { %1691 = vmatpush1.bf16.msra.mxu1 %v2703_v23  ;;  %1651 = vmatprep.subr.bf16.mxu0 %v2704_v24  ;;  %v2736_v51 = vld [vmem:[%s4072_s1 + $0x384] ss:$16 sps:$4 sm:$0xff]   ;;  %v2739_v56 = vld [vmem:[%s4072_s1 + $0x380] ss:$16 sps:$4 sm:$0xff]  }
  0x19   :  { %1692 = vmatprep.subr.bf16.mxu1 %v2706_v25  ;;  %v22_v52 = vld [vmem:[%s4071_s0] sm:$0xff] }
  0x1a   :  { %v309_v54 = vrot.slane %v22_v52, %v308_v49  ;;  %v302_v55 = vcombine.high %v22_v52, %v22_v52  ;;  %v2740_v57 = vld [vmem:[%s4072_s1 + $0x164] ss:$16 sps:$4 sm:$0xff]   ;;  %v2744_v61 = vld [vmem:[%s4072_s1 + $0x160] ss:$16 sps:$4 sm:$0xff]  }
  0x1b   :  { %1652 = vmatpush1.bf16.msra.mxu0 %v2708_v26  ;;  %v2742_v58 = vld [vmem:[%s4072_s1 + $0x364] ss:$16 sps:$4 sm:$0xff]   ;;  %v2745_v0 = vld [vmem:[%s4072_s1 + $0x360] ss:$16 sps:$4 sm:$0xff]  }
  0x1c   :  { %1693 = vmatpush1.bf16.msra.mxu1 %v2709_v27  ;;  %1653 = vmatprep.subr.bf16.mxu0 %v2710_v28  ;;  %v317_v59 = vcombine.high %v309_v54, %v309_v54  ;;  %v316_v60 = vrot.slane %v302_v55, %v308_v49  ;;  %v2746_v1 = vld [vmem:[%s4072_s1 + $0x144] ss:$16 sps:$4 sm:$0xff]   ;;  %v2750_v4 = vld [vmem:[%s4072_s1 + $0x140] ss:$16 sps:$4 sm:$0xff]   ;;  %v3344_v14 = vrot.slane %v309_v54, %v308_v49 }
  0x1d   :  { %1694 = vmatprep.subr.bf16.mxu1 %v2712_v29  ;;  %v2748_v2 = vld [vmem:[%s4072_s1 + $0x344] ss:$16 sps:$4 sm:$0xff]   ;;  %v2751_v5 = vld [vmem:[%s4072_s1 + $0x340] ss:$16 sps:$4 sm:$0xff]  }
  0x1e   :  { %v3298_v62 = vrot.slane %v317_v59, %v308_v49  ;;  %v3300_v63 = vrot.slane %v316_v60, %v308_v49  ;;  %v2752_v6 = vld [vmem:[%s4072_s1 + $0x124] ss:$16 sps:$4 sm:$0xff]   ;;  %v2756_v8 = vld [vmem:[%s4072_s1 + $0x120] ss:$16 sps:$4 sm:$0xff]   ;;  %v318_v12 = vcombine.high %v316_v60, %v316_v60  ;;  %v3359_v19 = vcombine.high %v3344_v14, %v3344_v14 }
  0x1f   :  { %1654 = vmatpush1.bf16.msra.mxu0 %v2714_v30  ;;  %v2754_v7 = vld [vmem:[%s4072_s1 + $0x324] ss:$16 sps:$4 sm:$0xff]   ;;  %v2757_v9 = vld [vmem:[%s4072_s1 + $0x320] ss:$16 sps:$4 sm:$0xff]  }
  0x20   :  { %1695 = vmatpush1.bf16.msra.mxu1 %v2715_v31  ;;  %1655 = vmatprep.subr.bf16.mxu0 %v2716_v32  ;;  %v3313_v3 = vcombine.high %v3298_v62, %v3298_v62  ;;  %v2758_v10 = vld [vmem:[%s4072_s1 + $0x104] ss:$16 sps:$4 sm:$0xff]   ;;  %v2762_v13 = vld [vmem:[%s4072_s1 + $0x100] ss:$16 sps:$4 sm:$0xff]   ;;  %v3355_v18 = vrot.slane %v318_v12, %v308_v49 }
  0x21   :  { %1696 = vmatprep.subr.bf16.mxu1 %v2718_v33  ;;  %1671 = vmatprep.mubr.bf16.mxu0 %v3298_v62  ;;  %v2760_v11 = vld [vmem:[%s4072_s1 + $0x304] ss:$16 sps:$4 sm:$0xff]   ;;  %v2763_v15 = vld [vmem:[%s4072_s1 + $0x300] ss:$16 sps:$4 sm:$0xff]  }
  0x22   :  { %1712 = vmatprep.mubr.bf16.mxu1 %v3313_v3  ;;  %v2766_v16 = vld [vmem:[%s4072_s1 + $0x4e4] ss:$16 sps:$4 sm:$0xff]   ;;  %v2764_v20 = vld [vmem:[%s4072_s1 + $0x4e0] ss:$16 sps:$4 sm:$0xff]   ;;  %v3375_v24 = vcombine.high %v3355_v18, %v3355_v18 }
  0x23   :  { %1656 = vmatpush2.bf16.msra.mxu0 %v2720_v34  ;;  %v2769_v17 = vld [vmem:[%s4072_s1 + $0x6e4] ss:$16 sps:$4 sm:$0xff]   ;;  %v2767_v21 = vld [vmem:[%s4072_s1 + $0x6e0] ss:$16 sps:$4 sm:$0xff]  }
  0x24   :  { %1697 = vmatpush2.bf16.msra.mxu1 %v2721_v35  ;;  %1657 = vmatprep.subr.bf16.mxu0 %v2722_v39  ;;  %v2772_v22 = vld [vmem:[%s4072_s1 + $0x4c4] ss:$16 sps:$4 sm:$0xff]   ;;  %v2770_v25 = vld [vmem:[%s4072_s1 + $0x4c0] ss:$16 sps:$4 sm:$0xff]  }
  0x25   :  { %1698 = vmatprep.subr.bf16.mxu1 %v2724_v40  ;;  %v2775_v23 = vld [vmem:[%s4072_s1 + $0x6c4] ss:$16 sps:$4 sm:$0xff]   ;;  %v2773_v26 = vld [vmem:[%s4072_s1 + $0x6c0] ss:$16 sps:$4 sm:$0xff]  }
  0x26   :  { %v2778_v27 = vld [vmem:[%s4072_s1 + $0x4a4] ss:$16 sps:$4 sm:$0xff]   ;;  %v2776_v29 = vld [vmem:[%s4072_s1 + $0x4a0] ss:$16 sps:$4 sm:$0xff]  }
  0x27   :  { %1658 = vmatpush2.bf16.msra.mxu0 %v2726_v41  ;;  %v2781_v28 = vld [vmem:[%s4072_s1 + $0x6a4] ss:$16 sps:$4 sm:$0xff]   ;;  %v2779_v30 = vld [vmem:[%s4072_s1 + $0x6a0] ss:$16 sps:$4 sm:$0xff]  }
  0x28   :  { %1699 = vmatpush2.bf16.msra.mxu1 %v2727_v44  ;;  %1659 = vmatprep.subr.bf16.mxu0 %v2728_v45  ;;  %v2784_v31 = vld [vmem:[%s4072_s1 + $0x484] ss:$16 sps:$4 sm:$0xff]   ;;  %v2782_v33 = vld [vmem:[%s4072_s1 + $0x480] ss:$16 sps:$4 sm:$0xff]  }
  0x29   :  { %1700 = vmatprep.subr.bf16.mxu1 %v2730_v46  ;;  %v2787_v32 = vld [vmem:[%s4072_s1 + $0x684] ss:$16 sps:$4 sm:$0xff]   ;;  %v2785_v34 = vld [vmem:[%s4072_s1 + $0x680] ss:$16 sps:$4 sm:$0xff]  }
  0x2a   :  { %v2790_v35 = vld [vmem:[%s4072_s1 + $0x464] ss:$16 sps:$4 sm:$0xff]   ;;  %v2788_v37 = vld [vmem:[%s4072_s1 + $0x460] ss:$16 sps:$4 sm:$0xff]  }
  0x2b   :  { %1660 = vmatpush2.bf16.msra.mxu0 %v2732_v47  ;;  %v2793_v36 = vld [vmem:[%s4072_s1 + $0x664] ss:$16 sps:$4 sm:$0xff]   ;;  %v2791_v38 = vld [vmem:[%s4072_s1 + $0x660] ss:$16 sps:$4 sm:$0xff]  }
  0x2c   :  { %1701 = vmatpush2.bf16.msra.mxu1 %v2733_v48  ;;  %1661 = vmatprep.subr.bf16.mxu0 %v2734_v50  ;;  %v2796_v39 = vld [vmem:[%s4072_s1 + $0x444] ss:$16 sps:$4 sm:$0xff]   ;;  %v2794_v41 = vld [vmem:[%s4072_s1 + $0x440] ss:$16 sps:$4 sm:$0xff]  }
  0x2d   :  { %1702 = vmatprep.subr.bf16.mxu1 %v2736_v51  ;;  %v2799_v40 = vld [vmem:[%s4072_s1 + $0x644] ss:$16 sps:$4 sm:$0xff]   ;;  %v2797_v43 = vld [vmem:[%s4072_s1 + $0x640] ss:$16 sps:$4 sm:$0xff]  }
  0x2e   :  { %v2802_v44 = vld [vmem:[%s4072_s1 + $0x424] ss:$16 sps:$4 sm:$0xff]   ;;  %v2800_v46 = vld [vmem:[%s4072_s1 + $0x420] ss:$16 sps:$4 sm:$0xff]  }
  0x2f   :  { %1662 = vmatpush2.bf16.msra.mxu0 %v2738_v53  ;;  %v2805_v45 = vld [vmem:[%s4072_s1 + $0x624] ss:$16 sps:$4 sm:$0xff]   ;;  %v2803_v47 = vld [vmem:[%s4072_s1 + $0x620] ss:$16 sps:$4 sm:$0xff]  }
  0x30   :  { %1703 = vmatpush2.bf16.msra.mxu1 %v2739_v56  ;;  %1663 = vmatprep.subr.bf16.mxu0 %v2740_v57  ;;  %v2808_v48 = vld [vmem:[%s4072_s1 + $0x404] ss:$16 sps:$4 sm:$0xff]   ;;  %v2806_v50 = vld [vmem:[%s4072_s1 + $0x400] ss:$16 sps:$4 sm:$0xff]  }
  0x31   :  { %1704 = vmatprep.subr.bf16.mxu1 %v2742_v58  ;;  %v2811_v49 = vld [vmem:[%s4072_s1 + $0x604] ss:$16 sps:$4 sm:$0xff]   ;;  %v2809_v51 = vld [vmem:[%s4072_s1 + $0x600] ss:$16 sps:$4 sm:$0xff]  }
  0x32   :  { %v2814_v52 = vld [vmem:[%s4072_s1 + $0x5e4] ss:$16 sps:$4 sm:$0xff]   ;;  %v2812_v54 = vld [vmem:[%s4072_s1 + $0x5e0] ss:$16 sps:$4 sm:$0xff]  }
  0x33   :  { %1664 = vmatpush2.bf16.msra.mxu0 %v2744_v61  ;;  %v2817_v53 = vld [vmem:[%s4072_s1 + $0x7e4] ss:$16 sps:$4 sm:$0xff]   ;;  %v2815_v55 = vld [vmem:[%s4072_s1 + $0x7e0] ss:$16 sps:$4 sm:$0xff]  }
  0x34   :  { %1705 = vmatpush2.bf16.msra.mxu1 %v2745_v0  ;;  %1665 = vmatprep.subr.bf16.mxu0 %v2746_v1  ;;  %v2820_v56 = vld [vmem:[%s4072_s1 + $0x5c4] ss:$16 sps:$4 sm:$0xff]   ;;  %v2818_v58 = vld [vmem:[%s4072_s1 + $0x5c0] ss:$16 sps:$4 sm:$0xff]  }
  0x35   :  { %1706 = vmatprep.subr.bf16.mxu1 %v2748_v2  ;;  %v2823_v57 = vld [vmem:[%s4072_s1 + $0x7c4] ss:$16 sps:$4 sm:$0xff]   ;;  %v2821_v59 = vld [vmem:[%s4072_s1 + $0x7c0] ss:$16 sps:$4 sm:$0xff]  }
  0x36   :  { %v2826_v60 = vld [vmem:[%s4072_s1 + $0x5a4] ss:$16 sps:$4 sm:$0xff]   ;;  %v2824_v0 = vld [vmem:[%s4072_s1 + $0x5a0] ss:$16 sps:$4 sm:$0xff]  }
  0x37   :  { %1666 = vmatpush2.bf16.msra.mxu0 %v2750_v4  ;;  %v2829_v61 = vld [vmem:[%s4072_s1 + $0x7a4] ss:$16 sps:$4 sm:$0xff]   ;;  %v2827_v1 = vld [vmem:[%s4072_s1 + $0x7a0] ss:$16 sps:$4 sm:$0xff]  }
  0x38   :  { %1707 = vmatpush2.bf16.msra.mxu1 %v2751_v5  ;;  %1667 = vmatprep.subr.bf16.mxu0 %v2752_v6  ;;  %v2832_v2 = vld [vmem:[%s4072_s1 + $0x584] ss:$16 sps:$4 sm:$0xff]   ;;  %v2830_v5 = vld [vmem:[%s4072_s1 + $0x580] ss:$16 sps:$4 sm:$0xff]  }
  0x39   :  { %1708 = vmatprep.subr.bf16.mxu1 %v2754_v7  ;;  %v2835_v4 = vld [vmem:[%s4072_s1 + $0x784] ss:$16 sps:$4 sm:$0xff]   ;;  %v2833_v6 = vld [vmem:[%s4072_s1 + $0x780] ss:$16 sps:$4 sm:$0xff]  }
  0x3a   :  { %v2838_v7 = vld [vmem:[%s4072_s1 + $0x564] ss:$16 sps:$4 sm:$0xff]  }
  0x3b   :  { %1668 = vmatpush2.bf16.msra.mxu0 %v2756_v8  ;;  %v2841_v8 = vld [vmem:[%s4072_s1 + $0x764] ss:$16 sps:$4 sm:$0xff]  }
  0x3c   :  { %1709 = vmatpush2.bf16.msra.mxu1 %v2757_v9  ;;  %1669 = vmatprep.subr.bf16.mxu0 %v2758_v10  ;;  %v2836_v9 = vld [vmem:[%s4072_s1 + $0x560] ss:$16 sps:$4 sm:$0xff]   ;;  %v2847_v12 = vld [vmem:[%s4072_s1 + $0x744] ss:$16 sps:$4 sm:$0xff]  }
  0x3d   :  { %1710 = vmatprep.subr.bf16.mxu1 %v2760_v11  ;;  %v2839_v10 = vld [vmem:[%s4072_s1 + $0x760] ss:$16 sps:$4 sm:$0xff]   ;;  %v2844_v11 = vld [vmem:[%s4072_s1 + $0x544] ss:$16 sps:$4 sm:$0xff]  }
  0x3f   :  { %1670 = vmatpush2.bf16.msra.mxu0 %v2762_v13  ;;  %v2842_v13 = vld [vmem:[%s4072_s1 + $0x540] ss:$16 sps:$4 sm:$0xff]  }
  0x40   :  { %1711 = vmatpush2.bf16.msra.mxu1 %v2763_v15  ;;  %1721 = vmatprep.subr.bf16.mxu0 %v2766_v16  ;;  %v2845_v15 = vld [vmem:[%s4072_s1 + $0x740] ss:$16 sps:$4 sm:$0xff]   ;;  %v2850_v16 = vld [vmem:[%s4072_s1 + $0x524] ss:$16 sps:$4 sm:$0xff]  }
  0x41   :  { %1762 = vmatprep.subr.bf16.mxu1 %v2769_v17  ;;  %v2853_v17 = vld [vmem:[%s4072_s1 + $0x724] ss:$16 sps:$4 sm:$0xff]  }
  0x42   :  { %1672 = vmatmul.mubr.bf16.vlgmr.msra.gmra.mxu0 %v3344_v14 }
  0x43   :  { %1713 = vmatmul.mubr.bf16.vlgmr.msra.gmra.mxu1 %v3359_v19  ;;  %1722 = vmatpush1.bf16.msra.mxu0 %v2764_v20  ;;  %v2848_v20 = vld [vmem:[%s4072_s1 + $0x520] ss:$16 sps:$4 sm:$0xff]  }
  0x44   :  { %1763 = vmatpush1.bf16.msra.mxu1 %v2767_v21  ;;  %1723 = vmatprep.subr.bf16.mxu0 %v2772_v22  ;;  %v2851_v21 = vld [vmem:[%s4072_s1 + $0x720] ss:$16 sps:$4 sm:$0xff]   ;;  %v2856_v22 = vld [vmem:[%s4072_s1 + $0x504] ss:$16 sps:$4 sm:$0xff]  }
  0x45   :  { %1764 = vmatprep.subr.bf16.mxu1 %v2775_v23  ;;  %1753 = vmatprep.mubr.bf16.mxu0 %v3355_v18  ;;  %v2859_v23 = vld [vmem:[%s4072_s1 + $0x704] ss:$16 sps:$4 sm:$0xff]  }
  0x46   :  { %1794 = vmatprep.mubr.bf16.mxu1 %v3375_v24 }
  0x47   :  { %1724 = vmatpush1.bf16.msra.mxu0 %v2770_v25  ;;  %v2854_v25 = vld [vmem:[%s4072_s1 + $0x500] ss:$16 sps:$4 sm:$0xff]  }
  0x48   :  { %1765 = vmatpush1.bf16.msra.mxu1 %v2773_v26  ;;  %1725 = vmatprep.subr.bf16.mxu0 %v2778_v27  ;;  %v2857_v26 = vld [vmem:[%s4072_s1 + $0x700] ss:$16 sps:$4 sm:$0xff]   ;;  %v2863_v27 = vld [vmem:[%s4072_s1 + $0xec] ss:$16 sps:$4 sm:$0xff]  }
  0x49   :  { %1766 = vmatprep.subr.bf16.mxu1 %v2781_v28  ;;  %v2866_v28 = vld [vmem:[%s4072_s1 + $0x2ec] ss:$16 sps:$4 sm:$0xff]  }
  0x4b   :  { %1726 = vmatpush1.bf16.msra.mxu0 %v2776_v29  ;;  %v3563_v29 = vcombine.high %v3300_v63, %v3300_v63 }
  0x4c   :  { %1767 = vmatpush1.bf16.msra.mxu1 %v2779_v30  ;;  %1727 = vmatprep.subr.bf16.mxu0 %v2784_v31  ;;  %v2861_v30 = vld [vmem:[%s4072_s1 + $0xe8] ss:$16 sps:$4 sm:$0xff]  }
  0x4d   :  { %1768 = vmatprep.subr.bf16.mxu1 %v2787_v32  ;;  %v2864_v31 = vld [vmem:[%s4072_s1 + $0x2e8] ss:$16 sps:$4 sm:$0xff]   ;;  %v2869_v32 = vld [vmem:[%s4072_s1 + $0xcc] ss:$16 sps:$4 sm:$0xff]  }
  0x4f   :  { %1728 = vmatpush1.bf16.msra.mxu0 %v2782_v33  ;;  %v2872_v33 = vld [vmem:[%s4072_s1 + $0x2cc] ss:$16 sps:$4 sm:$0xff]  }
  0x50   :  { %1769 = vmatpush1.bf16.msra.mxu1 %v2785_v34  ;;  %1729 = vmatprep.subr.bf16.mxu0 %v2790_v35  ;;  %v2867_v34 = vld [vmem:[%s4072_s1 + $0xc8] ss:$16 sps:$4 sm:$0xff]  }
  0x51   :  { %1770 = vmatprep.subr.bf16.mxu1 %v2793_v36  ;;  %v2870_v35 = vld [vmem:[%s4072_s1 + $0x2c8] ss:$16 sps:$4 sm:$0xff]   ;;  %v2875_v36 = vld [vmem:[%s4072_s1 + $0xac] ss:$16 sps:$4 sm:$0xff]  }
  0x53   :  { %1730 = vmatpush1.bf16.msra.mxu0 %v2788_v37  ;;  %v2878_v37 = vld [vmem:[%s4072_s1 + $0x2ac] ss:$16 sps:$4 sm:$0xff]  }
  0x54   :  { %1771 = vmatpush1.bf16.msra.mxu1 %v2791_v38  ;;  %1731 = vmatprep.subr.bf16.mxu0 %v2796_v39  ;;  %v2873_v38 = vld [vmem:[%s4072_s1 + $0xa8] ss:$16 sps:$4 sm:$0xff]  }
  0x55   :  { %1772 = vmatprep.subr.bf16.mxu1 %v2799_v40  ;;  %v2876_v39 = vld [vmem:[%s4072_s1 + $0x2a8] ss:$16 sps:$4 sm:$0xff]   ;;  %v2881_v40 = vld [vmem:[%s4072_s1 + $0x8c] ss:$16 sps:$4 sm:$0xff]  }
  0x57   :  { %1732 = vmatpush1.bf16.msra.mxu0 %v2794_v41  ;;  %v2882_v41 = vld [vmem:[%s4072_s1 + $0x288] ss:$16 sps:$4 sm:$0xff]  }
  0x58   :  { %1773 = vmatpush1.bf16.msra.mxu1 %v2797_v43  ;;  %1733 = vmatprep.subr.bf16.mxu0 %v2802_v44  ;;  %v2887_v43 = vld [vmem:[%s4072_s1 + $0x6c] ss:$16 sps:$4 sm:$0xff]  }
  0x59   :  { %1774 = vmatprep.subr.bf16.mxu1 %v2805_v45  ;;  %v2890_v44 = vld [vmem:[%s4072_s1 + $0x26c] ss:$16 sps:$4 sm:$0xff]   ;;  %v2885_v45 = vld [vmem:[%s4072_s1 + $0x68] ss:$16 sps:$4 sm:$0xff]  }
  0x5b   :  { %1734 = vmatpush1.bf16.msra.mxu0 %v2800_v46  ;;  %v2888_v46 = vld [vmem:[%s4072_s1 + $0x268] ss:$16 sps:$4 sm:$0xff]  }
  0x5c   :  { %1775 = vmatpush1.bf16.msra.mxu1 %v2803_v47  ;;  %1735 = vmatprep.subr.bf16.mxu0 %v2808_v48  ;;  %v2893_v47 = vld [vmem:[%s4072_s1 + $0x4c] ss:$16 sps:$4 sm:$0xff]  }
  0x5d   :  { %1776 = vmatprep.subr.bf16.mxu1 %v2811_v49  ;;  %v2896_v48 = vld [vmem:[%s4072_s1 + $0x24c] ss:$16 sps:$4 sm:$0xff]   ;;  %v2891_v49 = vld [vmem:[%s4072_s1 + $0x48] ss:$16 sps:$4 sm:$0xff]  }
  0x5f   :  { %1736 = vmatpush1.bf16.msra.mxu0 %v2806_v50  ;;  %v2894_v50 = vld [vmem:[%s4072_s1 + $0x248] ss:$16 sps:$4 sm:$0xff]  }
  0x60   :  { %1777 = vmatpush1.bf16.msra.mxu1 %v2809_v51  ;;  %1737 = vmatprep.subr.bf16.mxu0 %v2814_v52  ;;  %v2899_v51 = vld [vmem:[%s4072_s1 + $0x2c] ss:$16 sps:$4 sm:$0xff]  }
  0x61   :  { %1778 = vmatprep.subr.bf16.mxu1 %v2817_v53  ;;  %v2902_v52 = vld [vmem:[%s4072_s1 + $0x22c] ss:$16 sps:$4 sm:$0xff]   ;;  %v2897_v53 = vld [vmem:[%s4072_s1 + $0x28] ss:$16 sps:$4 sm:$0xff]  }
  0x63   :  { %1738 = vmatpush2.bf16.msra.mxu0 %v2812_v54  ;;  %v2900_v54 = vld [vmem:[%s4072_s1 + $0x228] ss:$16 sps:$4 sm:$0xff]  }
  0x64   :  { %1779 = vmatpush2.bf16.msra.mxu1 %v2815_v55  ;;  %1739 = vmatprep.subr.bf16.mxu0 %v2820_v56  ;;  %v2905_v55 = vld [vmem:[%s4072_s1 + $0xc] ss:$16 sps:$4 sm:$0xff]  }
  0x65   :  { %1780 = vmatprep.subr.bf16.mxu1 %v2823_v57  ;;  %v2908_v56 = vld [vmem:[%s4072_s1 + $0x20c] ss:$16 sps:$4 sm:$0xff]   ;;  %v2903_v57 = vld [vmem:[%s4072_s1 + $0x8] ss:$16 sps:$4 sm:$0xff]  }
  0x67   :  { %1740 = vmatpush2.bf16.msra.mxu0 %v2818_v58  ;;  %v2906_v58 = vld [vmem:[%s4072_s1 + $0x208] ss:$16 sps:$4 sm:$0xff]  }
  0x68   :  { %1781 = vmatpush2.bf16.msra.mxu1 %v2821_v59  ;;  %1741 = vmatprep.subr.bf16.mxu0 %v2826_v60  ;;  %v2911_v59 = vld [vmem:[%s4072_s1 + $0x1ec] ss:$16 sps:$4 sm:$0xff]  }
  0x69   :  { %1782 = vmatprep.subr.bf16.mxu1 %v2829_v61  ;;  %v2914_v60 = vld [vmem:[%s4072_s1 + $0x3ec] ss:$16 sps:$4 sm:$0xff]   ;;  %v2909_v61 = vld [vmem:[%s4072_s1 + $0x1e8] ss:$16 sps:$4 sm:$0xff]  }
  0x6b   :  { %1742 = vmatpush2.bf16.msra.mxu0 %v2824_v0  ;;  %v2912_v0 = vld [vmem:[%s4072_s1 + $0x3e8] ss:$16 sps:$4 sm:$0xff]  }
  0x6c   :  { %1783 = vmatpush2.bf16.msra.mxu1 %v2827_v1  ;;  %1743 = vmatprep.subr.bf16.mxu0 %v2832_v2  ;;  %v2917_v1 = vld [vmem:[%s4072_s1 + $0x1cc] ss:$16 sps:$4 sm:$0xff]  }
  0x6d   :  { %1784 = vmatprep.subr.bf16.mxu1 %v2835_v4  ;;  %v2920_v2 = vld [vmem:[%s4072_s1 + $0x3cc] ss:$16 sps:$4 sm:$0xff]   ;;  %v2915_v4 = vld [vmem:[%s4072_s1 + $0x1c8] ss:$16 sps:$4 sm:$0xff]  }
  0x6f   :  { %1744 = vmatpush2.bf16.msra.mxu0 %v2830_v5  ;;  %v2918_v5 = vld [vmem:[%s4072_s1 + $0x3c8] ss:$16 sps:$4 sm:$0xff]  }
  0x70   :  { %1785 = vmatpush2.bf16.msra.mxu1 %v2833_v6  ;;  %1745 = vmatprep.subr.bf16.mxu0 %v2838_v7  ;;  %v2923_v6 = vld [vmem:[%s4072_s1 + $0x1ac] ss:$16 sps:$4 sm:$0xff]  }
  0x71   :  { %1786 = vmatprep.subr.bf16.mxu1 %v2841_v8  ;;  %v2926_v7 = vld [vmem:[%s4072_s1 + $0x3ac] ss:$16 sps:$4 sm:$0xff]   ;;  %v2921_v8 = vld [vmem:[%s4072_s1 + $0x1a8] ss:$16 sps:$4 sm:$0xff]  }
  0x73   :  { %1746 = vmatpush2.bf16.msra.mxu0 %v2836_v9  ;;  %v2924_v9 = vld [vmem:[%s4072_s1 + $0x3a8] ss:$16 sps:$4 sm:$0xff]  }
  0x74   :  { %1787 = vmatpush2.bf16.msra.mxu1 %v2839_v10  ;;  %1747 = vmatprep.subr.bf16.mxu0 %v2844_v11  ;;  %v2929_v10 = vld [vmem:[%s4072_s1 + $0x18c] ss:$16 sps:$4 sm:$0xff]  }
  0x75   :  { %1788 = vmatprep.subr.bf16.mxu1 %v2847_v12  ;;  %v2932_v11 = vld [vmem:[%s4072_s1 + $0x38c] ss:$16 sps:$4 sm:$0xff]   ;;  %v2927_v12 = vld [vmem:[%s4072_s1 + $0x188] ss:$16 sps:$4 sm:$0xff]  }
  0x77   :  { %1748 = vmatpush2.bf16.msra.mxu0 %v2842_v13  ;;  %v2930_v13 = vld [vmem:[%s4072_s1 + $0x388] ss:$16 sps:$4 sm:$0xff]  }
  0x78   :  { %1789 = vmatpush2.bf16.msra.mxu1 %v2845_v15  ;;  %1749 = vmatprep.subr.bf16.mxu0 %v2850_v16  ;;  %v2935_v15 = vld [vmem:[%s4072_s1 + $0x16c] ss:$16 sps:$4 sm:$0xff]  }
  0x79   :  { %1790 = vmatprep.subr.bf16.mxu1 %v2853_v17  ;;  %v2938_v16 = vld [vmem:[%s4072_s1 + $0x36c] ss:$16 sps:$4 sm:$0xff]   ;;  %v2933_v17 = vld [vmem:[%s4072_s1 + $0x168] ss:$16 sps:$4 sm:$0xff]  }
  0x7b   :  { %1750 = vmatpush2.bf16.msra.mxu0 %v2848_v20  ;;  %v2936_v20 = vld [vmem:[%s4072_s1 + $0x368] ss:$16 sps:$4 sm:$0xff]  }
  0x7c   :  { %1791 = vmatpush2.bf16.msra.mxu1 %v2851_v21  ;;  %1751 = vmatprep.subr.bf16.mxu0 %v2856_v22  ;;  %v2941_v21 = vld [vmem:[%s4072_s1 + $0x14c] ss:$16 sps:$4 sm:$0xff]  }
  0x7d   :  { %1792 = vmatprep.subr.bf16.mxu1 %v2859_v23  ;;  %v2944_v22 = vld [vmem:[%s4072_s1 + $0x34c] ss:$16 sps:$4 sm:$0xff]   ;;  %v2939_v23 = vld [vmem:[%s4072_s1 + $0x148] ss:$16 sps:$4 sm:$0xff]  }
  0x7f   :  { %1752 = vmatpush2.bf16.msra.mxu0 %v2854_v25  ;;  %v2942_v25 = vld [vmem:[%s4072_s1 + $0x348] ss:$16 sps:$4 sm:$0xff]  }
  0x80   :  { %1793 = vmatpush2.bf16.msra.mxu1 %v2857_v26  ;;  %1803 = vmatprep.subr.bf16.mxu0 %v2863_v27  ;;  %v2947_v26 = vld [vmem:[%s4072_s1 + $0x12c] ss:$16 sps:$4 sm:$0xff]  }
  0x81   :  { %1844 = vmatprep.subr.bf16.mxu1 %v2866_v28  ;;  %v2950_v27 = vld [vmem:[%s4072_s1 + $0x32c] ss:$16 sps:$4 sm:$0xff]   ;;  %v2945_v28 = vld [vmem:[%s4072_s1 + $0x128] ss:$16 sps:$4 sm:$0xff]  }
  0x82   :  { %1754 = vmatmul.mubr.bf16.vlgmr.msra.gmra.mxu0 %v3300_v63 }
  0x83   :  { %1795 = vmatmul.mubr.bf16.vlgmr.msra.gmra.mxu1 %v3563_v29  ;;  %1804 = vmatpush1.bf16.msra.mxu0 %v2861_v30  ;;  %v2948_v30 = vld [vmem:[%s4072_s1 + $0x328] ss:$16 sps:$4 sm:$0xff]  }
  0x84   :  { %1845 = vmatpush1.bf16.msra.mxu1 %v2864_v31  ;;  %1805 = vmatprep.subr.bf16.mxu0 %v2869_v32  ;;  %v2953_v31 = vld [vmem:[%s4072_s1 + $0x10c] ss:$16 sps:$4 sm:$0xff]  }
  0x85   :  { %1846 = vmatprep.subr.bf16.mxu1 %v2872_v33  ;;  %1835 = vmatprep.mubr.bf16.mxu0 %v3298_v62  ;;  %v2884_v62 = vld [vmem:[%s4072_s1 + $0x28c] ss:$16 sps:$4 sm:$0xff]   ;;  %v2951_v33 = vld [vmem:[%s4072_s1 + $0x108] ss:$16 sps:$4 sm:$0xff]  }
  0x86   :  { %1876 = vmatprep.mubr.bf16.mxu1 %v3313_v3  ;;  %v2879_v3 = vld [vmem:[%s4072_s1 + $0x88] ss:$16 sps:$4 sm:$0xff]   ;;  %v2956_v32 = vld [vmem:[%s4072_s1 + $0x30c] ss:$16 sps:$4 sm:$0xff]  }
  0x87   :  { %1806 = vmatpush1.bf16.msra.mxu0 %v2867_v34  ;;  %v2954_v34 = vld [vmem:[%s4072_s1 + $0x308] ss:$16 sps:$4 sm:$0xff]  }
  0x88   :  { %1847 = vmatpush1.bf16.msra.mxu1 %v2870_v35  ;;  %1807 = vmatprep.subr.bf16.mxu0 %v2875_v36  ;;  %v2959_v35 = vld [vmem:[%s4072_s1 + $0x4ec] ss:$16 sps:$4 sm:$0xff]  }
  0x89   :  { %1848 = vmatprep.subr.bf16.mxu1 %v2878_v37  ;;  %v2962_v36 = vld [vmem:[%s4072_s1 + $0x6ec] ss:$16 sps:$4 sm:$0xff]   ;;  %v2957_v37 = vld [vmem:[%s4072_s1 + $0x4e8] ss:$16 sps:$4 sm:$0xff]  }
  0x8b   :  { %1808 = vmatpush1.bf16.msra.mxu0 %v2873_v38  ;;  %v2960_v38 = vld [vmem:[%s4072_s1 + $0x6e8] ss:$16 sps:$4 sm:$0xff]  }
  0x8c   :  { %1849 = vmatpush1.bf16.msra.mxu1 %v2876_v39  ;;  %1809 = vmatprep.subr.bf16.mxu0 %v2881_v40  ;;  %v2965_v39 = vld [vmem:[%s4072_s1 + $0x4cc] ss:$16 sps:$4 sm:$0xff]  }
  0x8d   :  { %1850 = vmatprep.subr.bf16.mxu1 %v2884_v62  ;;  %v2968_v40 = vld [vmem:[%s4072_s1 + $0x6cc] ss:$16 sps:$4 sm:$0xff]   ;;  %v2963_v62 = vld [vmem:[%s4072_s1 + $0x4c8] ss:$16 sps:$4 sm:$0xff]  }
  0x8f   :  { %1810 = vmatpush1.bf16.msra.mxu0 %v2879_v3  ;;  %v2966_v3 = vld [vmem:[%s4072_s1 + $0x6c8] ss:$16 sps:$4 sm:$0xff]  }
  0x90   :  { %1851 = vmatpush1.bf16.msra.mxu1 %v2882_v41  ;;  %1811 = vmatprep.subr.bf16.mxu0 %v2887_v43 }
  0x91   :  { %1852 = vmatprep.subr.bf16.mxu1 %v2890_v44 }
  0x93   :  { %1812 = vmatpush1.bf16.msra.mxu0 %v2885_v45 }
  0x94   :  { %1853 = vmatpush1.bf16.msra.mxu1 %v2888_v46  ;;  %1813 = vmatprep.subr.bf16.mxu0 %v2893_v47 }
  0x95   :  { %1854 = vmatprep.subr.bf16.mxu1 %v2896_v48 }
  0x97   :  { %1814 = vmatpush1.bf16.msra.mxu0 %v2891_v49 }
  0x98   :  { %1855 = vmatpush1.bf16.msra.mxu1 %v2894_v50  ;;  %1815 = vmatprep.subr.bf16.mxu0 %v2899_v51 }
  0x99   :  { %1856 = vmatprep.subr.bf16.mxu1 %v2902_v52 }
  0x9b   :  { %1816 = vmatpush1.bf16.msra.mxu0 %v2897_v53 }
  0x9c   :  { %1857 = vmatpush1.bf16.msra.mxu1 %v2900_v54  ;;  %1817 = vmatprep.subr.bf16.mxu0 %v2905_v55 }
  0x9d   :  { %1858 = vmatprep.subr.bf16.mxu1 %v2908_v56 }
  0x9f   :  { %1818 = vmatpush1.bf16.msra.mxu0 %v2903_v57 }
  0xa0   :  { %1859 = vmatpush1.bf16.msra.mxu1 %v2906_v58  ;;  %1819 = vmatprep.subr.bf16.mxu0 %v2911_v59 }
  0xa1   :  { %1860 = vmatprep.subr.bf16.mxu1 %v2914_v60 }
  0xa3   :  { %1820 = vmatpush2.bf16.msra.mxu0 %v2909_v61 }
  0xa4   :  { %1861 = vmatpush2.bf16.msra.mxu1 %v2912_v0  ;;  %1821 = vmatprep.subr.bf16.mxu0 %v2917_v1 }
  0xa5   :  { %1862 = vmatprep.subr.bf16.mxu1 %v2920_v2 }
  0xa7   :  { %1822 = vmatpush2.bf16.msra.mxu0 %v2915_v4 }
  0xa8   :  { %1863 = vmatpush2.bf16.msra.mxu1 %v2918_v5  ;;  %1823 = vmatprep.subr.bf16.mxu0 %v2923_v6 }
  0xa9   :  { %1864 = vmatprep.subr.bf16.mxu1 %v2926_v7 }
  0xab   :  { %1824 = vmatpush2.bf16.msra.mxu0 %v2921_v8 }
  0xac   :  { %1865 = vmatpush2.bf16.msra.mxu1 %v2924_v9  ;;  %1825 = vmatprep.subr.bf16.mxu0 %v2929_v10 }
  0xad   :  { %1866 = vmatprep.subr.bf16.mxu1 %v2932_v11 }
  0xaf   :  { %1826 = vmatpush2.bf16.msra.mxu0 %v2927_v12 }
  0xb0   :  { %1867 = vmatpush2.bf16.msra.mxu1 %v2930_v13  ;;  %1827 = vmatprep.subr.bf16.mxu0 %v2935_v15 }
  0xb1   :  { %1868 = vmatprep.subr.bf16.mxu1 %v2938_v16 }
  0xb3   :  { %1828 = vmatpush2.bf16.msra.mxu0 %v2933_v17 }
  0xb4   :  { %1869 = vmatpush2.bf16.msra.mxu1 %v2936_v20  ;;  %1829 = vmatprep.subr.bf16.mxu0 %v2941_v21 }
  0xb5   :  { %1870 = vmatprep.subr.bf16.mxu1 %v2944_v22 }
  0xb7   :  { %1830 = vmatpush2.bf16.msra.mxu0 %v2939_v23 }
  0xb8   :  { %1871 = vmatpush2.bf16.msra.mxu1 %v2942_v25  ;;  %1831 = vmatprep.subr.bf16.mxu0 %v2947_v26 }
  0xb9   :  { %1872 = vmatprep.subr.bf16.mxu1 %v2950_v27 }
  0xbb   :  { %1832 = vmatpush2.bf16.msra.mxu0 %v2945_v28 }
  0xbc   :  { %1873 = vmatpush2.bf16.msra.mxu1 %v2948_v30  ;;  %1833 = vmatprep.subr.bf16.mxu0 %v2953_v31 }
  0xbd   :  { %1874 = vmatprep.subr.bf16.mxu1 %v2956_v32 }
  0xbf   :  { %1834 = vmatpush2.bf16.msra.mxu0 %v2951_v33 }
  0xc0   :  { %1875 = vmatpush2.bf16.msra.mxu1 %v2954_v34  ;;  %1885 = vmatprep.subr.bf16.mxu0 %v2959_v35 }
  0xc1   :  { %1926 = vmatprep.subr.bf16.mxu1 %v2962_v36 }
  0xc2   :  { %1836 = vmatmul.mubr.bf16.vlgmr.msra.gmra.mxu0 %v3344_v14 }
  0xc3   :  { %1877 = vmatmul.mubr.bf16.vlgmr.msra.gmra.mxu1 %v3359_v19  ;;  %1886 = vmatpush1.bf16.msra.mxu0 %v2957_v37 }
  0xc4   :  { %1927 = vmatpush1.bf16.msra.mxu1 %v2960_v38 }
  0xc5   :  { %10 = vsyncpa [#allocation3], 0  ;;  %1887 = vmatprep.subr.bf16.mxu0 %v2965_v39  ;;  %1928 = vmatprep.subr.bf16.mxu1 %v2968_v40  ;;  %v2971_v41 = vld [vmem:[%s4072_s1 + $0x4ac] ss:$16 sps:$4 sm:$0xff]   ;;  %v2969_v14 = vld [vmem:[%s4072_s1 + $0x4a8] ss:$16 sps:$4 sm:$0xff]  }
  0xc6   :  { %v2974_v43 = vld [vmem:[%s4072_s1 + $0x6ac] ss:$16 sps:$4 sm:$0xff]   ;;  %1917 = vmatprep.mubr.bf16.mxu0 %v3355_v18  ;;  %1958 = vmatprep.mubr.bf16.mxu1 %v3375_v24  ;;  %v2972_v19 = vld [vmem:[%s4072_s1 + $0x6a8] ss:$16 sps:$4 sm:$0xff]   ;;  %v3055_v40 = vld [vmem:[%s4074_s3 + $0x70] sm:$0xff]   ;;  %s3108_s26 = smov [#allocation2]  }
  0xc7   :  { %1888 = vmatpush1.bf16.msra.mxu0 %v2963_v62  ;;  %v2977_v44 = vld [vmem:[%s4072_s1 + $0x48c] ss:$16 sps:$4 sm:$0xff]   ;;  %v2975_v24 = vld [vmem:[%s4072_s1 + $0x488] ss:$16 sps:$4 sm:$0xff]   ;;  %s2325_s27 = sshll.u32 %s3108_s26, 4  ;;  %s2326_s27 = int_to_ptr.vmem [resolvable:$true] %s2325_s27 }
  0xc8   :  { %1929 = vmatpush1.bf16.msra.mxu1 %v2966_v3  ;;  %1889 = vmatprep.subr.bf16.mxu0 %v2971_v41  ;;  %v2980_v18 = vld [vmem:[%s4072_s1 + $0x68c] ss:$16 sps:$4 sm:$0xff]   ;;  %v2978_v45 = vld [vmem:[%s4072_s1 + $0x688] ss:$16 sps:$4 sm:$0xff]   ;;  %v3056_v41 = vld [vmem:[%s4074_s3 + $0x30] sm:$0xff]   ;;  %s3085_s28 = scalar_lea.vmem %s2326_s27, 32  ;;  %p3090_p1 = scmp.lt.s32.totalorder %s2326_s27, %s2326_s27 }
  0xc9   :  { %1930 = vmatprep.subr.bf16.mxu1 %v2974_v43  ;;  %v2983_v46 = vld [vmem:[%s4072_s1 + $0x46c] ss:$16 sps:$4 sm:$0xff]   ;;  %v2981_v48 = vld [vmem:[%s4072_s1 + $0x468] ss:$16 sps:$4 sm:$0xff]   ;;  %p3086_p0 = scmp.ne.s32.totalorder %s2326_s27, %s3085_s28  ;;  %p3091_p2 = scmp.lt.s32.totalorder %s3085_s28, %s3085_s28 }
  0xca   :  { %v2986_v47 = vld [vmem:[%s4072_s1 + $0x66c] ss:$16 sps:$4 sm:$0xff]   ;;  %v2984_v49 = vld [vmem:[%s4072_s1 + $0x668] ss:$16 sps:$4 sm:$0xff]  }
  0xcb   :  { %1890 = vmatpush1.bf16.msra.mxu0 %v2969_v14  ;;  %v2989_v50 = vld [vmem:[%s4072_s1 + $0x44c] ss:$16 sps:$4 sm:$0xff]   ;;  %v2987_v52 = vld [vmem:[%s4072_s1 + $0x448] ss:$16 sps:$4 sm:$0xff]   ;;  %p3092_p3 = por %p3091_p2, %p3090_p1 }
  0xcc   :  { %1931 = vmatpush1.bf16.msra.mxu1 %v2972_v19  ;;  %1891 = vmatprep.subr.bf16.mxu0 %v2977_v44  ;;  %v2992_v51 = vld [vmem:[%s4072_s1 + $0x64c] ss:$16 sps:$4 sm:$0xff]   ;;  %v2990_v53 = vld [vmem:[%s4072_s1 + $0x648] ss:$16 sps:$4 sm:$0xff]  }
  0xcd   :  { %1932 = vmatprep.subr.bf16.mxu1 %v2980_v18  ;;  %v2995_v54 = vld [vmem:[%s4072_s1 + $0x42c] ss:$16 sps:$4 sm:$0xff]   ;;  %v2993_v56 = vld [vmem:[%s4072_s1 + $0x428] ss:$16 sps:$4 sm:$0xff]   ;;  %p3093_p4 = pnand %p3092_p3, %p3086_p0 }
  0xce   :  { %v2998_v55 = vld [vmem:[%s4072_s1 + $0x62c] ss:$16 sps:$4 sm:$0xff]   ;;  %v2996_v57 = vld [vmem:[%s4072_s1 + $0x628] ss:$16 sps:$4 sm:$0xff]  }
  0xcf   :  { %1892 = vmatpush1.bf16.msra.mxu0 %v2975_v24  ;;  %v3001_v58 = vld [vmem:[%s4072_s1 + $0x40c] ss:$16 sps:$4 sm:$0xff]   ;;  %v2999_v60 = vld [vmem:[%s4072_s1 + $0x408] ss:$16 sps:$4 sm:$0xff]  }
  0xd0   :  { %1933 = vmatpush1.bf16.msra.mxu1 %v2978_v45  ;;  %1893 = vmatprep.subr.bf16.mxu0 %v2983_v46  ;;  %v3004_v59 = vld [vmem:[%s4072_s1 + $0x60c] ss:$16 sps:$4 sm:$0xff]   ;;  %v3002_v61 = vld [vmem:[%s4072_s1 + $0x608] ss:$16 sps:$4 sm:$0xff]  }
  0xd1   :  { %1934 = vmatprep.subr.bf16.mxu1 %v2986_v47  ;;  %v3007_v0 = vld [vmem:[%s4072_s1 + $0x5ec] ss:$16 sps:$4 sm:$0xff]   ;;  %v3005_v2 = vld [vmem:[%s4072_s1 + $0x5e8] ss:$16 sps:$4 sm:$0xff]  }
  0xd2   :  { %v3010_v1 = vld [vmem:[%s4072_s1 + $0x7ec] ss:$16 sps:$4 sm:$0xff]   ;;  %v3008_v4 = vld [vmem:[%s4072_s1 + $0x7e8] ss:$16 sps:$4 sm:$0xff]  }
  0xd3   :  { %1894 = vmatpush1.bf16.msra.mxu0 %v2981_v48  ;;  %v3013_v5 = vld [vmem:[%s4072_s1 + $0x5cc] ss:$16 sps:$4 sm:$0xff]   ;;  %v3011_v7 = vld [vmem:[%s4072_s1 + $0x5c8] ss:$16 sps:$4 sm:$0xff]   ;;  %v3071_v48 = vld [vmem:[%s4074_s3 + $0xf0] sm:$0xff]  }
  0xd4   :  { %1935 = vmatpush1.bf16.msra.mxu1 %v2984_v49  ;;  %1895 = vmatprep.subr.bf16.mxu0 %v2989_v50  ;;  %v3016_v6 = vld [vmem:[%s4072_s1 + $0x7cc] ss:$16 sps:$4 sm:$0xff]   ;;  %v3014_v8 = vld [vmem:[%s4072_s1 + $0x7c8] ss:$16 sps:$4 sm:$0xff]   ;;  %v3060_v49 = vld [vmem:[%s4074_s3 + $0x20] sm:$0xff]  }
  0xd5   :  { %1936 = vmatprep.subr.bf16.mxu1 %v2992_v51  ;;  %v3019_v9 = vld [vmem:[%s4072_s1 + $0x5ac] ss:$16 sps:$4 sm:$0xff]   ;;  %v3017_v11 = vld [vmem:[%s4072_s1 + $0x5a8] ss:$16 sps:$4 sm:$0xff]   ;;  %v3072_v50 = vld [vmem:[%s4074_s3 + $0xb0] sm:$0xff]  }
  0xd6   :  { %v3022_v10 = vld [vmem:[%s4072_s1 + $0x7ac] ss:$16 sps:$4 sm:$0xff]   ;;  %v3020_v12 = vld [vmem:[%s4072_s1 + $0x7a8] ss:$16 sps:$4 sm:$0xff]  }
  0xd7   :  { %1896 = vmatpush1.bf16.msra.mxu0 %v2987_v52  ;;  %v3025_v13 = vld [vmem:[%s4072_s1 + $0x58c] ss:$16 sps:$4 sm:$0xff]   ;;  %v3023_v16 = vld [vmem:[%s4072_s1 + $0x588] ss:$16 sps:$4 sm:$0xff]  }
  0xd8   :  { %1937 = vmatpush1.bf16.msra.mxu1 %v2990_v53  ;;  %1897 = vmatprep.subr.bf16.mxu0 %v2995_v54  ;;  %v3028_v15 = vld [vmem:[%s4072_s1 + $0x78c] ss:$16 sps:$4 sm:$0xff]   ;;  %v3026_v17 = vld [vmem:[%s4072_s1 + $0x788] ss:$16 sps:$4 sm:$0xff]  }
  0xd9   :  { %1938 = vmatprep.subr.bf16.mxu1 %v2998_v55  ;;  %v3031_v20 = vld [vmem:[%s4072_s1 + $0x56c] ss:$16 sps:$4 sm:$0xff]   ;;  %v3029_v22 = vld [vmem:[%s4072_s1 + $0x568] ss:$16 sps:$4 sm:$0xff]   ;;  %v3063_v55 = vld [vmem:[%s4074_s3 + $0x50] sm:$0xff]  }
  0xda   :  { %v3034_v21 = vld [vmem:[%s4072_s1 + $0x76c] ss:$16 sps:$4 sm:$0xff]   ;;  %v3032_v23 = vld [vmem:[%s4072_s1 + $0x768] ss:$16 sps:$4 sm:$0xff]  }
  0xdb   :  { %1898 = vmatpush1.bf16.msra.mxu0 %v2993_v56  ;;  %v3037_v25 = vld [vmem:[%s4072_s1 + $0x54c] ss:$16 sps:$4 sm:$0xff]   ;;  %v3035_v27 = vld [vmem:[%s4072_s1 + $0x548] ss:$16 sps:$4 sm:$0xff]   ;;  %v3075_v56 = vld [vmem:[%s4074_s3 + $0xe0] sm:$0xff]  }
  0xdc   :  { %1939 = vmatpush1.bf16.msra.mxu1 %v2996_v57  ;;  %1899 = vmatprep.subr.bf16.mxu0 %v3001_v58  ;;  %v3040_v26 = vld [vmem:[%s4072_s1 + $0x74c] ss:$16 sps:$4 sm:$0xff]   ;;  %v3038_v28 = vld [vmem:[%s4072_s1 + $0x748] ss:$16 sps:$4 sm:$0xff]   ;;  %v3064_v57 = vld [vmem:[%s4074_s3 + $0x10] sm:$0xff]  }
  0xdd   :  { %1940 = vmatprep.subr.bf16.mxu1 %v3004_v59  ;;  %v3043_v30 = vld [vmem:[%s4072_s1 + $0x52c] ss:$16 sps:$4 sm:$0xff]   ;;  %v3041_v32 = vld [vmem:[%s4072_s1 + $0x528] ss:$16 sps:$4 sm:$0xff]   ;;  %v3076_v58 = vld [vmem:[%s4074_s3 + $0xa0] sm:$0xff]  }
  0xde   :  { %v3046_v31 = vld [vmem:[%s4072_s1 + $0x72c] ss:$16 sps:$4 sm:$0xff]   ;;  %v3044_v33 = vld [vmem:[%s4072_s1 + $0x728] ss:$16 sps:$4 sm:$0xff]  }
  0xdf   :  { %1900 = vmatpush1.bf16.msra.mxu0 %v2999_v60  ;;  %v3049_v34 = vld [vmem:[%s4072_s1 + $0x50c] ss:$16 sps:$4 sm:$0xff]   ;;  %v3047_v36 = vld [vmem:[%s4072_s1 + $0x508] ss:$16 sps:$4 sm:$0xff]  }
  0xe0   :  { %1941 = vmatpush1.bf16.msra.mxu1 %v3002_v61  ;;  %1901 = vmatprep.subr.bf16.mxu0 %v3007_v0  ;;  %v3052_v35 = vld [vmem:[%s4072_s1 + $0x70c] ss:$16 sps:$4 sm:$0xff]   ;;  %v3050_v37 = vld [vmem:[%s4072_s1 + $0x708] ss:$16 sps:$4 sm:$0xff]  }
  0xe1   :  { %1942 = vmatprep.subr.bf16.mxu1 %v3010_v1  ;;  %v3053_v38 = vld [vmem:[%s4074_s3 + $0x78] sm:$0xff]   ;;  %v3057_v19 = vld [vmem:[%s4074_s3 + $0x68] sm:$0xff]   ;;  %v3067_v1 = vld [vmem:[%s4074_s3 + $0x40] sm:$0xff]  }
  0xe2   :  { %v3054_v39 = vld [vmem:[%s4074_s3 + $0x38] sm:$0xff]   ;;  %v3073_v52 = vld [vmem:[%s4074_s3 + $0xe8] sm:$0xff]  }
  0xe3   :  { %1902 = vmatpush2.bf16.msra.mxu0 %v3005_v2  ;;  %v3069_v46 = vld [vmem:[%s4074_s3 + $0xf8] sm:$0xff]   ;;  %v3074_v54 = vld [vmem:[%s4074_s3 + $0xa8] sm:$0xff]   ;;  %v3068_v2 = vld [vmem:[%s4074_s3] sm:$0xff]  }
  0xe4   :  { %1943 = vmatpush2.bf16.msra.mxu1 %v3008_v4  ;;  %1903 = vmatprep.subr.bf16.mxu0 %v3013_v5  ;;  %v3070_v47 = vld [vmem:[%s4074_s3 + $0xb8] sm:$0xff]   ;;  %v3065_v59 = vld [vmem:[%s4074_s3 + $0x48] sm:$0xff]   ;;  %v283_v4 = vsub.s32 0, %v3256_v42  ;;  %v279_v5 = vld [vmem:[%s4073_s2] sm:$0xf] }
  0xe5   :  { %1944 = vmatprep.subr.bf16.mxu1 %v3016_v6  ;;  %v3061_v51 = vld [vmem:[%s4074_s3 + $0x58] sm:$0xff]   ;;  %v3066_v61 = vld [vmem:[%s4074_s3 + $0x8] sm:$0xff]   ;;  %v287_v6 = vsub.s32 1, %v3256_v42 }
  0xe6   :  { %v3062_v53 = vld [vmem:[%s4074_s3 + $0x18] sm:$0xff]  }
  0xe7   :  { %1904 = vmatpush2.bf16.msra.mxu0 %v3011_v7  ;;  %v3077_v60 = vld [vmem:[%s4074_s3 + $0xd8] sm:$0xff]   ;;  %v284_v7 = vrot.slane %v279_v5, %v283_v4 }
  0xe8   :  { %1945 = vmatpush2.bf16.msra.mxu1 %v3014_v8  ;;  %1905 = vmatprep.subr.bf16.mxu0 %v3019_v9  ;;  %v3078_v0 = vld [vmem:[%s4074_s3 + $0x98] sm:$0xff]   ;;  %v288_v8 = vrot.slane %v279_v5, %v287_v6 }
  0xe9   :  { %1946 = vmatprep.subr.bf16.mxu1 %v3022_v10 }
  0xeb   :  { %1906 = vmatpush2.bf16.msra.mxu0 %v3017_v11  ;;  %v3079_v11 = vld [vmem:[%s4074_s3 + $0xd0] sm:$0xff]  }
  0xec   :  { %1947 = vmatpush2.bf16.msra.mxu1 %v3020_v12  ;;  %1907 = vmatprep.subr.bf16.mxu0 %v3025_v13  ;;  %v3080_v13 = vld [vmem:[%s4074_s3 + $0x90] sm:$0xff]  }
  0xed   :  { %1948 = vmatprep.subr.bf16.mxu1 %v3028_v15 }
  0xef   :  { %1908 = vmatpush2.bf16.msra.mxu0 %v3023_v16 }
  0xf0   :  { %1949 = vmatpush2.bf16.msra.mxu1 %v3026_v17  ;;  %1909 = vmatprep.subr.bf16.mxu0 %v3031_v20 }
  0xf1   :  { %1950 = vmatprep.subr.bf16.mxu1 %v3034_v21 }
  0xf3   :  { %1910 = vmatpush2.bf16.msra.mxu0 %v3029_v22 }
  0xf4   :  { %1951 = vmatpush2.bf16.msra.mxu1 %v3032_v23  ;;  %1911 = vmatprep.subr.bf16.mxu0 %v3037_v25  ;;  %v3081_v23 = vld [vmem:[%s4074_s3 + $0xc8] sm:$0xff]  }
  0xf5   :  { %1952 = vmatprep.subr.bf16.mxu1 %v3040_v26 }
  0xf7   :  { %1912 = vmatpush2.bf16.msra.mxu0 %v3035_v27  ;;  %v3082_v27 = vld [vmem:[%s4074_s3 + $0x88] sm:$0xff]  }
  0xf8   :  { %1953 = vmatpush2.bf16.msra.mxu1 %v3038_v28  ;;  %1913 = vmatprep.subr.bf16.mxu0 %v3043_v30 }
  0xf9   :  { %1954 = vmatprep.subr.bf16.mxu1 %v3046_v31 }
  0xfb   :  { %1914 = vmatpush2.bf16.msra.mxu0 %v3041_v32 }
  0xfc   :  { %1955 = vmatpush2.bf16.msra.mxu1 %v3044_v33  ;;  %1915 = vmatprep.subr.bf16.mxu0 %v3049_v34 }
  0xfd   :  { %1956 = vmatprep.subr.bf16.mxu1 %v3052_v35  ;;  %v3083_v35 = vld [vmem:[%s4074_s3 + $0xc0] sm:$0xff]  }
  0xff   :  { %1916 = vmatpush2.bf16.msra.mxu0 %v3047_v36 }
 0x100   :  { %1957 = vmatpush2.bf16.msra.mxu1 %v3050_v37  ;;  %2622 = vmatprep.subr.bf16.mxu0 %v3053_v38  ;;  %v3084_v37 = vld [vmem:[%s4074_s3 + $0x80] sm:$0xff]  }
 0x101   :  { %2644 = vmatprep.subr.bf16.mxu1 %v3069_v46 }
 0x102   :  { %v3960_v62 = vpop.f32.mrf.mxu0  ;;  %1918 = vmatmul.mubr.bf16.vlgmr.msra.gmra.mxu0 %v3300_v63  ;;  %v3058_v63 = vld [vmem:[%s4074_s3 + $0x28] sm:$0xff]  }
 0x103   :  { %v3962_v3 = vpop.f32.mrf.mxu1  ;;  %1959 = vmatmul.mubr.bf16.vlgmr.msra.gmra.mxu1 %v3563_v29  ;;  %2623 = vmatpush3.bf16.msra.mxu0 %v3054_v39  ;;  %v3059_v29 = vld [vmem:[%s4074_s3 + $0x60] sm:$0xff]   ;;  %v1674_v9 = vadd.f32 %v3960_v62, %v284_v7 }
 0x104   :  { %v1675_v43 = vpop.f32.mrf.mxu0  ;;  %2624 = vmatprep.subr.bf16.mxu0 %v3055_v40  ;;  %2645 = vmatpush3.bf16.msra.mxu1 %v3070_v47 }
 0x105   :  { %v3969_v14 = vpop.f32.mrf.mxu1  ;;  %2646 = vmatprep.subr.bf16.mxu1 %v3071_v48  ;;  %v1676_v10 = vadd.f32 %v1675_v43, %v288_v8  ;;  %v1715_v12 = vadd.f32 %v3962_v3, %v1674_v9  ;;  %v2589_v8 = vld [vmem:[%s4075_s4] ss:$0 sm:$0xff] }
 0x106   :  { %v1677_v44 = vpop.f32.mrf.mxu0 }
 0x107   :  { %v1718_v18 = vpop.f32.mrf.mxu1  ;;  %2625 = vmatpush3.bf16.msra.mxu0 %v3056_v41  ;;  %v1717_v17 = vadd.f32 %v3969_v14, %v1676_v10 }
 0x108   :  { %v1678_v24 = vpop.f32.mrf.mxu0  ;;  %2626 = vmatprep.subr.bf16.mxu0 %v3057_v19  ;;  %2647 = vmatpush3.bf16.msra.mxu1 %v3072_v50  ;;  %v291_v18 = vsub.s32 2, %v3256_v42 }
 0x109   :  { %v1719_v45 = vpop.f32.mrf.mxu1  ;;  %2648 = vmatprep.subr.bf16.mxu1 %v3073_v52 }
 0x10b   :  { %2627 = vmatpush3.bf16.msra.mxu0 %v3058_v63  ;;  %v295_v63 = vsub.s32 3, %v3256_v42 }
 0x10c   :  { %2628 = vmatprep.subr.bf16.mxu0 %v3059_v29  ;;  %2649 = vmatpush3.bf16.msra.mxu1 %v3074_v54  ;;  %v292_v29 = vrot.slane %v279_v5, %v291_v18 }
 0x10d   :  { %2650 = vmatprep.subr.bf16.mxu1 %v3075_v56  ;;  %v296_v24 = vrot.slane %v279_v5, %v295_v63 }
 0x10f   :  { %2629 = vmatpush3.bf16.msra.mxu0 %v3060_v49 }
 0x110   :  { %2630 = vmatprep.subr.bf16.mxu0 %v3061_v51  ;;  %2651 = vmatpush3.bf16.msra.mxu1 %v3076_v58 }
 0x111   :  { %2652 = vmatprep.subr.bf16.mxu1 %v3077_v60 }
 0x113   :  { %2631 = vmatpush3.bf16.msra.mxu0 %v3062_v53 }
 0x114   :  { %2632 = vmatprep.subr.bf16.mxu0 %v3063_v55  ;;  %2653 = vmatpush3.bf16.msra.mxu1 %v3078_v0 }
 0x115   :  { %2654 = vmatprep.subr.bf16.mxu1 %v3079_v11 }
 0x117   :  { %2633 = vmatpush3.bf16.msra.mxu0 %v3064_v57 }
 0x118   :  { %2634 = vmatprep.subr.bf16.mxu0 %v3065_v59  ;;  %2655 = vmatpush3.bf16.msra.mxu1 %v3080_v13 }
 0x119   :  { %2656 = vmatprep.subr.bf16.mxu1 %v3081_v23 }
 0x11b   :  { %2635 = vmatpush3.bf16.msra.mxu0 %v3066_v61 }
 0x11c   :  { %2636 = vmatprep.subr.bf16.mxu0 %v3067_v1  ;;  %2657 = vmatpush3.bf16.msra.mxu1 %v3082_v27 }
 0x11d   :  { %2658 = vmatprep.subr.bf16.mxu1 %v3083_v35 }
 0x11f   :  { %2637 = vmatpush3.bf16.msra.mxu0 %v3068_v2 }
 0x120   :  { %2659 = vmatpush3.bf16.msra.mxu1 %v3084_v37 }
 0x142   :  { %v1755_v15 = vpop.f32.mrf.mxu0 }
 0x143   :  { %v1796_v16 = vpop.f32.mrf.mxu1  ;;  %v1756_v20 = vadd.f32 %v1755_v15, %v1715_v12 }
 0x144   :  { %v1757_v21 = vpop.f32.mrf.mxu0 }
 0x145   :  { %v1798_v22 = vpop.f32.mrf.mxu1  ;;  %v1797_v25 = vadd.f32 %v1796_v16, %v1756_v20  ;;  %v1758_v26 = vadd.f32 %v1757_v21, %v1717_v17 }
 0x146   :  { %v1759_v28 = vpop.f32.mrf.mxu0 }
 0x147   :  { %v1800_v30 = vpop.f32.mrf.mxu1  ;;  %v1799_v31 = vadd.f32 %v1798_v22, %v1758_v26  ;;  %v1967_v32 = vmax.f32 %v1797_v25, 0.0 }
 0x148   :  { %v1760_v33 = vpop.f32.mrf.mxu0 }
 0x149   :  { %v1801_v34 = vpop.f32.mrf.mxu1  ;;  %v1968_v36 = vmax.f32 %v1799_v31, 0.0  ;;  %v1971_v39 = vpack.c.bf16 %v1967_v32, %v1967_v32 }
 0x14b   :  { %v1972_v38 = vpack.c.bf16 %v1968_v36, %v1968_v36 }
 0x14d   :  { %2270 = vmatprep.mubr.bf16.mxu0 %v1972_v38 }
 0x14e   :  { %2271 = vmatmul.mubr.bf16.vlgmr.msra.gmra.mxu0 %v1971_v39 }
 0x182   :  { %v1837_v40 = vpop.f32.mrf.mxu0 }
 0x183   :  { %v1878_v62 = vpop.f32.mrf.mxu1  ;;  %v1838_v45 = vadd.f32 %v1837_v40, %v292_v29 }
 0x184   :  { %v1839_v3 = vpop.f32.mrf.mxu0 }
 0x185   :  { %v1880_v41 = vpop.f32.mrf.mxu1  ;;  %v1840_v46 = vadd.f32 %v1839_v3, %v296_v24  ;;  %v1879_v47 = vadd.f32 %v1878_v62, %v1838_v45 }
 0x186   :  { %v1841_v43 = vpop.f32.mrf.mxu0 }
 0x187   :  { %v1882_v14 = vpop.f32.mrf.mxu1  ;;  %v1881_v50 = vadd.f32 %v1880_v41, %v1840_v46 }
 0x188   :  { %v1842_v19 = vpop.f32.mrf.mxu0 }
 0x189   :  { %v1883_v44 = vpop.f32.mrf.mxu1 }
 0x1c2   :  { %v1919_v48 = vpop.f32.mrf.mxu0 }
 0x1c3   :  { %v1960_v49 = vpop.f32.mrf.mxu1  ;;  %v1920_v51 = vadd.f32 %v1919_v48, %v1879_v47 }
 0x1c4   :  { %v1921_v52 = vpop.f32.mrf.mxu0 }
 0x1c5   :  { %v1962_v53 = vpop.f32.mrf.mxu1  ;;  %v1961_v54 = vadd.f32 %v1960_v49, %v1920_v51  ;;  %v1922_v55 = vadd.f32 %v1921_v52, %v1881_v50 }
 0x1c6   :  { %v1923_v56 = vpop.f32.mrf.mxu0 }
 0x1c7   :  { %v1964_v57 = vpop.f32.mrf.mxu1  ;;  %v1963_v58 = vadd.f32 %v1962_v53, %v1922_v55  ;;  %v1969_v59 = vmax.f32 %v1961_v54, 0.0 }
 0x1c8   :  { %v1924_v60 = vpop.f32.mrf.mxu0 }
 0x1c9   :  { %v1965_v61 = vpop.f32.mrf.mxu1  ;;  %v1970_v42 = vmax.f32 %v1963_v58, 0.0  ;;  %v1973_v1 = vpack.c.bf16 %v1969_v59, %v1969_v59 }
 0x1cb   :  { %v1974_v0 = vpack.c.bf16 %v1970_v42, %v1970_v42 }
 0x1cd   :  { %2310 = vmatprep.mubr.bf16.mxu1 %v1974_v0 }
 0x1ce   :  { %2311 = vmatmul.mubr.bf16.vlgmr.msra.gmra.mxu1 %v1973_v1 }
 0x20e   :  { %v2638_v2 = vpop.f32.mrf.mxu0 }
 0x210   :  { %v2639_v4 = vpop.f32.mrf.mxu0 }
 0x211   :  { %v2640_v5 = vadd.f32 %v2639_v4, %v2638_v2 }
 0x212   :  { %v2641_v6 = vpop.f32.mrf.mxu0 }
 0x213   :  { %v2273_v11 = vadd.f32 %v2640_v5, %v2589_v8 }
 0x214   :  { %v2642_v7 = vpop.f32.mrf.mxu0 }
 0x28e   :  { %v2660_v9 = vpop.f32.mrf.mxu1 }
 0x290   :  { %v2661_v10 = vpop.f32.mrf.mxu1 }
 0x291   :  { %v2662_v12 = vadd.f32 %v2661_v10, %v2660_v9 }
 0x292   :  { %v2663_v13 = vpop.f32.mrf.mxu1 }
 0x293   :  { %v2313_v15 = vadd.f32 %v2662_v12, %v2273_v11 }
 0x294   :  { %v2664_v16 = vpop.f32.mrf.mxu1 }
 0x295   :  { %2318 = vst [vmem:[#allocation2] sm:$0x3] %v2313_v15 }
 0x296   :  { %3096 = shalt.err (!%p3093_p4)
}
 0x297   :  { %2328 = dma.vmem_to_hbm [thread:$0]  %s2326_s27, 32, %s4076_s5, [#allocation3]  }
 0x298   :  { %3105 = dma.done.wait [#allocation3], 32  }
 0x299   :  { %3106 = vsyncadd [#allocation3], 4294967264 }
 0x29a   :  { %2332 = vsyncpa [#allocation3], 1 }

</bundles_post_ra>
